<compile_context>
chip_gen: v7x
topology: tpu7x:2x2x1
jax: 0.10.0
libtpu: 0.0.40
codegen_flags: <defaults>
</compile_context>

<pallas_src>
import functools

import numpy as np

import jax
import jax.numpy as jnp
from jax.experimental import pallas as pl
from jax.experimental.pallas import tpu as pltpu

IMG = 28            # MNIST-style input, (B, 1, 28, 28)
C1, C2 = 20, 50     # conv channel counts
K = 5               # conv kernel size
L_IN = 256          # conv1 im2col lanes: lane = dy*28 + col   (140 used)
L1 = 256            # pooled1 packed lanes: lane = 20*jx + c   (240 used)
L2 = 256            # pooled2 packed lanes: lane = 50*w  + c2  (200 used)
LOUT = 512          # fc1 output lanes (500 used, padded for lane-dense stores)
ENC_OUT = 500
DROPOUT_P = 0.5


# ----------------------------------------------------------------------------
# Host-side (one-time) weight re-packing: conv/fc -> banded matmul matrices.
# ----------------------------------------------------------------------------
def build_params(w1, b1, w2, b2, wfc, bfc):
    """w1:(20,1,5,5) b1:(20,) w2:(50,20,5,5) b2:(50,) wfc:(500,800) bfc:(500,)."""
    w1 = np.asarray(w1, np.float32)
    b1 = np.asarray(b1, np.float32)
    w2 = np.asarray(w2, np.float32)
    b2 = np.asarray(b2, np.float32)
    wfc = np.asarray(wfc, np.float32)
    bfc = np.asarray(bfc, np.float32)

    # conv1 (dy folded into K, parity folded into N):
    #   in lane  = dy*28 + col                          (col = x + dx)
    #   out lane = parity*256 + 20*j + c     for output x = 2*j + parity
    m1 = np.zeros((L_IN, 2 * L1), np.float32)
    for par in range(2):
        for j in range(12):
            x = 2 * j + par
            for dy in range(K):
                for dx in range(K):
                    m1[dy * IMG + x + dx,
                       par * L1 + C1 * j: par * L1 + C1 * j + C1] = w1[:, 0, dy, dx]
    b1row = np.zeros((1, 2 * L1), np.float32)
    for par in range(2):
        b1row[0, par * L1: par * L1 + 12 * C1] = np.tile(b1, 12)

    # conv2 (one matrix per dy tap, parity folded into N):
    #   in lane  = 20*jx + ci   (pooled1 x index jx = x2 + dx)
    #   out lane = parity*256 + 50*w + c2    for output x2 = 2*w + parity
    m2 = np.zeros((K, L1, 2 * L2), np.float32)
    for dy in range(K):
        for par in range(2):
            for w in range(4):
                x2 = 2 * w + par
                for dx in range(K):
                    jx = x2 + dx
                    m2[dy, C1 * jx: C1 * jx + C1,
                       par * L2 + C2 * w: par * L2 + C2 * w + C2] = w2[:, :, dy, dx].T
    b2row = np.zeros((1, 2 * L2), np.float32)
    for par in range(2):
        b2row[0, par * L2: par * L2 + 4 * C2] = np.tile(b2, 4)

    # fc1 (pooled2 rows h folded into K):
    #   in lane = h*256 + 50*w + c2 ;  PyTorch flatten index = c2*16 + h*4 + w
    m3 = np.zeros((4 * L2, LOUT), np.float32)
    wr = wfc.reshape(ENC_OUT, C2, 4, 4)           # [o, c2, h, w]
    for h in range(4):
        for w in range(4):
            m3[h * L2 + C2 * w: h * L2 + C2 * w + C2, :ENC_OUT] = wr[:, :, h, w].T
    b3row = np.zeros((1, LOUT), np.float32)
    b3row[0, :ENC_OUT] = bfc

    # Dropout2d: channel keep-lane -> packed conv2-output-lane replication.
    rep = np.zeros((128, 2 * L2), np.float32)
    for c in range(C2):
        for par in range(2):
            for w in range(4):
                rep[c, par * L2 + C2 * w + c] = 1.0

    bf = lambda a: jnp.asarray(a, jnp.bfloat16)     # MXU operands
    fp = lambda a: jnp.asarray(a, jnp.float32)      # biases (added in f32)
    return (bf(m1), fp(b1row), bf(m2), fp(b2row), bf(m3), fp(b3row), bf(rep))


# ----------------------------------------------------------------------------
# The fused kernel (one batch tile per grid step).
# ----------------------------------------------------------------------------
def _lenet_encoder_kernel(*refs, tile_b, training, p_drop):
    if training:
        (seed_ref, x_ref, m1_ref, b1_ref, m2_ref, b2_ref,
         m3_ref, b3_ref, rep_ref, o_ref) = refs
    else:
        (x_ref, m1_ref, b1_ref, m2_ref, b2_ref, m3_ref, b3_ref, o_ref) = refs
        seed_ref = rep_ref = None

    f32, bf16 = jnp.float32, jnp.bfloat16
    B = tile_b

    # ---- conv1: one deep matmul (dy folded into K, parity folded into N) ----
    # x_ref: (24, B, 256): rows = output y, sublanes = batch, lanes = dy*28+col.
    lhs1 = x_ref[...].reshape(24 * B, L_IN).astype(bf16)
    a1 = jnp.dot(lhs1, m1_ref[...], preferred_element_type=f32) + b1_ref[...]
    # a1: (24B, 512); even-x outputs in lanes 0:256, odd-x outputs in 256:512.

    # ---- MaxPool2d(2) then ReLU (module order) -------------------------------
    p1 = jnp.maximum(a1[:, :L1], a1[:, L1:])       # width pool (parity halves)
    p1 = p1.reshape(12, 2, B, L1)
    p1 = jnp.maximum(p1[:, 0], p1[:, 1])           # height pool (row pairs)
    p1 = jnp.maximum(p1, 0.0).astype(bf16)         # ReLU; bf16 to feed the MXU
    # p1: (12, B, 256); lane = 20*jx + cin for pooled x index jx.

    # ---- conv2: 5 dy taps, parity folded into the 512 output lanes ----------
    a2 = b2_ref[...]                                # (1, 512) f32, broadcasts
    for dy in range(K):
        lhs2 = p1[dy:dy + 8].reshape(8 * B, L1)
        a2 = a2 + jnp.dot(lhs2, m2_ref[dy], preferred_element_type=f32)
    # a2: (8B, 512); even-x2 outputs in lanes 0:256, odd-x2 in 256:512.

    # ---- Dropout2d (training only): zero whole channels, scale by 1/(1-p) ---
    if training and p_drop > 0.0:
        pltpu.prng_seed(seed_ref[0] + pl.program_id(0))     # distinct stream/tile
        bits = pltpu.bitcast(pltpu.prng_random_bits((B, 128)), jnp.uint32)
        thresh = jnp.uint32(min(int(round((1.0 - p_drop) * 2.0 ** 32)), 2 ** 32 - 1))
        keep = (bits < thresh).astype(bf16)                 # (B, 128): lane c = channel
        chan = jnp.dot(keep, rep_ref[...],
                       preferred_element_type=f32) * (1.0 / (1.0 - p_drop))
        a2 = (a2.reshape(8, B, 2 * L2) * chan[None]).reshape(8 * B, 2 * L2)
    # TODO(synk): training-mode Dropout2d uses the TPU PRNG stream, so masks are
    # statistically equivalent but not bit-identical to torch's RNG.

    # ---- MaxPool2d(2) then ReLU ----------------------------------------------
    p2 = jnp.maximum(a2[:, :L2], a2[:, L2:])       # width pool (parity halves)
    p2 = p2.reshape(4, 2, B, L2)
    p2 = jnp.maximum(p2[:, 0], p2[:, 1])           # height pool (row pairs)
    p2 = jnp.maximum(p2, 0.0).astype(bf16)
    # p2: (4, B, 256); lane = 50*w + c2 for pooled x index w.

    # ---- fc1: ONE matmul; pooled rows h packed into lanes (128-aligned concat)
    p2f = jnp.concatenate([p2[0], p2[1], p2[2], p2[3]], axis=-1)   # (B, 1024)
    feat = jnp.dot(p2f, m3_ref[...], preferred_element_type=f32) + b3_ref[...]
    o_ref[...] = feat.astype(o_ref.dtype)


# ----------------------------------------------------------------------------
# Wrapper: batch-tiled pallas_call.
# ----------------------------------------------------------------------------
@functools.partial(jax.jit, static_argnames=("tile_b", "training"))
def lenet_encoder(x, params, seed=None, *, tile_b=128, training=False):
    """x: (B, 1, 28, 28) float -> feat: (B, 500) float32."""
    m1, b1row, m2, b2row, m3, b3row, rep = params
    B = x.shape[0]
    assert x.shape[1:] == (1, IMG, IMG), "LeNetEncoder expects (B, 1, 28, 28) input"
    assert 0.0 <= DROPOUT_P < 1.0

    # Batch tile: multiple of 8, <= 128 (v7x 64 MiB/TC VMEM budget), never larger
    # than the padded batch, and capped so there are >= 2 grid steps when the
    # batch allows it (keeps both v7x TensorCores fed; harmless on v5e/v6e).
    tile_b = min(int(tile_b), 128)
    tile_b = max(8, (min(tile_b, ((B + 7) // 8) * 8) // 8) * 8)
    if B >= 16 and 2 * tile_b > B:
        tile_b = ((B // 2 + 7) // 8) * 8
    b_pad = ((B + tile_b - 1) // tile_b) * tile_b
    grid = (b_pad // tile_b,)

    # Host-side im2col over dy: xs[y, b, dy*28 + col] = image[b, y + dy, col].
    img = x.reshape(B, IMG, IMG).astype(jnp.float32)
    ywin = jnp.arange(IMG - K + 1)[:, None] + jnp.arange(K)[None, :]   # (24, 5)
    xs = img[:, ywin, :]                                               # (B, 24, 5, 28)
    xs = jnp.transpose(xs, (1, 0, 2, 3)).reshape(IMG - K + 1, B, K * IMG)
    xs = jnp.pad(xs, ((0, 0), (0, b_pad - B), (0, L_IN - K * IMG)))    # (24, b_pad, 256)

    kernel = functools.partial(_lenet_encoder_kernel, tile_b=tile_b,
                               training=training, p_drop=DROPOUT_P)

    in_specs = []
    operands = []
    if training:
        if seed is None:
            seed = jnp.zeros((1,), jnp.int32)
        in_specs.append(pl.BlockSpec(memory_space=pltpu.MemorySpace.SMEM))   # seed
        operands.append(jnp.asarray(seed, jnp.int32).reshape(1))
    in_specs += [
        pl.BlockSpec((IMG - K + 1, tile_b, L_IN), lambda i: (0, i, 0)),  # im2col images
        pl.BlockSpec((L_IN, 2 * L1), lambda i: (0, 0)),                  # conv1 matrix (resident)
        pl.BlockSpec((1, 2 * L1), lambda i: (0, 0)),                     # conv1 bias row
        pl.BlockSpec((K, L1, 2 * L2), lambda i: (0, 0, 0)),              # conv2 matrices (resident)
        pl.BlockSpec((1, 2 * L2), lambda i: (0, 0)),                     # conv2 bias row
        pl.BlockSpec((4 * L2, LOUT), lambda i: (0, 0)),                  # fc1 matrix (resident)
        pl.BlockSpec((1, LOUT), lambda i: (0, 0)),                       # fc1 bias row
    ]
    operands += [xs, m1, b1row, m2, b2row, m3, b3row]
    if training:
        in_specs.append(pl.BlockSpec((128, 2 * L2), lambda i: (0, 0)))   # dropout replication
        operands.append(rep)

    macs = b_pad * (24 * 24 * C1 * K * K + 8 * 8 * C2 * C1 * K * K + 800 * ENC_OUT)
    bytes_acc = (xs.size * 4 + b_pad * LOUT * 4
                 + 2 * (m1.size + m2.size + m3.size)
                 + 4 * (b1row.size + b2row.size + b3row.size))
    cost = pl.CostEstimate(flops=2 * macs, transcendentals=0,
                           bytes_accessed=int(bytes_acc))

    out = pl.pallas_call(
        kernel,
        out_shape=jax.ShapeDtypeStruct((b_pad, LOUT), jnp.float32),
        grid=grid,
        in_specs=in_specs,
        out_specs=pl.BlockSpec((tile_b, LOUT), lambda i: (i, 0)),
        compiler_params=pltpu.CompilerParams(
            dimension_semantics=("parallel",),        # megacore / v7x dual-TC split
            vmem_limit_bytes=48 * 1024 * 1024,        # > v5e 16 MiB scoped default, < v7x 64 MiB/TC
        ),
        cost_estimate=cost,
    )(*operands)

    return out[:B, :ENC_OUT]


# ----------------------------------------------------------------------------
# Pure-JAX reference (eval mode) for the correctness check.
# ----------------------------------------------------------------------------
def reference_forward(x, w1, b1, w2, b2, wfc, bfc):
    hi = jax.lax.Precision.HIGHEST
    h = jax.lax.conv_general_dilated(
        x, w1, window_strides=(1, 1), padding="VALID",
        dimension_numbers=("NCHW", "OIHW", "NCHW"), precision=hi)
    h = h + b1[None, :, None, None]
    h = jax.lax.reduce_window(h, -jnp.inf, jax.lax.max,
                              (1, 1, 2, 2), (1, 1, 2, 2), "VALID")
    h = jnp.maximum(h, 0.0)
    h = jax.lax.conv_general_dilated(
        h, w2, window_strides=(1, 1), padding="VALID",
        dimension_numbers=("NCHW", "OIHW", "NCHW"), precision=hi)
    h = h + b2[None, :, None, None]
    h = jax.lax.reduce_window(h, -jnp.inf, jax.lax.max,
                              (1, 1, 2, 2), (1, 1, 2, 2), "VALID")
    h = jnp.maximum(h, 0.0)
    h = h.reshape(h.shape[0], -1)                      # (B, 800) in (C, H, W) order
    return jnp.dot(h, wfc.T, precision=hi) + bfc


if __name__ == "__main__":
    key = jax.random.PRNGKey(0)
    kx, k1, k2, k3, k4, k5, k6 = jax.random.split(key, 7)

    Bdemo = 20   # small demo batch; spatial size is fixed at 28 by the architecture
    x = jax.random.normal(kx, (Bdemo, 1, IMG, IMG), dtype=jnp.float32)

    # Deterministic PyTorch-default-style init: U(-1/sqrt(fan_in), 1/sqrt(fan_in)).
    def uinit(k, shape, fan_in):
        bound = 1.0 / np.sqrt(fan_in)
        return jax.random.uniform(k, shape, minval=-bound, maxval=bound,
                                  dtype=jnp.float32)

    w1 = uinit(k1, (C1, 1, K, K), 25)
    b1 = uinit(k2, (C1,), 25)
    w2 = uinit(k3, (C2, C1, K, K), 500)
    b2 = uinit(k4, (C2,), 500)
    wfc = uinit(k5, (ENC_OUT, 800), 800)
    bfc = uinit(k6, (ENC_OUT,), 800)

    params = build_params(w1, b1, w2, b2, wfc, bfc)

    # tile_b=8 with B=20 -> grid=(3,): exercises batch tiling + padding.
    feat = lenet_encoder(x, params, tile_b=8, training=False)
    feat = jax.block_until_ready(feat)

    ref = reference_forward(x, w1, b1, w2, b2, wfc, bfc)
    assert feat.shape == (Bdemo, ENC_OUT)
    max_err = float(jnp.max(jnp.abs(feat - ref)))
    # bf16 MXU operands with f32 accumulation: ~1e-3 typical, ~1e-2 worst-case.
    assert jnp.allclose(feat, ref, atol=5e-2, rtol=5e-2), f"mismatch: {max_err}"

    print("KERNEL_OK")
</pallas_src>

<mosaic_0001>
module attributes {stable_mosaic.version = 11 : i64} {
  func.func @_lenet_encoder_kernel(%arg0: i32, %arg1: memref<24x8x256xf32, #tpu.memory_space<vmem>>, %arg2: memref<256x512xbf16, #tpu.memory_space<vmem>>, %arg3: memref<1x512xf32, #tpu.memory_space<vmem>>, %arg4: memref<5x256x512xbf16, #tpu.memory_space<vmem>>, %arg5: memref<1x512xf32, #tpu.memory_space<vmem>>, %arg6: memref<1024x512xbf16, #tpu.memory_space<vmem>>, %arg7: memref<1x512xf32, #tpu.memory_space<vmem>>, %arg8: memref<8x512xf32, #tpu.memory_space<vmem>>) attributes {dimension_semantics = [#tpu.dimension_semantics<parallel>], iteration_bounds = array<i64: 3>, scalar_prefetch = 0 : i64, scratch_operands = 0 : i64, tpu.core_type = #tpu.core_type<tc>, window_params = [{transform_indices = @transform_0, window_bounds = array<i64: 24, 8, 256>}, {pipeline_mode = #tpu.pipeline_mode<synchronous>, transform_indices = @transform_1, window_bounds = array<i64: 256, 512>}, {pipeline_mode = #tpu.pipeline_mode<synchronous>, transform_indices = @transform_2, window_bounds = array<i64: 1, 512>}, {pipeline_mode = #tpu.pipeline_mode<synchronous>, transform_indices = @transform_3, window_bounds = array<i64: 5, 256, 512>}, {pipeline_mode = #tpu.pipeline_mode<synchronous>, transform_indices = @transform_4, window_bounds = array<i64: 1, 512>}, {pipeline_mode = #tpu.pipeline_mode<synchronous>, transform_indices = @transform_5, window_bounds = array<i64: 1024, 512>}, {pipeline_mode = #tpu.pipeline_mode<synchronous>, transform_indices = @transform_6, window_bounds = array<i64: 1, 512>}, {transform_indices = @transform_7, window_bounds = array<i64: 8, 512>}]} {
    %c0 = arith.constant 0 : index
    %c0_0 = arith.constant 0 : index
    %c0_1 = arith.constant 0 : index
    %0 = vector.load %arg1[%c0, %c0_0, %c0_1] : memref<24x8x256xf32, #tpu.memory_space<vmem>>, vector<24x8x256xf32>
    %1 = vector.shape_cast %0 : vector<24x8x256xf32> to vector<192x256xf32>
    %2 = arith.truncf %1 : vector<192x256xf32> to vector<192x256xbf16>
    %c0_2 = arith.constant 0 : index
    %c0_3 = arith.constant 0 : index
    %3 = vector.load %arg2[%c0_2, %c0_3] : memref<256x512xbf16, #tpu.memory_space<vmem>>, vector<256x512xbf16>
    %cst = arith.constant dense<0.000000e+00> : vector<192x512xf32>
    %4 = tpu.matmul %2, %3, %cst {dimension_numbers = #tpu.dot_dimension_numbers<[1], [0], [0], [1], [0, 0, 1, 1], [], []>} : vector<192x256xbf16>, vector<256x512xbf16>, vector<192x512xf32> -> vector<192x512xf32>
    %c0_4 = arith.constant 0 : index
    %c0_5 = arith.constant 0 : index
    %5 = vector.load %arg3[%c0_4, %c0_5] : memref<1x512xf32, #tpu.memory_space<vmem>>, vector<1x512xf32>
    %6 = vector.broadcast %5 : vector<1x512xf32> to vector<192x512xf32>
    %7 = arith.addf %4, %6 : vector<192x512xf32>
    %8 = vector.extract_strided_slice %7 {offsets = [0, 0], sizes = [192, 256], strides = [1, 1]} : vector<192x512xf32> to vector<192x256xf32>
    %9 = vector.extract_strided_slice %7 {offsets = [0, 256], sizes = [192, 256], strides = [1, 1]} : vector<192x512xf32> to vector<192x256xf32>
    %10 = arith.maximumf %8, %9 : vector<192x256xf32>
    %11 = vector.shape_cast %10 : vector<192x256xf32> to vector<12x2x8x256xf32>
    %12 = vector.extract_strided_slice %11 {offsets = [0, 0, 0, 0], sizes = [12, 1, 8, 256], strides = [1, 1, 1, 1]} : vector<12x2x8x256xf32> to vector<12x1x8x256xf32>
    %13 = vector.shape_cast %12 : vector<12x1x8x256xf32> to vector<12x8x256xf32>
    %14 = vector.extract_strided_slice %11 {offsets = [0, 1, 0, 0], sizes = [12, 1, 8, 256], strides = [1, 1, 1, 1]} : vector<12x2x8x256xf32> to vector<12x1x8x256xf32>
    %15 = vector.shape_cast %14 : vector<12x1x8x256xf32> to vector<12x8x256xf32>
    %16 = arith.maximumf %13, %15 : vector<12x8x256xf32>
    %cst_6 = arith.constant 0.000000e+00 : f32
    %17 = vector.broadcast %cst_6 : f32 to vector<12x8x256xf32>
    %18 = arith.maximumf %16, %17 : vector<12x8x256xf32>
    %19 = arith.truncf %18 : vector<12x8x256xf32> to vector<12x8x256xbf16>
    %c0_7 = arith.constant 0 : index
    %c0_8 = arith.constant 0 : index
    %20 = vector.load %arg5[%c0_7, %c0_8] : memref<1x512xf32, #tpu.memory_space<vmem>>, vector<1x512xf32>
    %21 = vector.extract_strided_slice %19 {offsets = [0, 0, 0], sizes = [8, 8, 256], strides = [1, 1, 1]} : vector<12x8x256xbf16> to vector<8x8x256xbf16>
    %22 = vector.shape_cast %21 : vector<8x8x256xbf16> to vector<64x256xbf16>
    %c0_9 = arith.constant 0 : index
    %c0_10 = arith.constant 0 : index
    %c0_11 = arith.constant 0 : index
    %23 = vector.load %arg4[%c0_9, %c0_10, %c0_11] : memref<5x256x512xbf16, #tpu.memory_space<vmem>>, vector<1x256x512xbf16>
    %24 = vector.shape_cast %23 : vector<1x256x512xbf16> to vector<256x512xbf16>
    %cst_12 = arith.constant dense<0.000000e+00> : vector<64x512xf32>
    %25 = tpu.matmul %22, %24, %cst_12 {dimension_numbers = #tpu.dot_dimension_numbers<[1], [0], [0], [1], [0, 0, 1, 1], [], []>} : vector<64x256xbf16>, vector<256x512xbf16>, vector<64x512xf32> -> vector<64x512xf32>
    %26 = vector.broadcast %20 : vector<1x512xf32> to vector<64x512xf32>
    %27 = arith.addf %26, %25 : vector<64x512xf32>
    %28 = vector.extract_strided_slice %19 {offsets = [1, 0, 0], sizes = [8, 8, 256], strides = [1, 1, 1]} : vector<12x8x256xbf16> to vector<8x8x256xbf16>
    %29 = vector.shape_cast %28 : vector<8x8x256xbf16> to vector<64x256xbf16>
    %c1 = arith.constant 1 : index
    %c0_13 = arith.constant 0 : index
    %c0_14 = arith.constant 0 : index
    %30 = vector.load %arg4[%c1, %c0_13, %c0_14] : memref<5x256x512xbf16, #tpu.memory_space<vmem>>, vector<1x256x512xbf16>
    %31 = vector.shape_cast %30 : vector<1x256x512xbf16> to vector<256x512xbf16>
    %cst_15 = arith.constant dense<0.000000e+00> : vector<64x512xf32>
    %32 = tpu.matmul %29, %31, %cst_15 {dimension_numbers = #tpu.dot_dimension_numbers<[1], [0], [0], [1], [0, 0, 1, 1], [], []>} : vector<64x256xbf16>, vector<256x512xbf16>, vector<64x512xf32> -> vector<64x512xf32>
    %33 = arith.addf %27, %32 : vector<64x512xf32>
    %34 = vector.extract_strided_slice %19 {offsets = [2, 0, 0], sizes = [8, 8, 256], strides = [1, 1, 1]} : vector<12x8x256xbf16> to vector<8x8x256xbf16>
    %35 = vector.shape_cast %34 : vector<8x8x256xbf16> to vector<64x256xbf16>
    %c2 = arith.constant 2 : index
    %c0_16 = arith.constant 0 : index
    %c0_17 = arith.constant 0 : index
    %36 = vector.load %arg4[%c2, %c0_16, %c0_17] : memref<5x256x512xbf16, #tpu.memory_space<vmem>>, vector<1x256x512xbf16>
    %37 = vector.shape_cast %36 : vector<1x256x512xbf16> to vector<256x512xbf16>
    %cst_18 = arith.constant dense<0.000000e+00> : vector<64x512xf32>
    %38 = tpu.matmul %35, %37, %cst_18 {dimension_numbers = #tpu.dot_dimension_numbers<[1], [0], [0], [1], [0, 0, 1, 1], [], []>} : vector<64x256xbf16>, vector<256x512xbf16>, vector<64x512xf32> -> vector<64x512xf32>
    %39 = arith.addf %33, %38 : vector<64x512xf32>
    %40 = vector.extract_strided_slice %19 {offsets = [3, 0, 0], sizes = [8, 8, 256], strides = [1, 1, 1]} : vector<12x8x256xbf16> to vector<8x8x256xbf16>
    %41 = vector.shape_cast %40 : vector<8x8x256xbf16> to vector<64x256xbf16>
    %c3 = arith.constant 3 : index
    %c0_19 = arith.constant 0 : index
    %c0_20 = arith.constant 0 : index
    %42 = vector.load %arg4[%c3, %c0_19, %c0_20] : memref<5x256x512xbf16, #tpu.memory_space<vmem>>, vector<1x256x512xbf16>
    %43 = vector.shape_cast %42 : vector<1x256x512xbf16> to vector<256x512xbf16>
    %cst_21 = arith.constant dense<0.000000e+00> : vector<64x512xf32>
    %44 = tpu.matmul %41, %43, %cst_21 {dimension_numbers = #tpu.dot_dimension_numbers<[1], [0], [0], [1], [0, 0, 1, 1], [], []>} : vector<64x256xbf16>, vector<256x512xbf16>, vector<64x512xf32> -> vector<64x512xf32>
    %45 = arith.addf %39, %44 : vector<64x512xf32>
    %46 = vector.extract_strided_slice %19 {offsets = [4, 0, 0], sizes = [8, 8, 256], strides = [1, 1, 1]} : vector<12x8x256xbf16> to vector<8x8x256xbf16>
    %47 = vector.shape_cast %46 : vector<8x8x256xbf16> to vector<64x256xbf16>
    %c4 = arith.constant 4 : index
    %c0_22 = arith.constant 0 : index
    %c0_23 = arith.constant 0 : index
    %48 = vector.load %arg4[%c4, %c0_22, %c0_23] : memref<5x256x512xbf16, #tpu.memory_space<vmem>>, vector<1x256x512xbf16>
    %49 = vector.shape_cast %48 : vector<1x256x512xbf16> to vector<256x512xbf16>
    %cst_24 = arith.constant dense<0.000000e+00> : vector<64x512xf32>
    %50 = tpu.matmul %47, %49, %cst_24 {dimension_numbers = #tpu.dot_dimension_numbers<[1], [0], [0], [1], [0, 0, 1, 1], [], []>} : vector<64x256xbf16>, vector<256x512xbf16>, vector<64x512xf32> -> vector<64x512xf32>
    %51 = arith.addf %45, %50 : vector<64x512xf32>
    %52 = vector.extract_strided_slice %51 {offsets = [0, 0], sizes = [64, 256], strides = [1, 1]} : vector<64x512xf32> to vector<64x256xf32>
    %53 = vector.extract_strided_slice %51 {offsets = [0, 256], sizes = [64, 256], strides = [1, 1]} : vector<64x512xf32> to vector<64x256xf32>
    %54 = arith.maximumf %52, %53 : vector<64x256xf32>
    %55 = vector.shape_cast %54 : vector<64x256xf32> to vector<4x2x8x256xf32>
    %56 = vector.extract_strided_slice %55 {offsets = [0, 0, 0, 0], sizes = [4, 1, 8, 256], strides = [1, 1, 1, 1]} : vector<4x2x8x256xf32> to vector<4x1x8x256xf32>
    %57 = vector.shape_cast %56 : vector<4x1x8x256xf32> to vector<4x8x256xf32>
    %58 = vector.extract_strided_slice %55 {offsets = [0, 1, 0, 0], sizes = [4, 1, 8, 256], strides = [1, 1, 1, 1]} : vector<4x2x8x256xf32> to vector<4x1x8x256xf32>
    %59 = vector.shape_cast %58 : vector<4x1x8x256xf32> to vector<4x8x256xf32>
    %60 = arith.maximumf %57, %59 : vector<4x8x256xf32>
    %cst_25 = arith.constant 0.000000e+00 : f32
    %61 = vector.broadcast %cst_25 : f32 to vector<4x8x256xf32>
    %62 = arith.maximumf %60, %61 : vector<4x8x256xf32>
    %63 = arith.truncf %62 : vector<4x8x256xf32> to vector<4x8x256xbf16>
    %64 = vector.extract_strided_slice %63 {offsets = [0, 0, 0], sizes = [1, 8, 256], strides = [1, 1, 1]} : vector<4x8x256xbf16> to vector<1x8x256xbf16>
    %65 = vector.shape_cast %64 : vector<1x8x256xbf16> to vector<8x256xbf16>
    %66 = vector.extract_strided_slice %63 {offsets = [1, 0, 0], sizes = [1, 8, 256], strides = [1, 1, 1]} : vector<4x8x256xbf16> to vector<1x8x256xbf16>
    %67 = vector.shape_cast %66 : vector<1x8x256xbf16> to vector<8x256xbf16>
    %68 = vector.extract_strided_slice %63 {offsets = [2, 0, 0], sizes = [1, 8, 256], strides = [1, 1, 1]} : vector<4x8x256xbf16> to vector<1x8x256xbf16>
    %69 = vector.shape_cast %68 : vector<1x8x256xbf16> to vector<8x256xbf16>
    %70 = vector.extract_strided_slice %63 {offsets = [3, 0, 0], sizes = [1, 8, 256], strides = [1, 1, 1]} : vector<4x8x256xbf16> to vector<1x8x256xbf16>
    %71 = vector.shape_cast %70 : vector<1x8x256xbf16> to vector<8x256xbf16>
    %72 = tpu.concatenate %65, %67, %69, %71 in 1 : vector<8x256xbf16>, vector<8x256xbf16>, vector<8x256xbf16>, vector<8x256xbf16> -> vector<8x1024xbf16>
    %c0_26 = arith.constant 0 : index
    %c0_27 = arith.constant 0 : index
    %73 = vector.load %arg6[%c0_26, %c0_27] : memref<1024x512xbf16, #tpu.memory_space<vmem>>, vector<1024x512xbf16>
    %cst_28 = arith.constant dense<0.000000e+00> : vector<8x512xf32>
    %74 = tpu.matmul %72, %73, %cst_28 {dimension_numbers = #tpu.dot_dimension_numbers<[1], [0], [0], [1], [0, 0, 1, 1], [], []>} : vector<8x1024xbf16>, vector<1024x512xbf16>, vector<8x512xf32> -> vector<8x512xf32>
    %c0_29 = arith.constant 0 : index
    %c0_30 = arith.constant 0 : index
    %75 = vector.load %arg7[%c0_29, %c0_30] : memref<1x512xf32, #tpu.memory_space<vmem>>, vector<1x512xf32>
    %76 = vector.broadcast %75 : vector<1x512xf32> to vector<8x512xf32>
    %77 = arith.addf %74, %76 : vector<8x512xf32>
    %c0_31 = arith.constant 0 : index
    %c0_32 = arith.constant 0 : index
    %78 = vector.load %arg8[%c0_31, %c0_32] : memref<8x512xf32, #tpu.memory_space<vmem>>, vector<8x512xf32>
    tpu.vector_store %arg8[%c0_31, %c0_32], %77 {strides = array<i32>} : memref<8x512xf32, #tpu.memory_space<vmem>>, vector<8x512xf32>,
    return
  }
  func.func @transform_0(%arg0: i32) -> (i32, i32, i32) {
    %c0_i32 = arith.constant 0 : i32
    %c0_i32_0 = arith.constant 0 : i32
    %c0_i32_1 = arith.constant 0 : i32
    return %c0_i32, %arg0, %c0_i32_0 : i32, i32, i32
  }
  func.func @transform_1(%arg0: i32) -> (i32, i32) {
    %c0_i32 = arith.constant 0 : i32
    %c0_i32_0 = arith.constant 0 : i32
    %c0_i32_1 = arith.constant 0 : i32
    return %c0_i32, %c0_i32_0 : i32, i32
  }
  func.func @transform_2(%arg0: i32) -> (i32, i32) {
    %c0_i32 = arith.constant 0 : i32
    %c0_i32_0 = arith.constant 0 : i32
    %c0_i32_1 = arith.constant 0 : i32
    return %c0_i32, %c0_i32_0 : i32, i32
  }
  func.func @transform_3(%arg0: i32) -> (i32, i32, i32) {
    %c0_i32 = arith.constant 0 : i32
    %c0_i32_0 = arith.constant 0 : i32
    %c0_i32_1 = arith.constant 0 : i32
    %c0_i32_2 = arith.constant 0 : i32
    return %c0_i32, %c0_i32_0, %c0_i32_1 : i32, i32, i32
  }
  func.func @transform_4(%arg0: i32) -> (i32, i32) {
    %c0_i32 = arith.constant 0 : i32
    %c0_i32_0 = arith.constant 0 : i32
    %c0_i32_1 = arith.constant 0 : i32
    return %c0_i32, %c0_i32_0 : i32, i32
  }
  func.func @transform_5(%arg0: i32) -> (i32, i32) {
    %c0_i32 = arith.constant 0 : i32
    %c0_i32_0 = arith.constant 0 : i32
    %c0_i32_1 = arith.constant 0 : i32
    return %c0_i32, %c0_i32_0 : i32, i32
  }
  func.func @transform_6(%arg0: i32) -> (i32, i32) {
    %c0_i32 = arith.constant 0 : i32
    %c0_i32_0 = arith.constant 0 : i32
    %c0_i32_1 = arith.constant 0 : i32
    return %c0_i32, %c0_i32_0 : i32, i32
  }
  func.func @transform_7(%arg0: i32) -> (i32, i32) {
    %c0_i32 = arith.constant 0 : i32
    %c0_i32_0 = arith.constant 0 : i32
    return %arg0, %c0_i32 : i32, i32
  }
}

</mosaic_0001>

<bundles_post_ra>
// kernel: lenet_encoder.1
= control target key start
LH: loop header
LB: loop body
LE: loop exit
PB: predicated region body
PF: predicated region fallthrough
CT: control target
= control target key end

     0   :  { %12 = vsyncpa [#allocation4], 0  ;;  %s11024_s0 = inlined_call_operand.vmem [shape: f32[24,24,256], index: 0, kind: input, shape index: {}]   ;;  %s11025_s1 = inlined_call_operand.vmem [shape: bf16[256,512], index: 1, kind: input, shape index: {}]   ;;  %s11026_s2 = inlined_call_operand.vmem [shape: f32[1,512], index: 2, kind: input, shape index: {}]   ;;  %s11027_s3 = inlined_call_operand.vmem [shape: bf16[5,256,512], index: 3, kind: input, shape index: {}]   ;;  %s11028_s4 = inlined_call_operand.vmem [shape: f32[1,512], index: 4, kind: input, shape index: {}]   ;;  %s11029_s5 = inlined_call_operand.vmem [shape: bf16[1024,512], index: 5, kind: input, shape index: {}]   ;;  %s11030_s6 = inlined_call_operand.vmem [shape: f32[1,512], index: 6, kind: input, shape index: {}]   ;;  %s11031_s7 = inlined_call_operand.hbm [shape: f32[24,512], index: 7, kind: output, shape index: {}]  }
   0x1   :  { %14 = vsyncpa [#allocation4 + $0x1], 0  ;;  %s8481_s24 = smov 0   ;;  %s8483_s25 = smov 0  }
   0x2   :  { %s8485_s26 = smov 0   ;;  %s8487_s27 = smov 0  }
   0x3 LB: > { %s6232_s28 = sadd.s32 4294967295, %s8438_s27   ;;  %s6233_s29 = sadd.s32 4294967294, %s8438_s27   ;;  %s8438_s27 = sphi %s8487_s27, %s11037_s27   ;;  %s8434_s26 = sphi %s8485_s26, %s11036_s26   ;;  %s8430_s25 = sphi %s8483_s25, %s11035_s25   ;;  %s8426_s24 = sphi %s8481_s24, %s11034_s24  }
   0x4   : > { %s8504_s30 = sadd.s32 1, %s8438_s27   ;;  %s27_s8 = sadd.s32 1, %s8434_s26 }
   0x5   : > { %s24_s9 = ssub.s32 %s8438_s27, %s8504_s30  ;;  %p34_p0 = scmp.ne.s32.totalorder %s8434_s26, %s8430_s25 }
   0x6   : > { %p25_p1 = scmp.eq.s32.totalorder %s24_s9, 0  ;;  %p35_p2 = scmp.eq.s32.totalorder %s8438_s27, 0 }
   0x7   : > { %p190_p3 = scmp.eq.s32.totalorder %s6232_s28, 2  ;;  %p195_p4 = scmp.ne.s32.totalorder %s8430_s25, %s8426_s24 }
   0x8   : > { %s8517_s10 = scalar_select %p25_p1, %s8434_s26, %s27_s8  }
   0x9   : > { %p36_p5 = por %p35_p2, %p34_p0  ;;  %p8519_p6 = por %p190_p3, %p34_p0 }
   0xa   : > { %p196_p7 = scmp.eq.s32.totalorder %s6233_s29, 2  ;;  %p6235_p9 = scmp.ge.s32.totalorder %s8438_s27, 3 }
   0xc   : > { %p8523_p8 = por %p196_p7, %p195_p4  ;;  %230 = sbr.rel (%p6235_p9) target bundleno = 48 (0x30), region = 40 }
  0x13   : > { %233 = sbr.rel (!%p36_p5) target bundleno = 48 (0x30), region = 44  ;;  %s235_s13 = sand.u32 (%p36_p5), 1, %s8434_s26  }
  0x14   : > { %s7163_s14 = sshll.u32 (%p36_p5), %s8438_s27, 4  ;;  %s7375_s15 = smul.u32 (%p36_p5), 384, %s235_s13 }
  0x15   : > { %s8533_s18 = scalar_lea.vmem (%p36_p5), %s11024_s0, %s7163_s14 }
  0x16   : > { %v253_v0 = vld [vmem:[%s8533_s18] sm:$0xff] (%p36_p5)  ;;  %v255_v1 = vld [vmem:[%s8533_s18 + $0x8] sm:$0xff] (%p36_p5)  ;;  %v257_v2 = vld [vmem:[%s8533_s18 + $0x30] sm:$0xff] (%p36_p5)  ;;  %s8541_s19 = scalar_lea.vmem (%p36_p5), [#allocation2], %s7375_s15 }
  0x17   : > { %v259_v3 = vld [vmem:[%s8533_s18 + $0x38] sm:$0xff] (%p36_p5)  ;;  %v261_v4 = vld [vmem:[%s8533_s18 + $0x60] sm:$0xff] (%p36_p5)  ;;  %v263_v5 = vld [vmem:[%s8533_s18 + $0x68] sm:$0xff] (%p36_p5)  ;;  %254 = vst [vmem:[%s8541_s19] sm:$0xff] (%p36_p5), %v253_v0 }
  0x18   : > { %256 = vst [vmem:[%s8541_s19 + $0x8] sm:$0xff] (%p36_p5), %v255_v1  ;;  %258 = vst [vmem:[%s8541_s19 + $0x10] sm:$0xff] (%p36_p5), %v257_v2  ;;  %v265_v6 = vld [vmem:[%s8533_s18 + $0x90] sm:$0xff] (%p36_p5)  ;;  %v267_v7 = vld [vmem:[%s8533_s18 + $0x98] sm:$0xff] (%p36_p5) }
  0x19   : > { %260 = vst [vmem:[%s8541_s19 + $0x18] sm:$0xff] (%p36_p5), %v259_v3  ;;  %262 = vst [vmem:[%s8541_s19 + $0x20] sm:$0xff] (%p36_p5), %v261_v4  ;;  %v269_v8 = vld [vmem:[%s8533_s18 + $0xc0] sm:$0xff] (%p36_p5)  ;;  %v271_v9 = vld [vmem:[%s8533_s18 + $0xc8] sm:$0xff] (%p36_p5) }
  0x1a   : > { %264 = vst [vmem:[%s8541_s19 + $0x28] sm:$0xff] %v263_v5  ;;  %266 = vst [vmem:[%s8541_s19 + $0x30] sm:$0xff] %v265_v6  ;;  %v273_v10 = vld [vmem:[%s8533_s18 + $0xf0] sm:$0xff]  ;;  %v275_v11 = vld [vmem:[%s8533_s18 + $0xf8] sm:$0xff] }
  0x1b   : > { %268 = vst [vmem:[%s8541_s19 + $0x38] sm:$0xff] %v267_v7  ;;  %270 = vst [vmem:[%s8541_s19 + $0x40] sm:$0xff] %v269_v8  ;;  %v277_v12 = vld [vmem:[%s8533_s18 + $0x120] sm:$0xff]  ;;  %v279_v13 = vld [vmem:[%s8533_s18 + $0x128] sm:$0xff] }
  0x1c   : > { %272 = vst [vmem:[%s8541_s19 + $0x48] sm:$0xff] %v271_v9  ;;  %274 = vst [vmem:[%s8541_s19 + $0x50] sm:$0xff] %v273_v10  ;;  %v281_v14 = vld [vmem:[%s8533_s18 + $0x150] sm:$0xff]  ;;  %v283_v15 = vld [vmem:[%s8533_s18 + $0x158] sm:$0xff] }
  0x1d   : > { %276 = vst [vmem:[%s8541_s19 + $0x58] sm:$0xff] %v275_v11  ;;  %278 = vst [vmem:[%s8541_s19 + $0x60] sm:$0xff] %v277_v12  ;;  %v285_v16 = vld [vmem:[%s8533_s18 + $0x180] sm:$0xff]  ;;  %v287_v17 = vld [vmem:[%s8533_s18 + $0x188] sm:$0xff] }
  0x1e   : > { %280 = vst [vmem:[%s8541_s19 + $0x68] sm:$0xff] %v279_v13  ;;  %282 = vst [vmem:[%s8541_s19 + $0x70] sm:$0xff] %v281_v14  ;;  %v289_v18 = vld [vmem:[%s8533_s18 + $0x1b0] sm:$0xff]  ;;  %v291_v19 = vld [vmem:[%s8533_s18 + $0x1b8] sm:$0xff] }
  0x1f   : > { %284 = vst [vmem:[%s8541_s19 + $0x78] sm:$0xff] %v283_v15  ;;  %286 = vst [vmem:[%s8541_s19 + $0x80] sm:$0xff] %v285_v16  ;;  %v293_v20 = vld [vmem:[%s8533_s18 + $0x1e0] sm:$0xff]  ;;  %v295_v21 = vld [vmem:[%s8533_s18 + $0x1e8] sm:$0xff] }
  0x20   : > { %288 = vst [vmem:[%s8541_s19 + $0x88] sm:$0xff] %v287_v17  ;;  %290 = vst [vmem:[%s8541_s19 + $0x90] sm:$0xff] %v289_v18  ;;  %v297_v22 = vld [vmem:[%s8533_s18 + $0x210] sm:$0xff]  ;;  %v299_v23 = vld [vmem:[%s8533_s18 + $0x218] sm:$0xff] }
  0x21   : > { %292 = vst [vmem:[%s8541_s19 + $0x98] sm:$0xff] %v291_v19  ;;  %294 = vst [vmem:[%s8541_s19 + $0xa0] sm:$0xff] %v293_v20  ;;  %v301_v24 = vld [vmem:[%s8533_s18 + $0x240] sm:$0xff]  ;;  %v303_v25 = vld [vmem:[%s8533_s18 + $0x248] sm:$0xff] }
  0x22   : > { %296 = vst [vmem:[%s8541_s19 + $0xa8] sm:$0xff] %v295_v21  ;;  %298 = vst [vmem:[%s8541_s19 + $0xb0] sm:$0xff] %v297_v22  ;;  %v305_v26 = vld [vmem:[%s8533_s18 + $0x270] sm:$0xff]  ;;  %v307_v27 = vld [vmem:[%s8533_s18 + $0x278] sm:$0xff] }
  0x23   : > { %300 = vst [vmem:[%s8541_s19 + $0xb8] sm:$0xff] %v299_v23  ;;  %302 = vst [vmem:[%s8541_s19 + $0xc0] sm:$0xff] %v301_v24  ;;  %v309_v28 = vld [vmem:[%s8533_s18 + $0x2a0] sm:$0xff]  ;;  %v311_v29 = vld [vmem:[%s8533_s18 + $0x2a8] sm:$0xff] }
  0x24   : > { %304 = vst [vmem:[%s8541_s19 + $0xc8] sm:$0xff] %v303_v25  ;;  %306 = vst [vmem:[%s8541_s19 + $0xd0] sm:$0xff] %v305_v26  ;;  %v313_v30 = vld [vmem:[%s8533_s18 + $0x2d0] sm:$0xff]  ;;  %v315_v31 = vld [vmem:[%s8533_s18 + $0x2d8] sm:$0xff] }
  0x25   : > { %308 = vst [vmem:[%s8541_s19 + $0xd8] sm:$0xff] %v307_v27  ;;  %310 = vst [vmem:[%s8541_s19 + $0xe0] sm:$0xff] %v309_v28  ;;  %v317_v32 = vld [vmem:[%s8533_s18 + $0x300] sm:$0xff]  ;;  %v319_v33 = vld [vmem:[%s8533_s18 + $0x308] sm:$0xff] }
  0x26   : > { %312 = vst [vmem:[%s8541_s19 + $0xe8] sm:$0xff] %v311_v29  ;;  %314 = vst [vmem:[%s8541_s19 + $0xf0] sm:$0xff] %v313_v30  ;;  %v321_v34 = vld [vmem:[%s8533_s18 + $0x330] sm:$0xff]  ;;  %v323_v35 = vld [vmem:[%s8533_s18 + $0x338] sm:$0xff] }
  0x27   : > { %316 = vst [vmem:[%s8541_s19 + $0xf8] sm:$0xff] %v315_v31  ;;  %318 = vst [vmem:[%s8541_s19 + $0x100] sm:$0xff] %v317_v32  ;;  %v325_v36 = vld [vmem:[%s8533_s18 + $0x360] sm:$0xff]  ;;  %v327_v37 = vld [vmem:[%s8533_s18 + $0x368] sm:$0xff] }
  0x28   : > { %320 = vst [vmem:[%s8541_s19 + $0x108] sm:$0xff] %v319_v33  ;;  %322 = vst [vmem:[%s8541_s19 + $0x110] sm:$0xff] %v321_v34  ;;  %v329_v38 = vld [vmem:[%s8533_s18 + $0x390] sm:$0xff]  ;;  %v331_v39 = vld [vmem:[%s8533_s18 + $0x398] sm:$0xff] }
  0x29   : > { %324 = vst [vmem:[%s8541_s19 + $0x118] sm:$0xff] %v323_v35  ;;  %326 = vst [vmem:[%s8541_s19 + $0x120] sm:$0xff] %v325_v36  ;;  %v333_v40 = vld [vmem:[%s8533_s18 + $0x3c0] sm:$0xff]  ;;  %v335_v41 = vld [vmem:[%s8533_s18 + $0x3c8] sm:$0xff] }
  0x2a   : > { %328 = vst [vmem:[%s8541_s19 + $0x128] sm:$0xff] %v327_v37  ;;  %330 = vst [vmem:[%s8541_s19 + $0x130] sm:$0xff] %v329_v38  ;;  %v337_v42 = vld [vmem:[%s8533_s18 + $0x3f0] sm:$0xff]  ;;  %v339_v43 = vld [vmem:[%s8533_s18 + $0x3f8] sm:$0xff] }
  0x2b   : > { %332 = vst [vmem:[%s8541_s19 + $0x138] sm:$0xff] %v331_v39  ;;  %334 = vst [vmem:[%s8541_s19 + $0x140] sm:$0xff] %v333_v40  ;;  %v341_v44 = vld [vmem:[%s8533_s18 + $0x420] sm:$0xff]  ;;  %v343_v45 = vld [vmem:[%s8533_s18 + $0x428] sm:$0xff] }
  0x2c   : > { %336 = vst [vmem:[%s8541_s19 + $0x148] sm:$0xff] %v335_v41  ;;  %338 = vst [vmem:[%s8541_s19 + $0x150] sm:$0xff] %v337_v42  ;;  %v345_v46 = vld [vmem:[%s8533_s18 + $0x450] sm:$0xff]  ;;  %v347_v47 = vld [vmem:[%s8533_s18 + $0x458] sm:$0xff] }
  0x2d   : > { %340 = vst [vmem:[%s8541_s19 + $0x158] sm:$0xff] %v339_v43  ;;  %342 = vst [vmem:[%s8541_s19 + $0x160] sm:$0xff] %v341_v44 }
  0x2e   : > { %344 = vst [vmem:[%s8541_s19 + $0x168] sm:$0xff] %v343_v45  ;;  %346 = vst [vmem:[%s8541_s19 + $0x170] sm:$0xff] %v345_v46 }
  0x2f   : > { %348 = vst [vmem:[%s8541_s19 + $0x178] sm:$0xff] %v347_v47 }
  0x30 PF: > { %p6238_p10 = scmp.ge.s32.totalorder %s8438_s27, 1  ;;  %p353_p11 = scmp.lt.s32.totalorder %s8438_s27, 4 }
  0x32   : > { %p354_p12 = pnand %p6238_p10, %p353_p11 }
  0x33   : > { %v7416_v48 = vld [vmem:[%s11025_s1 + $0x4] ss:$16 sps:$4 sm:$0xff] (!%p354_p12)   ;;  %v7418_v49 = vld [vmem:[%s11025_s1 + $0xc] ss:$16 sps:$4 sm:$0xff] (!%p354_p12)   ;;  %v7420_v50 = vld [vmem:[%s11025_s1] ss:$16 sps:$4 sm:$0xff] (!%p354_p12)  }
  0x34   : > { %357 = sbr.rel (%p354_p12) target bundleno = 1258 (0x4ea), region = 67  ;;  %869 = vmatprep.subr.bf16.mxu0 (!%p354_p12), %v7416_v48  ;;  %v7421_v51 = vld [vmem:[%s11025_s1 + $0x8] ss:$16 sps:$4 sm:$0xff] (!%p354_p12)   ;;  %1022 = vmatprep.subr.bf16.mxu1 (!%p354_p12), %v7418_v49  ;;  %v7422_v52 = vld [vmem:[%s11025_s1 + $0x24] ss:$16 sps:$4 sm:$0xff] (!%p354_p12)   ;;  %s8747_s29 = sand.u32 (!%p354_p12), 1, %s8430_s25  }
  0x35   : > { %870 = vmatpush1.bf16.msra.mxu0 (!%p354_p12), %v7420_v50  ;;  %1023 = vmatpush1.bf16.msra.mxu1 (!%p354_p12), %v7421_v51  ;;  %v7424_v53 = vld [vmem:[%s11025_s1 + $0x2c] ss:$16 sps:$4 sm:$0xff] (!%p354_p12)   ;;  %v7426_v54 = vld [vmem:[%s11025_s1 + $0x20] ss:$16 sps:$4 sm:$0xff] (!%p354_p12)   ;;  %v7427_v55 = vld [vmem:[%s11025_s1 + $0x28] ss:$16 sps:$4 sm:$0xff] (!%p354_p12)  }
  0x36   : > { %871 = vmatprep.subr.bf16.mxu0 (!%p354_p12), %v7422_v52  ;;  %1024 = vmatprep.subr.bf16.mxu1 (!%p354_p12), %v7424_v53  ;;  %v7428_v56 = vld [vmem:[%s11025_s1 + $0x44] ss:$16 sps:$4 sm:$0xff] (!%p354_p12)   ;;  %v7430_v57 = vld [vmem:[%s11025_s1 + $0x4c] ss:$16 sps:$4 sm:$0xff] (!%p354_p12)   ;;  %v7432_v58 = vld [vmem:[%s11025_s1 + $0x40] ss:$16 sps:$4 sm:$0xff] (!%p354_p12)  }
  0x37   : > { %v7433_v59 = vld [vmem:[%s11025_s1 + $0x48] ss:$16 sps:$4 sm:$0xff] (!%p354_p12)   ;;  %v7434_v60 = vld [vmem:[%s11025_s1 + $0x64] ss:$16 sps:$4 sm:$0xff] (!%p354_p12)   ;;  %v7436_v61 = vld [vmem:[%s11025_s1 + $0x6c] ss:$16 sps:$4 sm:$0xff] (!%p354_p12)  }
  0x38   : > { %v7438_v62 = vld [vmem:[%s11025_s1 + $0x60] ss:$16 sps:$4 sm:$0xff] (!%p354_p12)   ;;  %v7439_v63 = vld [vmem:[%s11025_s1 + $0x68] ss:$16 sps:$4 sm:$0xff] (!%p354_p12)   ;;  %v7440_v0 = vld [vmem:[%s11025_s1 + $0x84] ss:$16 sps:$4 sm:$0xff] (!%p354_p12)  }
  0x39   : > { %872 = vmatpush1.bf16.msra.mxu0 (!%p354_p12), %v7426_v54  ;;  %1025 = vmatpush1.bf16.msra.mxu1 (!%p354_p12), %v7427_v55  ;;  %v7442_v1 = vld [vmem:[%s11025_s1 + $0x8c] ss:$16 sps:$4 sm:$0xff] (!%p354_p12)   ;;  %v7444_v2 = vld [vmem:[%s11025_s1 + $0x80] ss:$16 sps:$4 sm:$0xff] (!%p354_p12)   ;;  %v7445_v3 = vld [vmem:[%s11025_s1 + $0x88] ss:$16 sps:$4 sm:$0xff] (!%p354_p12)  }
  0x3a   : > { %873 = vmatprep.subr.bf16.mxu0 (!%p354_p12), %v7428_v56  ;;  %1026 = vmatprep.subr.bf16.mxu1 (!%p354_p12), %v7430_v57  ;;  %v7446_v4 = vld [vmem:[%s11025_s1 + $0xa4] ss:$16 sps:$4 sm:$0xff] (!%p354_p12)   ;;  %v7448_v5 = vld [vmem:[%s11025_s1 + $0xac] ss:$16 sps:$4 sm:$0xff] (!%p354_p12)   ;;  %v7450_v6 = vld [vmem:[%s11025_s1 + $0xa0] ss:$16 sps:$4 sm:$0xff] (!%p354_p12)  }
  0x3b   : > { %v7451_v7 = vld [vmem:[%s11025_s1 + $0xa8] ss:$16 sps:$4 sm:$0xff]   ;;  %v7452_v8 = vld [vmem:[%s11025_s1 + $0xc4] ss:$16 sps:$4 sm:$0xff]   ;;  %v7454_v9 = vld [vmem:[%s11025_s1 + $0xcc] ss:$16 sps:$4 sm:$0xff]  }
  0x3c   : > { %v7456_v10 = vld [vmem:[%s11025_s1 + $0xc0] ss:$16 sps:$4 sm:$0xff]   ;;  %v7457_v11 = vld [vmem:[%s11025_s1 + $0xc8] ss:$16 sps:$4 sm:$0xff]   ;;  %v7458_v12 = vld [vmem:[%s11025_s1 + $0xe4] ss:$16 sps:$4 sm:$0xff]  }
  0x3d   : > { %874 = vmatpush1.bf16.msra.mxu0 %v7432_v58  ;;  %1027 = vmatpush1.bf16.msra.mxu1 %v7433_v59  ;;  %v7460_v13 = vld [vmem:[%s11025_s1 + $0xec] ss:$16 sps:$4 sm:$0xff]   ;;  %v7462_v14 = vld [vmem:[%s11025_s1 + $0xe0] ss:$16 sps:$4 sm:$0xff]   ;;  %v7463_v15 = vld [vmem:[%s11025_s1 + $0xe8] ss:$16 sps:$4 sm:$0xff]  }
  0x3e   : > { %875 = vmatprep.subr.bf16.mxu0 %v7434_v60  ;;  %1028 = vmatprep.subr.bf16.mxu1 %v7436_v61  ;;  %v7464_v16 = vld [vmem:[%s11025_s1 + $0x104] ss:$16 sps:$4 sm:$0xff]   ;;  %v7466_v17 = vld [vmem:[%s11025_s1 + $0x10c] ss:$16 sps:$4 sm:$0xff]   ;;  %v7468_v18 = vld [vmem:[%s11025_s1 + $0x100] ss:$16 sps:$4 sm:$0xff]  }
  0x3f   : > { %v7469_v19 = vld [vmem:[%s11025_s1 + $0x108] ss:$16 sps:$4 sm:$0xff]   ;;  %v7470_v20 = vld [vmem:[%s11025_s1 + $0x124] ss:$16 sps:$4 sm:$0xff]   ;;  %v7472_v21 = vld [vmem:[%s11025_s1 + $0x12c] ss:$16 sps:$4 sm:$0xff]  }
  0x40   : > { %v7474_v22 = vld [vmem:[%s11025_s1 + $0x120] ss:$16 sps:$4 sm:$0xff]   ;;  %s7376_s15 = smul.u32 384, %s8747_s29  ;;  %v7475_v23 = vld [vmem:[%s11025_s1 + $0x128] ss:$16 sps:$4 sm:$0xff]   ;;  %s6239_s9 = sshll.u32 %s8747_s29, 5 }
  0x41   : > { %876 = vmatpush1.bf16.msra.mxu0 %v7438_v62  ;;  %1029 = vmatpush1.bf16.msra.mxu1 %v7439_v63  ;;  %v7476_v24 = vld [vmem:[%s11025_s1 + $0x144] ss:$16 sps:$4 sm:$0xff]   ;;  %v7478_v25 = vld [vmem:[%s11025_s1 + $0x14c] ss:$16 sps:$4 sm:$0xff]   ;;  %v7480_v26 = vld [vmem:[%s11025_s1 + $0x140] ss:$16 sps:$4 sm:$0xff]  }
  0x42   : > { %877 = vmatprep.subr.bf16.mxu0 %v7440_v0  ;;  %1030 = vmatprep.subr.bf16.mxu1 %v7442_v1  ;;  %v7481_v27 = vld [vmem:[%s11025_s1 + $0x148] ss:$16 sps:$4 sm:$0xff]   ;;  %v7482_v28 = vld [vmem:[%s11025_s1 + $0x164] ss:$16 sps:$4 sm:$0xff]   ;;  %v7484_v29 = vld [vmem:[%s11025_s1 + $0x16c] ss:$16 sps:$4 sm:$0xff]  }
  0x43   : > { %s8777_s18 = scalar_lea.vmem [#allocation2], %s7376_s15  ;;  %v7486_v32 = vld [vmem:[%s11025_s1 + $0x160] ss:$16 sps:$4 sm:$0xff]   ;;  %v7487_v33 = vld [vmem:[%s11025_s1 + $0x168] ss:$16 sps:$4 sm:$0xff]   ;;  %s7186_s16 = sshll.u32 %s6232_s28, 9 }
  0x44   : > { %v392_v30 = vld [vmem:[%s8777_s18 + $0x8] sm:$0xff]  ;;  %v394_v31 = vld [vmem:[%s8777_s18 + $0x18] sm:$0xff]  ;;  %v7488_v35 = vld [vmem:[%s11025_s1 + $0x184] ss:$16 sps:$4 sm:$0xff]   ;;  %s390_s17 = scalar_lea.vmem [#allocation3], %s6239_s9  ;;  %s10981_s22 = scalar_lea.hbm %s11031_s7, %s7186_s16 }
  0x45   : > { %878 = vmatpush1.bf16.msra.mxu0 %v7444_v2  ;;  %1031 = vmatpush1.bf16.msra.mxu1 %v7445_v3  ;;  %v440_v34 = vpack.c.bf16 %v394_v31, %v392_v30  ;;  %v7490_v36 = vld [vmem:[%s11025_s1 + $0x18c] ss:$16 sps:$4 sm:$0xff]   ;;  %v7492_v37 = vld [vmem:[%s11025_s1 + $0x180] ss:$16 sps:$4 sm:$0xff]   ;;  %v7493_v38 = vld [vmem:[%s11025_s1 + $0x188] ss:$16 sps:$4 sm:$0xff]  }
  0x46   : > { %879 = vmatprep.subr.bf16.mxu0 %v7446_v4  ;;  %1032 = vmatprep.subr.bf16.mxu1 %v7448_v5  ;;  %v7494_v39 = vld [vmem:[%s11025_s1 + $0x1a4] ss:$16 sps:$4 sm:$0xff]   ;;  %v7496_v40 = vld [vmem:[%s11025_s1 + $0x1ac] ss:$16 sps:$4 sm:$0xff]   ;;  %v7498_v41 = vld [vmem:[%s11025_s1 + $0x1a0] ss:$16 sps:$4 sm:$0xff]  }
  0x47   : > { %901 = vmatprep.mubr.bf16.mxu0 %v440_v34  ;;  %1054 = vmatprep.mubr.bf16.mxu1 %v440_v34  ;;  %v7499_v42 = vld [vmem:[%s11025_s1 + $0x1a8] ss:$16 sps:$4 sm:$0xff]   ;;  %v7500_v43 = vld [vmem:[%s11025_s1 + $0x1c4] ss:$16 sps:$4 sm:$0xff]   ;;  %v7502_v44 = vld [vmem:[%s11025_s1 + $0x1cc] ss:$16 sps:$4 sm:$0xff]  }
  0x48   : > { %v7504_v45 = vld [vmem:[%s11025_s1 + $0x1c0] ss:$16 sps:$4 sm:$0xff]   ;;  %v7505_v46 = vld [vmem:[%s11025_s1 + $0x1c8] ss:$16 sps:$4 sm:$0xff]   ;;  %v7506_v47 = vld [vmem:[%s11025_s1 + $0x1e4] ss:$16 sps:$4 sm:$0xff]  }
  0x49   : > { %880 = vmatpush1.bf16.msra.mxu0 %v7450_v6  ;;  %1033 = vmatpush1.bf16.msra.mxu1 %v7451_v7  ;;  %v7508_v48 = vld [vmem:[%s11025_s1 + $0x1ec] ss:$16 sps:$4 sm:$0xff]   ;;  %v7510_v49 = vld [vmem:[%s11025_s1 + $0x1e0] ss:$16 sps:$4 sm:$0xff]   ;;  %v7511_v50 = vld [vmem:[%s11025_s1 + $0x1e8] ss:$16 sps:$4 sm:$0xff]  }
  0x4a   : > { %881 = vmatprep.subr.bf16.mxu0 %v7452_v8  ;;  %1034 = vmatprep.subr.bf16.mxu1 %v7454_v9  ;;  %v391_v51 = vld [vmem:[%s8777_s18] sm:$0xff]  ;;  %v393_v52 = vld [vmem:[%s8777_s18 + $0x10] sm:$0xff]  ;;  %v396_v53 = vld [vmem:[%s8777_s18 + $0x28] sm:$0xff]  ;;  %s6168_s19 = sshll.u32 %s390_s17, 4  ;;  %s6154_s28 = scalar_lea.sflag [#allocation4], %s8747_s29  ;;  %s10983_s19 = int_to_ptr.vmem [resolvable:$true] %s6168_s19 }
  0x4b   : > { %v398_v54 = vld [vmem:[%s8777_s18 + $0x38] sm:$0xff]  ;;  %v7514_v55 = vld [vmem:[%s11027_s3 + $0x4] ss:$16 sps:$4 sm:$0xff]   ;;  %v439_v57 = vpack.c.bf16 %v393_v52, %v391_v51  ;;  %v7512_v59 = vld [vmem:[%s11027_s3] ss:$16 sps:$4 sm:$0xff]   ;;  %s8440_s23 = smov [#allocation3]  }
  0x4c   : > { %v7517_v56 = vld [vmem:[%s11027_s3 + $0xc] ss:$16 sps:$4 sm:$0xff]   ;;  %v442_v58 = vpack.c.bf16 %v398_v54, %v396_v53  ;;  %v7515_v60 = vld [vmem:[%s11027_s3 + $0x8] ss:$16 sps:$4 sm:$0xff]   ;;  %v395_v61 = vld [vmem:[%s8777_s18 + $0x20] sm:$0xff]  ;;  %s8380_s15 = sshll.u32 %s8440_s23, 4  ;;  %s8381_s15 = int_to_ptr.vmem [resolvable:$false] %s8380_s15 }
  0x4d   : > { %882 = vmatpush1.bf16.msra.mxu0 %v7456_v10  ;;  %1035 = vmatpush1.bf16.msra.mxu1 %v7457_v11  ;;  %v397_v62 = vld [vmem:[%s8777_s18 + $0x30] sm:$0xff]  ;;  %v7523_v0 = vld [vmem:[%s11027_s3 + $0x2c] ss:$16 sps:$4 sm:$0xff]   ;;  %v7521_v4 = vld [vmem:[%s11027_s3 + $0x28] ss:$16 sps:$4 sm:$0xff]   ;;  %s8382_s8 = scalar_lea.vmem %s8381_s15, 1024  ;;  %p8383_p2 = scmp.lt.s32.totalorder %s10983_s19, %s8381_s15 }
  0x4e   : > { %883 = vmatprep.subr.bf16.mxu0 %v7458_v12  ;;  %1036 = vmatprep.subr.bf16.mxu1 %v7460_v13  ;;  %v7520_v63 = vld [vmem:[%s11027_s3 + $0x24] ss:$16 sps:$4 sm:$0xff]   ;;  %v400_v1 = vld [vmem:[%s8777_s18 + $0x48] sm:$0xff]  ;;  %v402_v2 = vld [vmem:[%s8777_s18 + $0x58] sm:$0xff]  ;;  %v441_v7 = vpack.c.bf16 %v397_v62, %v395_v61 }
  0x4f   : > { %v7518_v3 = vld [vmem:[%s11027_s3 + $0x20] ss:$16 sps:$4 sm:$0xff]   ;;  %v7526_v5 = vld [vmem:[%s11027_s3 + $0x44] ss:$16 sps:$4 sm:$0xff]   ;;  %v7529_v6 = vld [vmem:[%s11027_s3 + $0x4c] ss:$16 sps:$4 sm:$0xff]   ;;  %v444_v8 = vpack.c.bf16 %v402_v2, %v400_v1 }
  0x50   : > { %v7524_v9 = vld [vmem:[%s11027_s3 + $0x40] ss:$16 sps:$4 sm:$0xff]   ;;  %v7527_v10 = vld [vmem:[%s11027_s3 + $0x48] ss:$16 sps:$4 sm:$0xff]   ;;  %v7532_v13 = vld [vmem:[%s11027_s3 + $0x64] ss:$16 sps:$4 sm:$0xff]  }
  0x51   : > { %884 = vmatpush1.bf16.msra.mxu0 %v7462_v14  ;;  %1037 = vmatpush1.bf16.msra.mxu1 %v7463_v15  ;;  %v399_v11 = vld [vmem:[%s8777_s18 + $0x40] sm:$0xff]  ;;  %v401_v12 = vld [vmem:[%s8777_s18 + $0x50] sm:$0xff]  ;;  %v7535_v14 = vld [vmem:[%s11027_s3 + $0x6c] ss:$16 sps:$4 sm:$0xff]  }
  0x52   : > { %885 = vmatprep.subr.bf16.mxu0 %v7464_v16  ;;  %1038 = vmatprep.subr.bf16.mxu1 %v7466_v17  ;;  %v404_v15 = vld [vmem:[%s8777_s18 + $0x68] sm:$0xff]  ;;  %v406_v16 = vld [vmem:[%s8777_s18 + $0x78] sm:$0xff]  ;;  %v7530_v17 = vld [vmem:[%s11027_s3 + $0x60] ss:$16 sps:$4 sm:$0xff]  }
  0x53   : > { %v410_v30 = vld [vmem:[%s8777_s18 + $0x98] sm:$0xff]  ;;  %v7542_v31 = vld [vmem:[%s11027_s3 + $0xa0] ss:$16 sps:$4 sm:$0xff]   ;;  %v7568_v53 = vld [vmem:[%s11027_s3 + $0x124] ss:$16 sps:$4 sm:$0xff]  }
  0x54   : > { %v7553_v34 = vld [vmem:[%s11027_s3 + $0xcc] ss:$16 sps:$4 sm:$0xff]   ;;  %v7563_v51 = vld [vmem:[%s11027_s3 + $0x108] ss:$16 sps:$4 sm:$0xff]   ;;  %v7574_v61 = vld [vmem:[%s11027_s3 + $0x144] ss:$16 sps:$4 sm:$0xff]  }
  0x55   : > { %886 = vmatpush1.bf16.msra.mxu0 %v7468_v18  ;;  %1039 = vmatpush1.bf16.msra.mxu1 %v7469_v19  ;;  %v7533_v18 = vld [vmem:[%s11027_s3 + $0x68] ss:$16 sps:$4 sm:$0xff]   ;;  %v7538_v19 = vld [vmem:[%s11027_s3 + $0x84] ss:$16 sps:$4 sm:$0xff]   ;;  %v7571_v54 = vld [vmem:[%s11027_s3 + $0x12c] ss:$16 sps:$4 sm:$0xff]  }
  0x56   : > { %887 = vmatprep.subr.bf16.mxu0 %v7470_v20  ;;  %1040 = vmatprep.subr.bf16.mxu1 %v7472_v21  ;;  %v7541_v20 = vld [vmem:[%s11027_s3 + $0x8c] ss:$16 sps:$4 sm:$0xff]   ;;  %v443_v21 = vpack.c.bf16 %v401_v12, %v399_v11  ;;  %v7575_v1 = vld [vmem:[%s11027_s3 + $0x148] ss:$16 sps:$4 sm:$0xff]   ;;  %v7586_v11 = vld [vmem:[%s11027_s3 + $0x184] ss:$16 sps:$4 sm:$0xff]  }
  0x57   : > { %v7577_v62 = vld [vmem:[%s11027_s3 + $0x14c] ss:$16 sps:$4 sm:$0xff]  }
  0x58   : > { %v7589_v12 = vld [vmem:[%s11027_s3 + $0x18c] ss:$16 sps:$4 sm:$0xff]  }
  0x59   : > { %888 = vmatpush1.bf16.msra.mxu0 %v7474_v22  ;;  %1041 = vmatpush1.bf16.msra.mxu1 %v7475_v23  ;;  %v446_v22 = vpack.c.bf16 %v406_v16, %v404_v15  ;;  %v7536_v23 = vld [vmem:[%s11027_s3 + $0x80] ss:$16 sps:$4 sm:$0xff]   ;;  %v7587_v15 = vld [vmem:[%s11027_s3 + $0x188] ss:$16 sps:$4 sm:$0xff]  }
  0x5a   : > { %889 = vmatprep.subr.bf16.mxu0 %v7476_v24  ;;  %1042 = vmatprep.subr.bf16.mxu1 %v7478_v25  ;;  %v7539_v24 = vld [vmem:[%s11027_s3 + $0x88] ss:$16 sps:$4 sm:$0xff]   ;;  %v403_v25 = vld [vmem:[%s8777_s18 + $0x60] sm:$0xff] }
  0x5d   : > { %890 = vmatpush1.bf16.msra.mxu0 %v7480_v26  ;;  %1043 = vmatpush1.bf16.msra.mxu1 %v7481_v27  ;;  %v405_v26 = vld [vmem:[%s8777_s18 + $0x70] sm:$0xff] }
  0x5e   : > { %891 = vmatprep.subr.bf16.mxu0 %v7482_v28  ;;  %1044 = vmatprep.subr.bf16.mxu1 %v7484_v29  ;;  %v7544_v27 = vld [vmem:[%s11027_s3 + $0xa4] ss:$16 sps:$4 sm:$0xff]   ;;  %v7547_v28 = vld [vmem:[%s11027_s3 + $0xac] ss:$16 sps:$4 sm:$0xff]  }
  0x5f   : > { %v408_v29 = vld [vmem:[%s8777_s18 + $0x88] sm:$0xff] }
  0x61   : > { %892 = vmatpush1.bf16.msra.mxu0 %v7486_v32  ;;  %1045 = vmatpush1.bf16.msra.mxu1 %v7487_v33  ;;  %v7545_v32 = vld [vmem:[%s11027_s3 + $0xa8] ss:$16 sps:$4 sm:$0xff]   ;;  %v7550_v33 = vld [vmem:[%s11027_s3 + $0xc4] ss:$16 sps:$4 sm:$0xff]  }
  0x62   : > { %893 = vmatprep.subr.bf16.mxu0 %v7488_v35  ;;  %1046 = vmatprep.subr.bf16.mxu1 %v7490_v36  ;;  %v445_v35 = vpack.c.bf16 %v405_v26, %v403_v25  ;;  %v448_v36 = vpack.c.bf16 %v410_v30, %v408_v29  ;;  %v428_v25 = vld [vmem:[%s8777_s18 + $0x128] sm:$0xff]  ;;  %v430_v26 = vld [vmem:[%s8777_s18 + $0x138] sm:$0xff]  ;;  %v427_v29 = vld [vmem:[%s8777_s18 + $0x120] sm:$0xff] }
  0x63   : > { %v429_v30 = vld [vmem:[%s8777_s18 + $0x130] sm:$0xff] }
  0x65   : > { %894 = vmatpush1.bf16.msra.mxu0 %v7492_v37  ;;  %1047 = vmatpush1.bf16.msra.mxu1 %v7493_v38  ;;  %v7548_v37 = vld [vmem:[%s11027_s3 + $0xc0] ss:$16 sps:$4 sm:$0xff]   ;;  %v7551_v38 = vld [vmem:[%s11027_s3 + $0xc8] ss:$16 sps:$4 sm:$0xff]  }
  0x66   : > { %895 = vmatprep.subr.bf16.mxu0 %v7494_v39  ;;  %1048 = vmatprep.subr.bf16.mxu1 %v7496_v40  ;;  %v407_v39 = vld [vmem:[%s8777_s18 + $0x80] sm:$0xff]  ;;  %v409_v40 = vld [vmem:[%s8777_s18 + $0x90] sm:$0xff] }
  0x69   : > { %896 = vmatpush1.bf16.msra.mxu0 %v7498_v41  ;;  %1049 = vmatpush1.bf16.msra.mxu1 %v7499_v42  ;;  %v7556_v41 = vld [vmem:[%s11027_s3 + $0xe4] ss:$16 sps:$4 sm:$0xff]   ;;  %v7559_v42 = vld [vmem:[%s11027_s3 + $0xec] ss:$16 sps:$4 sm:$0xff]  }
  0x6a   : > { %897 = vmatprep.subr.bf16.mxu0 %v7500_v43  ;;  %1050 = vmatprep.subr.bf16.mxu1 %v7502_v44  ;;  %v412_v43 = vld [vmem:[%s8777_s18 + $0xa8] sm:$0xff]  ;;  %v414_v44 = vld [vmem:[%s8777_s18 + $0xb8] sm:$0xff] }
  0x6b   : > { %v450_v52 = vpack.c.bf16 %v414_v44, %v412_v43  ;;  %v7592_v44 = vld [vmem:[%s11027_s3 + $0x1a4] ss:$16 sps:$4 sm:$0xff]  }
  0x6d   : > { %898 = vmatpush1.bf16.msra.mxu0 %v7504_v45  ;;  %1051 = vmatpush1.bf16.msra.mxu1 %v7505_v46  ;;  %v7554_v45 = vld [vmem:[%s11027_s3 + $0xe0] ss:$16 sps:$4 sm:$0xff]   ;;  %v7557_v46 = vld [vmem:[%s11027_s3 + $0xe8] ss:$16 sps:$4 sm:$0xff]  }
  0x6e   : > { %899 = vmatprep.subr.bf16.mxu0 %v7506_v47  ;;  %1052 = vmatprep.subr.bf16.mxu1 %v7508_v48  ;;  %v7562_v47 = vld [vmem:[%s11027_s3 + $0x104] ss:$16 sps:$4 sm:$0xff]   ;;  %v7565_v48 = vld [vmem:[%s11027_s3 + $0x10c] ss:$16 sps:$4 sm:$0xff]  }
  0x71   : > { %900 = vmatpush1.bf16.msra.mxu0 %v7510_v49  ;;  %1053 = vmatpush1.bf16.msra.mxu1 %v7511_v50  ;;  %v447_v49 = vpack.c.bf16 %v409_v40, %v407_v39  ;;  %v7560_v50 = vld [vmem:[%s11027_s3 + $0x100] ss:$16 sps:$4 sm:$0xff]   ;;  %v438_v39 = vld [vmem:[%s8777_s18 + $0x178] sm:$0xff] }
  0x72   : > { %1728 = vmatprep.subr.bf16.mxu0 %v7514_v55  ;;  %1801 = vmatprep.subr.bf16.mxu1 %v7517_v56  ;;  %v411_v55 = vld [vmem:[%s8777_s18 + $0xa0] sm:$0xff]  ;;  %v413_v56 = vld [vmem:[%s8777_s18 + $0xb0] sm:$0xff] }
  0x74   : > { %902 = vmatmul.mubr.bf16.vlgmr.msra.gmra.mrb[0].mxu0 %v439_v57  ;;  %1055 = vmatmul.mubr.bf16.vlgmr.msra.gmra.mrb[0].mxu1 %v439_v57  ;;  %v416_v57 = vld [vmem:[%s8777_s18 + $0xc8] sm:$0xff] }
  0x75   : > { %911 = vmatprep.mubr.bf16.mxu0 %v442_v58  ;;  %1064 = vmatprep.mubr.bf16.mxu1 %v442_v58  ;;  %v418_v58 = vld [vmem:[%s8777_s18 + $0xd8] sm:$0xff] }
  0x76   : > { %1729 = vmatpush1.bf16.msra.mxu0 %v7512_v59  ;;  %1802 = vmatpush1.bf16.msra.mxu1 %v7515_v60  ;;  %v7566_v59 = vld [vmem:[%s11027_s3 + $0x120] ss:$16 sps:$4 sm:$0xff]   ;;  %v7569_v60 = vld [vmem:[%s11027_s3 + $0x128] ss:$16 sps:$4 sm:$0xff]   ;;  %v452_v2 = vpack.c.bf16 %v418_v58, %v416_v57  ;;  %v7613_v57 = vld [vmem:[%s11027_s3 + $0x20c] ss:$16 sps:$4 sm:$0xff]   ;;  %v529_v58 = vlaneseq }
  0x77   : > { %1730 = vmatprep.subr.bf16.mxu0 %v7520_v63  ;;  %1803 = vmatprep.subr.bf16.mxu1 %v7523_v0  ;;  %v449_v63 = vpack.c.bf16 %v413_v56, %v411_v55  ;;  %v7572_v0 = vld [vmem:[%s11027_s3 + $0x140] ss:$16 sps:$4 sm:$0xff]   ;;  %v7605_v55 = vld [vmem:[%s11027_s3 + $0x1e8] ss:$16 sps:$4 sm:$0xff]   ;;  %v7610_v56 = vld [vmem:[%s11027_s3 + $0x204] ss:$16 sps:$4 sm:$0xff]  }
  0x7a   : > { %1731 = vmatpush1.bf16.msra.mxu0 %v7518_v3  ;;  %1804 = vmatpush1.bf16.msra.mxu1 %v7521_v4  ;;  %v7580_v3 = vld [vmem:[%s11027_s3 + $0x164] ss:$16 sps:$4 sm:$0xff]   ;;  %v7583_v4 = vld [vmem:[%s11027_s3 + $0x16c] ss:$16 sps:$4 sm:$0xff]  }
  0x7b   : > { %1732 = vmatprep.subr.bf16.mxu0 %v7526_v5  ;;  %1805 = vmatprep.subr.bf16.mxu1 %v7529_v6  ;;  %v415_v5 = vld [vmem:[%s8777_s18 + $0xc0] sm:$0xff]  ;;  %v417_v6 = vld [vmem:[%s8777_s18 + $0xd0] sm:$0xff] }
  0x7c   : > { %912 = vmatmul.mubr.bf16.gmra.mrb[4].mxu0 %v441_v7  ;;  %1065 = vmatmul.mubr.bf16.gmra.mrb[4].mxu1 %v441_v7  ;;  %v420_v7 = vld [vmem:[%s8777_s18 + $0xe8] sm:$0xff] }
  0x7d   : > { %921 = vmatprep.mubr.bf16.mxu0 %v444_v8  ;;  %1074 = vmatprep.mubr.bf16.mxu1 %v444_v8  ;;  %v422_v8 = vld [vmem:[%s8777_s18 + $0xf8] sm:$0xff] }
  0x7e   : > { %1733 = vmatpush1.bf16.msra.mxu0 %v7524_v9  ;;  %1806 = vmatpush1.bf16.msra.mxu1 %v7527_v10  ;;  %v7578_v9 = vld [vmem:[%s11027_s3 + $0x160] ss:$16 sps:$4 sm:$0xff]   ;;  %v7581_v10 = vld [vmem:[%s11027_s3 + $0x168] ss:$16 sps:$4 sm:$0xff]   ;;  %v454_v16 = vpack.c.bf16 %v422_v8, %v420_v7 }
  0x7f   : > { %1734 = vmatprep.subr.bf16.mxu0 %v7532_v13  ;;  %1807 = vmatprep.subr.bf16.mxu1 %v7535_v14  ;;  %v451_v13 = vpack.c.bf16 %v417_v6, %v415_v5  ;;  %v7584_v14 = vld [vmem:[%s11027_s3 + $0x180] ss:$16 sps:$4 sm:$0xff]  }
  0x82   : > { %1735 = vmatpush1.bf16.msra.mxu0 %v7530_v17  ;;  %1808 = vmatpush1.bf16.msra.mxu1 %v7533_v18  ;;  %v419_v17 = vld [vmem:[%s8777_s18 + $0xe0] sm:$0xff]  ;;  %v421_v18 = vld [vmem:[%s8777_s18 + $0xf0] sm:$0xff] }
  0x83   : > { %1736 = vmatprep.subr.bf16.mxu0 %v7538_v19  ;;  %1809 = vmatprep.subr.bf16.mxu1 %v7541_v20  ;;  %v424_v19 = vld [vmem:[%s8777_s18 + $0x108] sm:$0xff]  ;;  %v426_v20 = vld [vmem:[%s8777_s18 + $0x118] sm:$0xff] }
  0x84   : > { %922 = vmatmul.mubr.bf16.gmra.mrb[8].mxu0 %v443_v21  ;;  %1075 = vmatmul.mubr.bf16.gmra.mrb[8].mxu1 %v443_v21  ;;  %v453_v21 = vpack.c.bf16 %v421_v18, %v419_v17 }
  0x85   : > { %931 = vmatprep.mubr.bf16.mxu0 %v446_v22  ;;  %1084 = vmatprep.mubr.bf16.mxu1 %v446_v22  ;;  %v456_v22 = vpack.c.bf16 %v426_v20, %v424_v19 }
  0x86   : > { %1737 = vmatpush1.bf16.msra.mxu0 %v7536_v23  ;;  %1810 = vmatpush1.bf16.msra.mxu1 %v7539_v24  ;;  %v423_v23 = vld [vmem:[%s8777_s18 + $0x100] sm:$0xff]  ;;  %v425_v24 = vld [vmem:[%s8777_s18 + $0x110] sm:$0xff] }
  0x87   : > { %1738 = vmatprep.subr.bf16.mxu0 %v7544_v27  ;;  %1811 = vmatprep.subr.bf16.mxu1 %v7547_v28  ;;  %v455_v27 = vpack.c.bf16 %v425_v24, %v423_v23  ;;  %v458_v28 = vpack.c.bf16 %v430_v26, %v428_v25 }
  0x8a   : > { %1739 = vmatpush1.bf16.msra.mxu0 %v7542_v31  ;;  %1812 = vmatpush1.bf16.msra.mxu1 %v7545_v32  ;;  %v432_v31 = vld [vmem:[%s8777_s18 + $0x148] sm:$0xff]  ;;  %v434_v32 = vld [vmem:[%s8777_s18 + $0x158] sm:$0xff] }
  0x8b   : > { %1740 = vmatprep.subr.bf16.mxu0 %v7550_v33  ;;  %1813 = vmatprep.subr.bf16.mxu1 %v7553_v34  ;;  %v457_v33 = vpack.c.bf16 %v429_v30, %v427_v29  ;;  %v460_v34 = vpack.c.bf16 %v434_v32, %v432_v31 }
  0x8c   : > { %932 = vmatmul.mubr.bf16.gmra.mrb[12].mxu0 %v445_v35  ;;  %1085 = vmatmul.mubr.bf16.gmra.mrb[12].mxu1 %v445_v35  ;;  %v431_v35 = vld [vmem:[%s8777_s18 + $0x140] sm:$0xff] }
  0x8d   : > { %941 = vmatprep.mubr.bf16.mxu0 %v448_v36  ;;  %1094 = vmatprep.mubr.bf16.mxu1 %v448_v36  ;;  %v433_v36 = vld [vmem:[%s8777_s18 + $0x150] sm:$0xff] }
  0x8e   : > { %1741 = vmatpush1.bf16.msra.mxu0 %v7548_v37  ;;  %1814 = vmatpush1.bf16.msra.mxu1 %v7551_v38  ;;  %v459_v37 = vpack.c.bf16 %v433_v36, %v431_v35  ;;  %v436_v38 = vld [vmem:[%s8777_s18 + $0x168] sm:$0xff] }
  0x8f   : > { %1742 = vmatprep.subr.bf16.mxu0 %v7556_v41  ;;  %1815 = vmatprep.subr.bf16.mxu1 %v7559_v42  ;;  %v462_v40 = vpack.c.bf16 %v438_v39, %v436_v38  ;;  %v435_v41 = vld [vmem:[%s8777_s18 + $0x160] sm:$0xff]  ;;  %v437_v42 = vld [vmem:[%s8777_s18 + $0x170] sm:$0xff]  ;;  %s8376_s18 = scalar_lea.vmem %s10983_s19, 512 }
  0x90   : > { %v461_v43 = vpack.c.bf16 %v437_v42, %v435_v41  ;;  %p8377_p13 = scmp.ne.s32.totalorder %s10983_s19, %s8376_s18  ;;  %p8384_p3 = scmp.lt.s32.totalorder %s8382_s8, %s8376_s18 }
  0x92   : > { %1743 = vmatpush1.bf16.msra.mxu0 %v7554_v45  ;;  %1816 = vmatpush1.bf16.msra.mxu1 %v7557_v46  ;;  %v7595_v45 = vld [vmem:[%s11027_s3 + $0x1ac] ss:$16 sps:$4 sm:$0xff]   ;;  %v7590_v46 = vld [vmem:[%s11027_s3 + $0x1a0] ss:$16 sps:$4 sm:$0xff]   ;;  %p8378_p0 = pnand %p8377_p13, %p8519_p6  ;;  %p8385_p4 = por %p8384_p3, %p8383_p2 }
  0x93   : > { %1744 = vmatprep.subr.bf16.mxu0 %v7562_v47  ;;  %1817 = vmatprep.subr.bf16.mxu1 %v7565_v48  ;;  %v7593_v47 = vld [vmem:[%s11027_s3 + $0x1a8] ss:$16 sps:$4 sm:$0xff]   ;;  %v7598_v48 = vld [vmem:[%s11027_s3 + $0x1c4] ss:$16 sps:$4 sm:$0xff]  }
  0x94   : > { %942 = vmatmul.mubr.bf16.gmra.mrb[16].mxu0 %v447_v49  ;;  %1095 = vmatmul.mubr.bf16.gmra.mrb[16].mxu1 %v447_v49  ;;  %v7601_v49 = vld [vmem:[%s11027_s3 + $0x1cc] ss:$16 sps:$4 sm:$0xff]   ;;  %p8379_p1 = pneg %p8378_p0 }
  0x95   : > { %951 = vmatprep.mubr.bf16.mxu0 %v450_v52  ;;  %1104 = vmatprep.mubr.bf16.mxu1 %v450_v52  ;;  %v7604_v52 = vld [vmem:[%s11027_s3 + $0x1e4] ss:$16 sps:$4 sm:$0xff]  }
  0x96   : > { %1745 = vmatpush1.bf16.msra.mxu0 %v7560_v50  ;;  %1818 = vmatpush1.bf16.msra.mxu1 %v7563_v51  ;;  %v7596_v50 = vld [vmem:[%s11027_s3 + $0x1c0] ss:$16 sps:$4 sm:$0xff]   ;;  %v7599_v51 = vld [vmem:[%s11027_s3 + $0x1c8] ss:$16 sps:$4 sm:$0xff]   ;;  %p8386_p5 = pnand %p8385_p4, %p8379_p1 }
  0x97   : > { %1746 = vmatprep.subr.bf16.mxu0 %v7568_v53  ;;  %1819 = vmatprep.subr.bf16.mxu1 %v7571_v54  ;;  %v7607_v53 = vld [vmem:[%s11027_s3 + $0x1ec] ss:$16 sps:$4 sm:$0xff]   ;;  %v7602_v54 = vld [vmem:[%s11027_s3 + $0x1e0] ss:$16 sps:$4 sm:$0xff]  }
  0x9a   : > { %1747 = vmatpush1.bf16.msra.mxu0 %v7566_v59  ;;  %1820 = vmatpush1.bf16.msra.mxu1 %v7569_v60  ;;  %v530_v59 = vshrl.u32 %v529_v58, 7 }
  0x9b   : > { %1748 = vmatprep.subr.bf16.mxu0 %v7574_v61  ;;  %1821 = vmatprep.subr.bf16.mxu1 %v7577_v62  ;;  %v527_v62 = vld [vmem:[%s11026_s2] sm:$0xf] }
  0x9c   : > { %952 = vmatmul.mubr.bf16.gmra.mrb[20].mxu0 %v449_v63  ;;  %1105 = vmatmul.mubr.bf16.gmra.mrb[20].mxu1 %v449_v63  ;;  %v9079_v60 = vsub.s32 0, %v530_v59  ;;  %v9081_v61 = vsub.s32 2, %v530_v59  ;;  %v9086_v63 = vsub.s32 1, %v530_v59 }
  0x9d   : > { %961 = vmatprep.mubr.bf16.mxu0 %v452_v2  ;;  %1114 = vmatprep.mubr.bf16.mxu1 %v452_v2 }
  0x9e   : > { %1749 = vmatpush1.bf16.msra.mxu0 %v7572_v0  ;;  %1822 = vmatpush1.bf16.msra.mxu1 %v7575_v1  ;;  %v9088_v0 = vsub.s32 3, %v530_v59  ;;  %v9091_v1 = vrot.slane %v527_v62, %v9079_v60  ;;  %v9094_v2 = vrot.slane %v527_v62, %v9081_v61 }
  0x9f   : > { %1750 = vmatprep.subr.bf16.mxu0 %v7580_v3  ;;  %1823 = vmatprep.subr.bf16.mxu1 %v7583_v4  ;;  %v9097_v3 = vrot.slane %v527_v62, %v9086_v63 }
  0xa0   : > { %v9100_v4 = vrot.slane %v527_v62, %v9088_v0 }
  0xa2   : > { %1751 = vmatpush1.bf16.msra.mxu0 %v7578_v9  ;;  %1824 = vmatpush1.bf16.msra.mxu1 %v7581_v10 }
  0xa3   : > { %1752 = vmatprep.subr.bf16.mxu0 %v7586_v11  ;;  %1825 = vmatprep.subr.bf16.mxu1 %v7589_v12 }
  0xa4   : > { %962 = vmatmul.mubr.bf16.gmra.mrb[24].mxu0 %v451_v13  ;;  %1115 = vmatmul.mubr.bf16.gmra.mrb[24].mxu1 %v451_v13 }
  0xa5   : > { %971 = vmatprep.mubr.bf16.mxu0 %v454_v16  ;;  %1124 = vmatprep.mubr.bf16.mxu1 %v454_v16 }
  0xa6   : > { %1753 = vmatpush1.bf16.msra.mxu0 %v7584_v14  ;;  %1826 = vmatpush1.bf16.msra.mxu1 %v7587_v15 }
  0xa7   : > { %1754 = vmatprep.subr.bf16.mxu0 %v7592_v44  ;;  %1827 = vmatprep.subr.bf16.mxu1 %v7595_v45 }
  0xaa   : > { %1755 = vmatpush1.bf16.msra.mxu0 %v7590_v46  ;;  %1828 = vmatpush1.bf16.msra.mxu1 %v7593_v47 }
  0xab   : > { %1756 = vmatprep.subr.bf16.mxu0 %v7598_v48  ;;  %1829 = vmatprep.subr.bf16.mxu1 %v7601_v49 }
  0xac   : > { %972 = vmatmul.mubr.bf16.gmra.mrb[28].mxu0 %v453_v21  ;;  %1125 = vmatmul.mubr.bf16.gmra.mrb[28].mxu1 %v453_v21 }
  0xad   : > { %981 = vmatprep.mubr.bf16.mxu0 %v456_v22  ;;  %1134 = vmatprep.mubr.bf16.mxu1 %v456_v22 }
  0xae   : > { %1757 = vmatpush1.bf16.msra.mxu0 %v7596_v50  ;;  %1830 = vmatpush1.bf16.msra.mxu1 %v7599_v51 }
  0xaf   : > { %1758 = vmatprep.subr.bf16.mxu0 %v7604_v52  ;;  %1831 = vmatprep.subr.bf16.mxu1 %v7607_v53 }
  0xb2   : > { %1759 = vmatpush1.bf16.msra.mxu0 %v7602_v54  ;;  %1832 = vmatpush1.bf16.msra.mxu1 %v7605_v55 }
  0xb3   : > { %2332 = vmatprep.subr.bf16.mxu0 %v7610_v56  ;;  %2405 = vmatprep.subr.bf16.mxu1 %v7613_v57 }
  0xb4   : > { %982 = vmatmul.mubr.bf16.gmra.mrb[32].mxu0 %v455_v27  ;;  %1135 = vmatmul.mubr.bf16.gmra.mrb[32].mxu1 %v455_v27 }
  0xb5   : > { %991 = vmatprep.mubr.bf16.mxu0 %v458_v28  ;;  %1144 = vmatprep.mubr.bf16.mxu1 %v458_v28 }
  0xbc   : > { %992 = vmatmul.mubr.bf16.gmra.mrb[36].mxu0 %v457_v33  ;;  %1145 = vmatmul.mubr.bf16.gmra.mrb[36].mxu1 %v457_v33 }
  0xbd   : > { %1001 = vmatprep.mubr.bf16.mxu0 %v460_v34  ;;  %1154 = vmatprep.mubr.bf16.mxu1 %v460_v34 }
  0xc4   : > { %1002 = vmatmul.mubr.bf16.gmra.mrb[40].mxu0 %v459_v37  ;;  %1155 = vmatmul.mubr.bf16.gmra.mrb[40].mxu1 %v459_v37 }
  0xc5   : > { %1011 = vmatprep.mubr.bf16.mxu0 %v462_v40  ;;  %1164 = vmatprep.mubr.bf16.mxu1 %v462_v40 }
  0xcc   : > { %1012 = vmatmul.mubr.bf16.gmra.mrb[44].mxu0 %v461_v43  ;;  %1165 = vmatmul.mubr.bf16.gmra.mrb[44].mxu1 %v461_v43 }
 0x147   : > { %v903_v5 = vpop.f32.mrb[0].mxu0  ;;  %v1056_v6 = vpop.f32.mrb[0].mxu1 }
 0x148   : > { %v904_v7 = vadd.f32 %v903_v5, %v9091_v1  ;;  %v1057_v8 = vadd.f32 %v1056_v6, %v9094_v2  ;;  %v905_v9 = vpop.f32.mrb[1].mxu0  ;;  %v1058_v10 = vpop.f32.mrb[1].mxu1 }
 0x149   : > { %v906_v11 = vadd.f32 %v905_v9, %v9097_v3  ;;  %v1059_v12 = vadd.f32 %v1058_v10, %v9100_v4  ;;  %v907_v13 = vpop.f32.mrb[2].mxu0  ;;  %v1060_v14 = vpop.f32.mrb[2].mxu1 }
 0x14a   : > { %v1175_v15 = vmax.f32 %v904_v7, %v1057_v8  ;;  %v908_v16 = vadd.f32 %v907_v13, %v9091_v1  ;;  %v1061_v17 = vadd.f32 %v1060_v14, %v9094_v2  ;;  %v909_v18 = vpop.f32.mrb[3].mxu0  ;;  %v1062_v19 = vpop.f32.mrb[3].mxu1  ;;  %v7608_v7 = vld [vmem:[%s11027_s3 + $0x200] ss:$16 sps:$4 sm:$0xff]   ;;  %v7611_v14 = vld [vmem:[%s11027_s3 + $0x208] ss:$16 sps:$4 sm:$0xff]  }
 0x14b   : > { %v1176_v20 = vmax.f32 %v906_v11, %v1059_v12  ;;  %v910_v21 = vadd.f32 %v909_v18, %v9097_v3  ;;  %v1063_v22 = vadd.f32 %v1062_v19, %v9100_v4 }
 0x14c   : > { %v1177_v23 = vmax.f32 %v908_v16, %v1061_v17 }
 0x14d   : > { %v1178_v24 = vmax.f32 %v910_v21, %v1063_v22 }
 0x14e   : > { %v1223_v25 = vmax.f32 %v1175_v15, %v1177_v23  ;;  %v7616_v15 = vld [vmem:[%s11027_s3 + $0x224] ss:$16 sps:$4 sm:$0xff]  }
 0x14f   : > { %v1224_v26 = vmax.f32 %v1176_v20, %v1178_v24  ;;  %v913_v27 = vpop.f32.mrb[4].mxu0  ;;  %v1066_v28 = vpop.f32.mrb[4].mxu1  ;;  %v7619_v20 = vld [vmem:[%s11027_s3 + $0x22c] ss:$16 sps:$4 sm:$0xff]   ;;  %v7614_v24 = vld [vmem:[%s11027_s3 + $0x220] ss:$16 sps:$4 sm:$0xff]  }
 0x150   : > { %v914_v29 = vadd.f32 %v913_v27, %v9091_v1  ;;  %v1067_v30 = vadd.f32 %v1066_v28, %v9094_v2  ;;  %v915_v31 = vpop.f32.mrb[5].mxu0  ;;  %v1068_v32 = vpop.f32.mrb[5].mxu1  ;;  %v1247_v48 = vmax.f32 %v1223_v25, 0.0  ;;  %v7617_v25 = vld [vmem:[%s11027_s3 + $0x228] ss:$16 sps:$4 sm:$0xff]  }
 0x151   : > { %v916_v33 = vadd.f32 %v915_v31, %v9097_v3  ;;  %v1069_v34 = vadd.f32 %v1068_v32, %v9100_v4  ;;  %v917_v35 = vpop.f32.mrb[6].mxu0  ;;  %v1070_v36 = vpop.f32.mrb[6].mxu1  ;;  %v1248_v57 = vmax.f32 %v1224_v26, 0.0 }
 0x152   : > { %v1179_v37 = vmax.f32 %v914_v29, %v1067_v30  ;;  %v918_v38 = vadd.f32 %v917_v35, %v9091_v1  ;;  %v1071_v39 = vadd.f32 %v1070_v36, %v9094_v2  ;;  %v919_v40 = vpop.f32.mrb[7].mxu0  ;;  %v1072_v41 = vpop.f32.mrb[7].mxu1  ;;  %v7622_v29 = vld [vmem:[%s11027_s3 + $0x244] ss:$16 sps:$4 sm:$0xff]   ;;  %v7625_v30 = vld [vmem:[%s11027_s3 + $0x24c] ss:$16 sps:$4 sm:$0xff]  }
 0x153   : > { %v1180_v42 = vmax.f32 %v916_v33, %v1069_v34  ;;  %v920_v43 = vadd.f32 %v919_v40, %v9097_v3  ;;  %v1073_v44 = vadd.f32 %v1072_v41, %v9100_v4 }
 0x154   : > { %v1181_v45 = vmax.f32 %v918_v38, %v1071_v39 }
 0x155   : > { %v1182_v46 = vmax.f32 %v920_v43, %v1073_v44 }
 0x156   : > { %v1225_v47 = vmax.f32 %v1179_v37, %v1181_v45 }
 0x157   : > { %v9118_v49 = vmax.f32 %v1180_v42, %v1182_v46  ;;  %v923_v50 = vpop.f32.mrb[8].mxu0  ;;  %v1076_v51 = vpop.f32.mrb[8].mxu1 }
 0x158   : > { %v1249_v52 = vmax.f32 %v1225_v47, 0.0  ;;  %v924_v53 = vadd.f32 %v923_v50, %v9091_v1  ;;  %v1077_v54 = vadd.f32 %v1076_v51, %v9094_v2  ;;  %v925_v55 = vpop.f32.mrb[9].mxu0  ;;  %v1078_v56 = vpop.f32.mrb[9].mxu1  ;;  %v7620_v47 = vld [vmem:[%s11027_s3 + $0x240] ss:$16 sps:$4 sm:$0xff]  }
 0x159   : > { %v1250_v58 = vmax.f32 %v9118_v49, 0.0  ;;  %v926_v59 = vadd.f32 %v925_v55, %v9097_v3  ;;  %v1079_v62 = vadd.f32 %v1078_v56, %v9100_v4  ;;  %v927_v5 = vpop.f32.mrb[10].mxu0  ;;  %v1080_v6 = vpop.f32.mrb[10].mxu1 }
 0x15a   : > { %v7164_v8 = vpack.c.bf16 %v1249_v52, %v1247_v48  ;;  %v1183_v9 = vmax.f32 %v924_v53, %v1077_v54  ;;  %v928_v10 = vadd.f32 %v927_v5, %v9091_v1  ;;  %v1081_v11 = vadd.f32 %v1080_v6, %v9094_v2  ;;  %v929_v12 = vpop.f32.mrb[11].mxu0  ;;  %v1082_v13 = vpop.f32.mrb[11].mxu1  ;;  %v7623_v48 = vld [vmem:[%s11027_s3 + $0x248] ss:$16 sps:$4 sm:$0xff]   ;;  %v7628_v53 = vld [vmem:[%s11027_s3 + $0x264] ss:$16 sps:$4 sm:$0xff]  }
 0x15b   : > { %v1184_v16 = vmax.f32 %v926_v59, %v1079_v62  ;;  %v930_v17 = vadd.f32 %v929_v12, %v9097_v3  ;;  %v1083_v18 = vadd.f32 %v1082_v13, %v9100_v4  ;;  %v7165_v19 = vpack.c.bf16 %v1250_v58, %v1248_v57  ;;  %v7631_v54 = vld [vmem:[%s11027_s3 + $0x26c] ss:$16 sps:$4 sm:$0xff]   ;;  %v7634_v12 = vld [vmem:[%s11027_s3 + $0x284] ss:$16 sps:$4 sm:$0xff]  }
 0x15c   : > { %v1185_v21 = vmax.f32 %v928_v10, %v1081_v11 }
 0x15d   : > { %v1186_v22 = vmax.f32 %v930_v17, %v1083_v18  ;;  %1760 = vmatprep.mubr.bf16.mxu0 %v7165_v19  ;;  %1833 = vmatprep.mubr.bf16.mxu1 %v7165_v19  ;;  %v7637_v18 = vld [vmem:[%s11027_s3 + $0x28c] ss:$16 sps:$4 sm:$0xff]  }
 0x15e   : > { %v9143_v23 = vmax.f32 %v1183_v9, %v1185_v21  ;;  %1761 = vmatmul.mubr.bf16.vlgmr.msra.gmra.mrb[48].mxu0 %v7164_v8  ;;  %1834 = vmatmul.mubr.bf16.vlgmr.msra.gmra.mrb[48].mxu1 %v7164_v8  ;;  %v7629_v8 = vld [vmem:[%s11027_s3 + $0x268] ss:$16 sps:$4 sm:$0xff]  }
 0x15f   : > { %v9151_v26 = vmax.f32 %v1184_v16, %v1186_v22  ;;  %2333 = vmatpush1.bf16.msra.mxu0 %v7608_v7  ;;  %2406 = vmatpush1.bf16.msra.mxu1 %v7611_v14  ;;  %v933_v27 = vpop.f32.mrb[12].mxu0  ;;  %v1086_v28 = vpop.f32.mrb[12].mxu1  ;;  %v7626_v7 = vld [vmem:[%s11027_s3 + $0x260] ss:$16 sps:$4 sm:$0xff]  }
 0x160   : > { %v1251_v31 = vmax.f32 %v9143_v23, 0.0  ;;  %v934_v32 = vadd.f32 %v933_v27, %v9091_v1  ;;  %v1087_v33 = vadd.f32 %v1086_v28, %v9094_v2  ;;  %v935_v34 = vpop.f32.mrb[13].mxu0  ;;  %v1088_v35 = vpop.f32.mrb[13].mxu1  ;;  %2334 = vmatprep.subr.bf16.mxu0 %v7616_v15  ;;  %2407 = vmatprep.subr.bf16.mxu1 %v7619_v20 }
 0x161   : > { %v1252_v36 = vmax.f32 %v9151_v26, 0.0  ;;  %v936_v37 = vadd.f32 %v935_v34, %v9097_v3  ;;  %v1089_v38 = vadd.f32 %v1088_v35, %v9100_v4  ;;  %v937_v39 = vpop.f32.mrb[14].mxu0  ;;  %v1090_v40 = vpop.f32.mrb[14].mxu1  ;;  %v7635_v26 = vld [vmem:[%s11027_s3 + $0x288] ss:$16 sps:$4 sm:$0xff]  }
 0x162   : > { %v9165_v41 = vpack.c.bf16 %v1251_v31, %v1249_v52  ;;  %v1187_v42 = vmax.f32 %v934_v32, %v1087_v33  ;;  %v938_v43 = vadd.f32 %v937_v39, %v9091_v1  ;;  %v1091_v44 = vadd.f32 %v1090_v40, %v9094_v2  ;;  %v939_v45 = vpop.f32.mrb[15].mxu0  ;;  %v1092_v46 = vpop.f32.mrb[15].mxu1  ;;  %v7643_v32 = vld [vmem:[%s11027_s3 + $0x2ac] ss:$16 sps:$4 sm:$0xff]   ;;  %v7638_v39 = vld [vmem:[%s11027_s3 + $0x2a0] ss:$16 sps:$4 sm:$0xff]  }
 0x163   : > { %v1188_v50 = vmax.f32 %v936_v37, %v1089_v38  ;;  %v940_v51 = vadd.f32 %v939_v45, %v9097_v3  ;;  %v1093_v52 = vadd.f32 %v1092_v46, %v9100_v4  ;;  %2335 = vmatpush1.bf16.msra.mxu0 %v7614_v24  ;;  %2408 = vmatpush1.bf16.msra.mxu1 %v7617_v25  ;;  %v7632_v25 = vld [vmem:[%s11027_s3 + $0x280] ss:$16 sps:$4 sm:$0xff]   ;;  %v7641_v40 = vld [vmem:[%s11027_s3 + $0x2a8] ss:$16 sps:$4 sm:$0xff]  }
 0x164   : > { %v1189_v55 = vmax.f32 %v938_v43, %v1091_v44  ;;  %2336 = vmatprep.subr.bf16.mxu0 %v7622_v29  ;;  %2409 = vmatprep.subr.bf16.mxu1 %v7625_v30  ;;  %v9185_v56 = vpack.c.bf16 %v1252_v36, %v1250_v58 }
 0x165   : > { %v1190_v57 = vmax.f32 %v940_v51, %v1093_v52 }
 0x166   : > { %v9187_v59 = vmax.f32 %v1187_v42, %v1189_v55 }
 0x167   : > { %v9189_v62 = vmax.f32 %v1188_v50, %v1190_v57  ;;  %2337 = vmatpush1.bf16.msra.mxu0 %v7620_v47  ;;  %2410 = vmatpush1.bf16.msra.mxu1 %v7623_v48  ;;  %v943_v5 = vpop.f32.mrb[16].mxu0  ;;  %v1096_v6 = vpop.f32.mrb[16].mxu1  ;;  %v7646_v47 = vld [vmem:[%s11027_s3 + $0x2c4] ss:$16 sps:$4 sm:$0xff]  }
 0x168   : > { %v1253_v49 = vmax.f32 %v9187_v59, 0.0  ;;  %v944_v58 = vadd.f32 %v943_v5, %v9091_v1  ;;  %v1097_v9 = vadd.f32 %v1096_v6, %v9094_v2  ;;  %v945_v10 = vpop.f32.mrb[17].mxu0  ;;  %v1098_v11 = vpop.f32.mrb[17].mxu1  ;;  %2338 = vmatprep.subr.bf16.mxu0 %v7628_v53  ;;  %2411 = vmatprep.subr.bf16.mxu1 %v7631_v54  ;;  %v7649_v54 = vld [vmem:[%s11027_s3 + $0x2cc] ss:$16 sps:$4 sm:$0xff]  }
 0x169   : > { %v1254_v13 = vmax.f32 %v9189_v62, 0.0  ;;  %v946_v14 = vadd.f32 %v945_v10, %v9097_v3  ;;  %v1099_v15 = vadd.f32 %v1098_v11, %v9100_v4  ;;  %v947_v16 = vpop.f32.mrb[18].mxu0  ;;  %v1100_v17 = vpop.f32.mrb[18].mxu1  ;;  %v7652_v11 = vld [vmem:[%s11027_s3 + $0x2e4] ss:$16 sps:$4 sm:$0xff]  }
 0x16a   : > { %v9209_v19 = vpack.c.bf16 %v1253_v49, %v1251_v31  ;;  %v1191_v20 = vmax.f32 %v944_v58, %v1097_v9  ;;  %v948_v21 = vadd.f32 %v947_v16, %v9091_v1  ;;  %v1101_v22 = vadd.f32 %v1100_v17, %v9094_v2  ;;  %v949_v23 = vpop.f32.mrb[19].mxu0  ;;  %v1102_v24 = vpop.f32.mrb[19].mxu1  ;;  %v7640_v31 = vld [vmem:[%s11027_s3 + $0x2a4] ss:$16 sps:$4 sm:$0xff]  }
 0x16b   : > { %v9219_v27 = vpack.c.bf16 %v1254_v13, %v1252_v36  ;;  %v1192_v28 = vmax.f32 %v946_v14, %v1099_v15  ;;  %v950_v29 = vadd.f32 %v949_v23, %v9097_v3  ;;  %v1103_v30 = vadd.f32 %v1102_v24, %v9100_v4  ;;  %2339 = vmatpush1.bf16.msra.mxu0 %v7626_v7  ;;  %v7644_v7 = vld [vmem:[%s11027_s3 + $0x2c0] ss:$16 sps:$4 sm:$0xff]  }
 0x16c   : > { %v1193_v33 = vmax.f32 %v948_v21, %v1101_v22  ;;  %2412 = vmatpush1.bf16.msra.mxu1 %v7629_v8  ;;  %2340 = vmatprep.subr.bf16.mxu0 %v7634_v12  ;;  %v7647_v8 = vld [vmem:[%s11027_s3 + $0x2c8] ss:$16 sps:$4 sm:$0xff]   ;;  %v7655_v12 = vld [vmem:[%s11027_s3 + $0x2ec] ss:$16 sps:$4 sm:$0xff]  }
 0x16d   : > { %v1194_v34 = vmax.f32 %v950_v29, %v1103_v30  ;;  %1770 = vmatprep.mubr.bf16.mxu0 %v9219_v27  ;;  %1843 = vmatprep.mubr.bf16.mxu1 %v9219_v27  ;;  %v7653_v21 = vld [vmem:[%s11027_s3 + $0x2e8] ss:$16 sps:$4 sm:$0xff]  }
 0x16e   : > { %v9231_v35 = vmax.f32 %v1191_v20, %v1193_v33  ;;  %2413 = vmatprep.subr.bf16.mxu1 %v7637_v18  ;;  %1771 = vmatmul.mubr.bf16.gmra.mrb[52].mxu0 %v9209_v19  ;;  %v7650_v20 = vld [vmem:[%s11027_s3 + $0x2e0] ss:$16 sps:$4 sm:$0xff]  }
 0x16f   : > { %v9234_v36 = vmax.f32 %v1192_v28, %v1194_v34  ;;  %1844 = vmatmul.mubr.bf16.gmra.mrb[52].mxu1 %v9209_v19  ;;  %2341 = vmatpush1.bf16.msra.mxu0 %v7632_v25  ;;  %v953_v37 = vpop.f32.mrb[20].mxu0  ;;  %v1106_v38 = vpop.f32.mrb[20].mxu1  ;;  %v7658_v28 = vld [vmem:[%s11027_s3 + $0x304] ss:$16 sps:$4 sm:$0xff]  }
 0x170   : > { %v1255_v42 = vmax.f32 %v9231_v35, 0.0  ;;  %2414 = vmatpush1.bf16.msra.mxu1 %v7635_v26  ;;  %v954_v43 = vadd.f32 %v953_v37, %v9091_v1  ;;  %v1107_v44 = vadd.f32 %v1106_v38, %v9094_v2  ;;  %v955_v45 = vpop.f32.mrb[21].mxu0  ;;  %v1108_v46 = vpop.f32.mrb[21].mxu1  ;;  %2342 = vmatprep.subr.bf16.mxu0 %v7640_v31 }
 0x171   : > { %v1256_v48 = vmax.f32 %v9234_v36, 0.0  ;;  %v956_v50 = vadd.f32 %v955_v45, %v9097_v3  ;;  %v1109_v51 = vadd.f32 %v1108_v46, %v9100_v4  ;;  %v957_v52 = vpop.f32.mrb[22].mxu0  ;;  %v1110_v53 = vpop.f32.mrb[22].mxu1  ;;  %2415 = vmatprep.subr.bf16.mxu1 %v7643_v32 }
 0x172   : > { %v9255_v55 = vpack.c.bf16 %v1255_v42, %v1253_v49  ;;  %v1195_v57 = vmax.f32 %v954_v43, %v1107_v44  ;;  %v958_v59 = vadd.f32 %v957_v52, %v9091_v1  ;;  %v1111_v62 = vadd.f32 %v1110_v53, %v9094_v2  ;;  %v959_v5 = vpop.f32.mrb[23].mxu0  ;;  %v1112_v6 = vpop.f32.mrb[23].mxu1  ;;  %v7661_v43 = vld [vmem:[%s11027_s3 + $0x30c] ss:$16 sps:$4 sm:$0xff]  }
 0x173   : > { %v9265_v58 = vpack.c.bf16 %v1256_v48, %v1254_v13  ;;  %v1196_v9 = vmax.f32 %v956_v50, %v1109_v51  ;;  %v960_v49 = vadd.f32 %v959_v5, %v9097_v3  ;;  %v1113_v10 = vadd.f32 %v1112_v6, %v9100_v4  ;;  %2343 = vmatpush1.bf16.msra.mxu0 %v7638_v39  ;;  %v7664_v50 = vld [vmem:[%s11027_s3 + $0x324] ss:$16 sps:$4 sm:$0xff]   ;;  %v7665_v5 = vld [vmem:[%s11027_s3 + $0x328] ss:$16 sps:$4 sm:$0xff]  }
 0x174   : > { %v1197_v14 = vmax.f32 %v958_v59, %v1111_v62  ;;  %2416 = vmatpush1.bf16.msra.mxu1 %v7641_v40  ;;  %2344 = vmatprep.subr.bf16.mxu0 %v7646_v47  ;;  %v7656_v40 = vld [vmem:[%s11027_s3 + $0x300] ss:$16 sps:$4 sm:$0xff]   ;;  %v7659_v47 = vld [vmem:[%s11027_s3 + $0x308] ss:$16 sps:$4 sm:$0xff]  }
 0x175   : > { %v1198_v15 = vmax.f32 %v960_v49, %v1113_v10  ;;  %2417 = vmatprep.subr.bf16.mxu1 %v7649_v54  ;;  %v7662_v62 = vld [vmem:[%s11027_s3 + $0x320] ss:$16 sps:$4 sm:$0xff]   ;;  %v7670_v10 = vld [vmem:[%s11027_s3 + $0x344] ss:$16 sps:$4 sm:$0xff]  }
 0x176   : > { %v9275_v13 = vmax.f32 %v1195_v57, %v1197_v14 }
 0x177   : > { %v9277_v16 = vmax.f32 %v1196_v9, %v1198_v15  ;;  %2345 = vmatpush1.bf16.msra.mxu0 %v7644_v7  ;;  %v963_v17 = vpop.f32.mrb[24].mxu0  ;;  %v1116_v18 = vpop.f32.mrb[24].mxu1 }
 0x178   : > { %v1257_v22 = vmax.f32 %v9275_v13, 0.0  ;;  %2418 = vmatpush1.bf16.msra.mxu1 %v7647_v8  ;;  %v964_v23 = vadd.f32 %v963_v17, %v9091_v1  ;;  %v1117_v24 = vadd.f32 %v1116_v18, %v9094_v2  ;;  %v965_v25 = vpop.f32.mrb[25].mxu0  ;;  %v1118_v26 = vpop.f32.mrb[25].mxu1  ;;  %2346 = vmatprep.subr.bf16.mxu0 %v7652_v11 }
 0x179   : > { %v1258_v29 = vmax.f32 %v9277_v16, 0.0  ;;  %v966_v30 = vadd.f32 %v965_v25, %v9097_v3  ;;  %v1119_v31 = vadd.f32 %v1118_v26, %v9100_v4  ;;  %v967_v32 = vpop.f32.mrb[26].mxu0  ;;  %v1120_v33 = vpop.f32.mrb[26].mxu1  ;;  %2419 = vmatprep.subr.bf16.mxu1 %v7655_v12  ;;  %v7673_v16 = vld [vmem:[%s11027_s3 + $0x34c] ss:$16 sps:$4 sm:$0xff]  }
 0x17a   : > { %v9294_v34 = vpack.c.bf16 %v1257_v22, %v1255_v42  ;;  %v1199_v35 = vmax.f32 %v964_v23, %v1117_v24  ;;  %v968_v36 = vadd.f32 %v967_v32, %v9091_v1  ;;  %v1121_v37 = vadd.f32 %v1120_v33, %v9094_v2  ;;  %v969_v38 = vpop.f32.mrb[27].mxu0  ;;  %v1122_v39 = vpop.f32.mrb[27].mxu1  ;;  %v7671_v32 = vld [vmem:[%s11027_s3 + $0x348] ss:$16 sps:$4 sm:$0xff]  }
 0x17b   : > { %v9304_v44 = vpack.c.bf16 %v1258_v29, %v1256_v48  ;;  %v1200_v45 = vmax.f32 %v966_v30, %v1119_v31  ;;  %v970_v42 = vadd.f32 %v969_v38, %v9097_v3  ;;  %v1123_v46 = vadd.f32 %v1122_v39, %v9100_v4  ;;  %2347 = vmatpush1.bf16.msra.mxu0 %v7650_v20  ;;  %v7667_v48 = vld [vmem:[%s11027_s3 + $0x32c] ss:$16 sps:$4 sm:$0xff]  }
 0x17c   : > { %v1201_v51 = vmax.f32 %v968_v36, %v1121_v37  ;;  %2420 = vmatpush1.bf16.msra.mxu1 %v7653_v21  ;;  %2348 = vmatprep.subr.bf16.mxu0 %v7658_v28 }
 0x17d   : > { %v1202_v52 = vmax.f32 %v970_v42, %v1123_v46  ;;  %1780 = vmatprep.mubr.bf16.mxu0 %v9304_v44  ;;  %1853 = vmatprep.mubr.bf16.mxu1 %v9304_v44 }
 0x17e   : > { %v9319_v53 = vmax.f32 %v1199_v35, %v1201_v51  ;;  %2421 = vmatprep.subr.bf16.mxu1 %v7661_v43  ;;  %1781 = vmatmul.mubr.bf16.gmra.mrb[56].mxu0 %v9294_v34  ;;  %v7679_v35 = vld [vmem:[%s11027_s3 + $0x36c] ss:$16 sps:$4 sm:$0xff]   ;;  %v7677_v43 = vld [vmem:[%s11027_s3 + $0x368] ss:$16 sps:$4 sm:$0xff]   ;;  %v7682_v51 = vld [vmem:[%s11027_s3 + $0x384] ss:$16 sps:$4 sm:$0xff]  }
 0x17f   : > { %v9322_v54 = vmax.f32 %v1200_v45, %v1202_v52  ;;  %1854 = vmatmul.mubr.bf16.gmra.mrb[56].mxu1 %v9294_v34  ;;  %2349 = vmatpush1.bf16.msra.mxu0 %v7656_v40  ;;  %v973_v57 = vpop.f32.mrb[28].mxu0  ;;  %v1126_v59 = vpop.f32.mrb[28].mxu1  ;;  %v7674_v40 = vld [vmem:[%s11027_s3 + $0x360] ss:$16 sps:$4 sm:$0xff]  }
 0x180   : > { %v1259_v6 = vmax.f32 %v9319_v53, 0.0  ;;  %2422 = vmatpush1.bf16.msra.mxu1 %v7659_v47  ;;  %v974_v7 = vadd.f32 %v973_v57, %v9091_v1  ;;  %v1127_v8 = vadd.f32 %v1126_v59, %v9094_v2  ;;  %v975_v9 = vpop.f32.mrb[29].mxu0  ;;  %v1128_v49 = vpop.f32.mrb[29].mxu1  ;;  %2350 = vmatprep.subr.bf16.mxu0 %v7664_v50 }
 0x181   : > { %v1260_v11 = vmax.f32 %v9322_v54, 0.0  ;;  %v976_v12 = vadd.f32 %v975_v9, %v9097_v3  ;;  %v1129_v14 = vadd.f32 %v1128_v49, %v9100_v4  ;;  %v977_v15 = vpop.f32.mrb[30].mxu0  ;;  %v1130_v13 = vpop.f32.mrb[30].mxu1  ;;  %2423 = vmatprep.subr.bf16.mxu1 %v7667_v48  ;;  %v7685_v49 = vld [vmem:[%s11027_s3 + $0x38c] ss:$16 sps:$4 sm:$0xff]  }
 0x182   : > { %v9343_v17 = vpack.c.bf16 %v1259_v6, %v1257_v22  ;;  %v1203_v18 = vmax.f32 %v974_v7, %v1127_v8  ;;  %v978_v20 = vadd.f32 %v977_v15, %v9091_v1  ;;  %v1131_v21 = vadd.f32 %v1130_v13, %v9094_v2  ;;  %v979_v23 = vpop.f32.mrb[31].mxu0  ;;  %v1132_v24 = vpop.f32.mrb[31].mxu1  ;;  %v7668_v22 = vld [vmem:[%s11027_s3 + $0x340] ss:$16 sps:$4 sm:$0xff]  }
 0x183   : > { %v9347_v25 = vpack.c.bf16 %v1260_v11, %v1258_v29  ;;  %v1204_v26 = vmax.f32 %v976_v12, %v1129_v14  ;;  %v980_v28 = vadd.f32 %v979_v23, %v9097_v3  ;;  %v1133_v30 = vadd.f32 %v1132_v24, %v9100_v4  ;;  %2351 = vmatpush1.bf16.msra.mxu0 %v7662_v62  ;;  %v7676_v29 = vld [vmem:[%s11027_s3 + $0x364] ss:$16 sps:$4 sm:$0xff]   ;;  %v7686_v24 = vld [vmem:[%s11027_s3 + $0x3a0] ss:$16 sps:$4 sm:$0xff]  }
 0x184   : > { %v1205_v31 = vmax.f32 %v978_v20, %v1131_v21  ;;  %2424 = vmatpush1.bf16.msra.mxu1 %v7665_v5  ;;  %2352 = vmatprep.subr.bf16.mxu0 %v7670_v10  ;;  %v7691_v21 = vld [vmem:[%s11027_s3 + $0x3ac] ss:$16 sps:$4 sm:$0xff]  }
 0x185   : > { %v1206_v33 = vmax.f32 %v980_v28, %v1133_v30  ;;  %2425 = vmatprep.subr.bf16.mxu1 %v7673_v16  ;;  %v7683_v16 = vld [vmem:[%s11027_s3 + $0x388] ss:$16 sps:$4 sm:$0xff]  }
 0x186   : > { %v9363_v36 = vmax.f32 %v1203_v18, %v1205_v31  ;;  %v7694_v31 = vld [vmem:[%s11027_s3 + $0x3c4] ss:$16 sps:$4 sm:$0xff]  }
 0x187   : > { %v9365_v37 = vmax.f32 %v1204_v26, %v1206_v33  ;;  %2353 = vmatpush1.bf16.msra.mxu0 %v7668_v22  ;;  %v983_v38 = vpop.f32.mrb[32].mxu0  ;;  %v1136_v39 = vpop.f32.mrb[32].mxu1  ;;  %v7689_v26 = vld [vmem:[%s11027_s3 + $0x3a8] ss:$16 sps:$4 sm:$0xff]  }
 0x188   : > { %v1261_v45 = vmax.f32 %v9363_v36, 0.0  ;;  %2426 = vmatpush1.bf16.msra.mxu1 %v7671_v32  ;;  %v984_v42 = vadd.f32 %v983_v38, %v9091_v1  ;;  %v1137_v46 = vadd.f32 %v1136_v39, %v9094_v2  ;;  %v985_v47 = vpop.f32.mrb[33].mxu0  ;;  %v1138_v50 = vpop.f32.mrb[33].mxu1  ;;  %2354 = vmatprep.subr.bf16.mxu0 %v7676_v29 }
 0x189   : > { %v1262_v52 = vmax.f32 %v9365_v37, 0.0  ;;  %v986_v48 = vadd.f32 %v985_v47, %v9097_v3  ;;  %v1139_v53 = vadd.f32 %v1138_v50, %v9100_v4  ;;  %v987_v54 = vpop.f32.mrb[34].mxu0  ;;  %v1140_v57 = vpop.f32.mrb[34].mxu1  ;;  %2427 = vmatprep.subr.bf16.mxu1 %v7679_v35  ;;  %v7697_v37 = vld [vmem:[%s11027_s3 + $0x3cc] ss:$16 sps:$4 sm:$0xff]  }
 0x18a   : > { %v9382_v59 = vpack.c.bf16 %v1261_v45, %v1259_v6  ;;  %v1207_v62 = vmax.f32 %v984_v42, %v1137_v46  ;;  %v988_v5 = vadd.f32 %v987_v54, %v9091_v1  ;;  %v1141_v7 = vadd.f32 %v1140_v57, %v9094_v2  ;;  %v989_v8 = vpop.f32.mrb[35].mxu0  ;;  %v1142_v9 = vpop.f32.mrb[35].mxu1  ;;  %v7680_v6 = vld [vmem:[%s11027_s3 + $0x380] ss:$16 sps:$4 sm:$0xff]  }
 0x18b   : > { %v9389_v10 = vpack.c.bf16 %v1262_v52, %v1260_v11  ;;  %v1208_v12 = vmax.f32 %v986_v48, %v1139_v53  ;;  %v990_v14 = vadd.f32 %v989_v8, %v9097_v3  ;;  %v1143_v15 = vadd.f32 %v1142_v9, %v9100_v4  ;;  %2355 = vmatpush1.bf16.msra.mxu0 %v7674_v40  ;;  %v7688_v11 = vld [vmem:[%s11027_s3 + $0x3a4] ss:$16 sps:$4 sm:$0xff]   ;;  %v7692_v53 = vld [vmem:[%s11027_s3 + $0x3c0] ss:$16 sps:$4 sm:$0xff]  }
 0x18c   : > { %v1209_v13 = vmax.f32 %v988_v5, %v1141_v7  ;;  %2428 = vmatpush1.bf16.msra.mxu1 %v7677_v43  ;;  %2356 = vmatprep.subr.bf16.mxu0 %v7682_v51  ;;  %v7703_v7 = vld [vmem:[%s11027_s3 + $0x3ec] ss:$16 sps:$4 sm:$0xff]  }
 0x18d   : > { %v1210_v18 = vmax.f32 %v990_v14, %v1143_v15  ;;  %1790 = vmatprep.mubr.bf16.mxu0 %v9389_v10  ;;  %1863 = vmatprep.mubr.bf16.mxu1 %v9389_v10 }
 0x18e   : > { %v9404_v20 = vmax.f32 %v1207_v62, %v1209_v13  ;;  %2429 = vmatprep.subr.bf16.mxu1 %v7685_v49  ;;  %1791 = vmatmul.mubr.bf16.gmra.mrb[60].mxu0 %v9382_v59  ;;  %v7695_v62 = vld [vmem:[%s11027_s3 + $0x3c8] ss:$16 sps:$4 sm:$0xff]   ;;  %v7698_v49 = vld [vmem:[%s11027_s3 + $0x3e0] ss:$16 sps:$4 sm:$0xff]   ;;  %v7706_v13 = vld [vmem:[%s11027_s3 + $0x404] ss:$16 sps:$4 sm:$0xff]  }
 0x18f   : > { %v9410_v23 = vmax.f32 %v1208_v12, %v1210_v18  ;;  %1864 = vmatmul.mubr.bf16.gmra.mrb[60].mxu1 %v9382_v59  ;;  %2357 = vmatpush1.bf16.msra.mxu0 %v7680_v6  ;;  %v993_v28 = vpop.f32.mrb[36].mxu0  ;;  %v1146_v30 = vpop.f32.mrb[36].mxu1  ;;  %v7701_v12 = vld [vmem:[%s11027_s3 + $0x3e8] ss:$16 sps:$4 sm:$0xff]  }
 0x190   : > { %v1263_v22 = vmax.f32 %v9404_v20, 0.0  ;;  %2430 = vmatpush1.bf16.msra.mxu1 %v7683_v16  ;;  %2364 = vmatprep.mubr.bf16.mxu0 %v9185_v56  ;;  %v994_v32 = vadd.f32 %v993_v28, %v9091_v1  ;;  %v1147_v29 = vadd.f32 %v1146_v30, %v9094_v2  ;;  %v995_v33 = vpop.f32.mrb[37].mxu0  ;;  %v1148_v35 = vpop.f32.mrb[37].mxu1 }
 0x191   : > { %v1264_v36 = vmax.f32 %v9410_v23, 0.0  ;;  %2437 = vmatprep.mubr.bf16.mxu1 %v9185_v56  ;;  %2358 = vmatprep.subr.bf16.mxu0 %v7688_v11  ;;  %v996_v38 = vadd.f32 %v995_v33, %v9097_v3  ;;  %v1149_v39 = vadd.f32 %v1148_v35, %v9100_v4  ;;  %v997_v40 = vpop.f32.mrb[38].mxu0  ;;  %v1150_v43 = vpop.f32.mrb[38].mxu1  ;;  %v7709_v23 = vld [vmem:[%s11027_s3 + $0x40c] ss:$16 sps:$4 sm:$0xff]  }
 0x192   : > { %v9433_v42 = vpack.c.bf16 %v1263_v22, %v1261_v45  ;;  %2431 = vmatprep.subr.bf16.mxu1 %v7691_v21  ;;  %v1211_v46 = vmax.f32 %v994_v32, %v1147_v29  ;;  %v998_v47 = vadd.f32 %v997_v40, %v9091_v1  ;;  %v1151_v50 = vadd.f32 %v1150_v43, %v9094_v2  ;;  %v999_v56 = vpop.f32.mrb[39].mxu0  ;;  %v1152_v51 = vpop.f32.mrb[39].mxu1 }
 0x193   : > { %v9437_v48 = vpack.c.bf16 %v1264_v36, %v1262_v52  ;;  %2359 = vmatpush1.bf16.msra.mxu0 %v7686_v24  ;;  %v1212_v54 = vmax.f32 %v996_v38, %v1149_v39  ;;  %v1000_v57 = vadd.f32 %v999_v56, %v9097_v3  ;;  %v1153_v45 = vadd.f32 %v1152_v51, %v9100_v4  ;;  %v7700_v52 = vld [vmem:[%s11027_s3 + $0x3e4] ss:$16 sps:$4 sm:$0xff]   ;;  %v7715_v51 = vld [vmem:[%s11027_s3 + $0x42c] ss:$16 sps:$4 sm:$0xff]  }
 0x194   : > { %2432 = vmatpush1.bf16.msra.mxu1 %v7689_v26  ;;  %2360 = vmatprep.subr.bf16.mxu0 %v7694_v31  ;;  %v1213_v5 = vmax.f32 %v998_v47, %v1151_v50  ;;  %v7707_v50 = vld [vmem:[%s11027_s3 + $0x408] ss:$16 sps:$4 sm:$0xff]  }
 0x195   : > { %2433 = vmatprep.subr.bf16.mxu1 %v7697_v37  ;;  %v1214_v8 = vmax.f32 %v1000_v57, %v1153_v45  ;;  %v7710_v57 = vld [vmem:[%s11027_s3 + $0x420] ss:$16 sps:$4 sm:$0xff]   ;;  %v7713_v45 = vld [vmem:[%s11027_s3 + $0x428] ss:$16 sps:$4 sm:$0xff]  }
 0x196   : > { %v9453_v9 = vmax.f32 %v1211_v46, %v1213_v5 }
 0x197   : > { %2361 = vmatpush1.bf16.msra.mxu0 %v7692_v53  ;;  %v1242_v14 = vmax.f32 %v1212_v54, %v1214_v8  ;;  %v1003_v15 = vpop.f32.mrb[40].mxu0  ;;  %v1156_v6 = vpop.f32.mrb[40].mxu1  ;;  %v7721_v8 = vld [vmem:[%s11027_s3 + $0x44c] ss:$16 sps:$4 sm:$0xff]  }
 0x198   : > { %2434 = vmatpush1.bf16.msra.mxu1 %v7695_v62  ;;  %2362 = vmatprep.subr.bf16.mxu0 %v7700_v52  ;;  %v1265_v16 = vmax.f32 %v9453_v9, 0.0  ;;  %v1004_v18 = vadd.f32 %v1003_v15, %v9091_v1  ;;  %v1157_v11 = vadd.f32 %v1156_v6, %v9094_v2  ;;  %v1005_v20 = vpop.f32.mrb[41].mxu0  ;;  %v1158_v21 = vpop.f32.mrb[41].mxu1 }
 0x199   : > { %2435 = vmatprep.subr.bf16.mxu1 %v7703_v7  ;;  %v1266_v24 = vmax.f32 %v1242_v14, 0.0  ;;  %v1006_v26 = vadd.f32 %v1005_v20, %v9097_v3  ;;  %v1159_v28 = vadd.f32 %v1158_v21, %v9100_v4  ;;  %v1007_v30 = vpop.f32.mrb[42].mxu0  ;;  %v1160_v31 = vpop.f32.mrb[42].mxu1 }
 0x19a   : > { %v9472_v32 = vpack.c.bf16 %v1265_v16, %v1263_v22  ;;  %v1215_v29 = vmax.f32 %v1004_v18, %v1157_v11  ;;  %v1008_v33 = vadd.f32 %v1007_v30, %v9091_v1  ;;  %v1161_v35 = vadd.f32 %v1160_v31, %v9094_v2  ;;  %v1009_v37 = vpop.f32.mrb[43].mxu0  ;;  %v1162_v38 = vpop.f32.mrb[43].mxu1  ;;  %v7704_v22 = vld [vmem:[%s11027_s3 + $0x400] ss:$16 sps:$4 sm:$0xff]  }
 0x19b   : > { %2363 = vmatpush1.bf16.msra.mxu0 %v7698_v49  ;;  %v9476_v39 = vpack.c.bf16 %v1266_v24, %v1264_v36  ;;  %v1216_v40 = vmax.f32 %v1006_v26, %v1159_v28  ;;  %v1010_v43 = vadd.f32 %v1009_v37, %v9097_v3  ;;  %v1163_v46 = vadd.f32 %v1162_v38, %v9100_v4  ;;  %v7712_v36 = vld [vmem:[%s11027_s3 + $0x424] ss:$16 sps:$4 sm:$0xff]  }
 0x19c   : > { %2436 = vmatpush1.bf16.msra.mxu1 %v7701_v12  ;;  %2903 = vmatprep.subr.bf16.mxu0 %v7706_v13  ;;  %v1217_v47 = vmax.f32 %v1008_v33, %v1161_v35  ;;  %v7716_v13 = vld [vmem:[%s11027_s3 + $0x440] ss:$16 sps:$4 sm:$0xff]  }
 0x19d   : > { %2976 = vmatprep.subr.bf16.mxu1 %v7709_v23  ;;  %v1218_v56 = vmax.f32 %v1010_v43, %v1163_v46  ;;  %v7733_v43 = vld [vmem:[%s11027_s3 + $0x48c] ss:$16 sps:$4 sm:$0xff]  }
 0x19e   : > { %2365 = vmatmul.mubr.bf16.vlgmr.msra.gmra.mrb[48].mxu0 %v9165_v41  ;;  %v9493_v53 = vmax.f32 %v1215_v29, %v1217_v47  ;;  %v7727_v29 = vld [vmem:[%s11027_s3 + $0x46c] ss:$16 sps:$4 sm:$0xff]   ;;  %v7728_v47 = vld [vmem:[%s11027_s3 + $0x480] ss:$16 sps:$4 sm:$0xff]  }
 0x19f   : > { %2438 = vmatmul.mubr.bf16.vlgmr.msra.gmra.mrb[48].mxu1 %v9165_v41  ;;  %2374 = vmatprep.mubr.bf16.mxu0 %v9265_v58  ;;  %v9497_v54 = vmax.f32 %v1216_v40, %v1218_v56  ;;  %v7718_v41 = vld [vmem:[%s11027_s3 + $0x444] ss:$16 sps:$4 sm:$0xff]   ;;  %v1013_v5 = vpop.f32.mrb[44].mxu0  ;;  %v1166_v7 = vpop.f32.mrb[44].mxu1 }
 0x1a0   : > { %2447 = vmatprep.mubr.bf16.mxu1 %v9265_v58  ;;  %2904 = vmatpush1.bf16.msra.mxu0 %v7704_v22  ;;  %v1267_v62 = vmax.f32 %v9493_v53, 0.0  ;;  %v1014_v9 = vadd.f32 %v1013_v5, %v9091_v1  ;;  %v1167_v49 = vadd.f32 %v1166_v7, %v9094_v2  ;;  %v1015_v14 = vpop.f32.mrb[45].mxu0  ;;  %v1168_v15 = vpop.f32.mrb[45].mxu1  ;;  %v7736_v56 = vld [vmem:[%s11027_s3 + $0x4a4] ss:$16 sps:$4 sm:$0xff]  }
 0x1a1   : > { %2977 = vmatpush1.bf16.msra.mxu1 %v7707_v50  ;;  %2905 = vmatprep.subr.bf16.mxu0 %v7712_v36  ;;  %v1268_v52 = vmax.f32 %v9497_v54, 0.0  ;;  %v1016_v11 = vadd.f32 %v1015_v14, %v9097_v3  ;;  %v1169_v20 = vadd.f32 %v1168_v15, %v9100_v4  ;;  %v1017_v21 = vpop.f32.mrb[46].mxu0  ;;  %v1170_v23 = vpop.f32.mrb[46].mxu1  ;;  %v7731_v36 = vld [vmem:[%s11027_s3 + $0x488] ss:$16 sps:$4 sm:$0xff]  }
 0x1a2   : > { %2978 = vmatprep.subr.bf16.mxu1 %v7715_v51  ;;  %v9518_v12 = vpack.c.bf16 %v1267_v62, %v1265_v16  ;;  %v1219_v18 = vmax.f32 %v1014_v9, %v1167_v49  ;;  %v7719_v16 = vld [vmem:[%s11027_s3 + $0x448] ss:$16 sps:$4 sm:$0xff]   ;;  %v1018_v26 = vadd.f32 %v1017_v21, %v9091_v1  ;;  %v1171_v28 = vadd.f32 %v1170_v23, %v9094_v2  ;;  %v1019_v30 = vpop.f32.mrb[47].mxu0  ;;  %v1172_v31 = vpop.f32.mrb[47].mxu1  ;;  %v7722_v2 = vld [vmem:[%s11027_s3 + $0x460] ss:$16 sps:$4 sm:$0xff]  }
 0x1a3   : > { %v9520_v6 = vpack.c.bf16 %v1268_v52, %v1266_v24  ;;  %v7724_v24 = vld [vmem:[%s11027_s3 + $0x464] ss:$16 sps:$4 sm:$0xff]   ;;  %v1220_v33 = vmax.f32 %v1016_v11, %v1169_v20  ;;  %v1020_v35 = vadd.f32 %v1019_v30, %v9097_v3  ;;  %v1173_v37 = vadd.f32 %v1172_v31, %v9100_v4  ;;  %v7725_v3 = vld [vmem:[%s11027_s3 + $0x468] ss:$16 sps:$4 sm:$0xff]   ;;  %v7739_v51 = vld [vmem:[%s11027_s3 + $0x4ac] ss:$16 sps:$4 sm:$0xff]  }
 0x1a4   : > { %2906 = vmatpush1.bf16.msra.mxu0 %v7710_v57  ;;  %v1221_v1 = vmax.f32 %v1018_v26, %v1171_v28  ;;  %v7730_v4 = vld [vmem:[%s11027_s3 + $0x484] ss:$16 sps:$4 sm:$0xff]   ;;  %v7745_v53 = vld [vmem:[%s11027_s3 + $0x4cc] ss:$16 sps:$4 sm:$0xff]   ;;  %v7743_v5 = vld [vmem:[%s11027_s3 + $0x4c8] ss:$16 sps:$4 sm:$0xff]  }
 0x1a5   : > { %2979 = vmatpush1.bf16.msra.mxu1 %v7713_v45  ;;  %2907 = vmatprep.subr.bf16.mxu0 %v7718_v41  ;;  %v1222_v38 = vmax.f32 %v1020_v35, %v1173_v37  ;;  %v7734_v45 = vld [vmem:[%s11027_s3 + $0x4a0] ss:$16 sps:$4 sm:$0xff]   ;;  %v7737_v41 = vld [vmem:[%s11027_s3 + $0x4a8] ss:$16 sps:$4 sm:$0xff]   ;;  %v7748_v7 = vld [vmem:[%s11027_s3 + $0x4e4] ss:$16 sps:$4 sm:$0xff]  }
 0x1a6   : > { %2375 = vmatmul.mubr.bf16.gmra.mrb[52].mxu0 %v9255_v55  ;;  %2980 = vmatprep.subr.bf16.mxu1 %v7721_v8  ;;  %v1245_v40 = vmax.f32 %v1219_v18, %v1221_v1  ;;  %v7751_v8 = vld [vmem:[%s11027_s3 + $0x4ec] ss:$16 sps:$4 sm:$0xff]   ;;  %v7746_v9 = vld [vmem:[%s11027_s3 + $0x4e0] ss:$16 sps:$4 sm:$0xff]   ;;  %v7749_v49 = vld [vmem:[%s11027_s3 + $0x4e8] ss:$16 sps:$4 sm:$0xff]  }
 0x1a7   : > { %2448 = vmatmul.mubr.bf16.gmra.mrb[52].mxu1 %v9255_v55  ;;  %2384 = vmatprep.mubr.bf16.mxu0 %v9347_v25  ;;  %v1246_v46 = vmax.f32 %v1220_v33, %v1222_v38  ;;  %v7754_v14 = vld [vmem:[%s11027_s3 + $0x504] ss:$16 sps:$4 sm:$0xff]   ;;  %v7757_v15 = vld [vmem:[%s11027_s3 + $0x50c] ss:$16 sps:$4 sm:$0xff]   ;;  %v7758_v20 = vld [vmem:[%s11027_s3 + $0x520] ss:$16 sps:$4 sm:$0xff]  }
 0x1a8   : > { %2457 = vmatprep.mubr.bf16.mxu1 %v9347_v25  ;;  %2908 = vmatpush1.bf16.msra.mxu0 %v7716_v13  ;;  %v1269_v22 = vmax.f32 %v1245_v40, 0.0  ;;  %v7755_v13 = vld [vmem:[%s11027_s3 + $0x508] ss:$16 sps:$4 sm:$0xff]   ;;  %v7760_v18 = vld [vmem:[%s11027_s3 + $0x524] ss:$16 sps:$4 sm:$0xff]  }
 0x1a9   : > { %2981 = vmatpush1.bf16.msra.mxu1 %v7719_v16  ;;  %2909 = vmatprep.subr.bf16.mxu0 %v7724_v24  ;;  %v1270_v50 = vmax.f32 %v1246_v46, 0.0  ;;  %v7763_v11 = vld [vmem:[%s11027_s3 + $0x52c] ss:$16 sps:$4 sm:$0xff]   ;;  %v7761_v21 = vld [vmem:[%s11027_s3 + $0x528] ss:$16 sps:$4 sm:$0xff]  }
 0x1aa   : > { %2982 = vmatprep.subr.bf16.mxu1 %v7727_v29  ;;  %v9575_v57 = vpack.c.bf16 %v1269_v22, %v1267_v62  ;;  %v7740_v62 = vld [vmem:[%s11027_s3 + $0x4c0] ss:$16 sps:$4 sm:$0xff]   ;;  %v7766_v23 = vld [vmem:[%s11027_s3 + $0x544] ss:$16 sps:$4 sm:$0xff]   ;;  %v7769_v16 = vld [vmem:[%s11027_s3 + $0x54c] ss:$16 sps:$4 sm:$0xff]  }
 0x1ab   : > { %v9571_v54 = vpack.c.bf16 %v1270_v50, %v1268_v52  ;;  %v7742_v52 = vld [vmem:[%s11027_s3 + $0x4c4] ss:$16 sps:$4 sm:$0xff]   ;;  %v7764_v24 = vld [vmem:[%s11027_s3 + $0x540] ss:$16 sps:$4 sm:$0xff]   ;;  %v7767_v26 = vld [vmem:[%s11027_s3 + $0x548] ss:$16 sps:$4 sm:$0xff]  }
 0x1ac   : > { %2910 = vmatpush1.bf16.msra.mxu0 %v7722_v2  ;;  %v7772_v28 = vld [vmem:[%s11027_s3 + $0x564] ss:$16 sps:$4 sm:$0xff]   ;;  %v7775_v30 = vld [vmem:[%s11027_s3 + $0x56c] ss:$16 sps:$4 sm:$0xff]   ;;  %v7770_v31 = vld [vmem:[%s11027_s3 + $0x560] ss:$16 sps:$4 sm:$0xff]  }
 0x1ad   : > { %2983 = vmatpush1.bf16.msra.mxu1 %v7725_v3  ;;  %2911 = vmatprep.subr.bf16.mxu0 %v7730_v4  ;;  %v7773_v29 = vld [vmem:[%s11027_s3 + $0x568] ss:$16 sps:$4 sm:$0xff]   ;;  %v7778_v33 = vld [vmem:[%s11027_s3 + $0x584] ss:$16 sps:$4 sm:$0xff]   ;;  %v7781_v35 = vld [vmem:[%s11027_s3 + $0x58c] ss:$16 sps:$4 sm:$0xff]  }
 0x1ae   : > { %2385 = vmatmul.mubr.bf16.gmra.mrb[56].mxu0 %v9343_v17  ;;  %2984 = vmatprep.subr.bf16.mxu1 %v7733_v43  ;;  %v7776_v37 = vld [vmem:[%s11027_s3 + $0x580] ss:$16 sps:$4 sm:$0xff]   ;;  %v7779_v1 = vld [vmem:[%s11027_s3 + $0x588] ss:$16 sps:$4 sm:$0xff]   ;;  %v7784_v2 = vld [vmem:[%s11027_s3 + $0x5a4] ss:$16 sps:$4 sm:$0xff]  }
 0x1af   : > { %2458 = vmatmul.mubr.bf16.gmra.mrb[56].mxu1 %v9343_v17  ;;  %2394 = vmatprep.mubr.bf16.mxu0 %v9437_v48  ;;  %v7787_v38 = vld [vmem:[%s11027_s3 + $0x5ac] ss:$16 sps:$4 sm:$0xff]   ;;  %v7782_v3 = vld [vmem:[%s11027_s3 + $0x5a0] ss:$16 sps:$4 sm:$0xff]   ;;  %v7785_v4 = vld [vmem:[%s11027_s3 + $0x5a8] ss:$16 sps:$4 sm:$0xff]  }
 0x1b0   : > { %2467 = vmatprep.mubr.bf16.mxu1 %v9437_v48  ;;  %2912 = vmatpush1.bf16.msra.mxu0 %v7728_v47  ;;  %v7790_v40 = vld [vmem:[%s11027_s3 + $0x5c4] ss:$16 sps:$4 sm:$0xff]   ;;  %v7793_v43 = vld [vmem:[%s11027_s3 + $0x5cc] ss:$16 sps:$4 sm:$0xff]   ;;  %v7788_v46 = vld [vmem:[%s11027_s3 + $0x5c0] ss:$16 sps:$4 sm:$0xff]  }
 0x1b1   : > { %2985 = vmatpush1.bf16.msra.mxu1 %v7731_v36  ;;  %2913 = vmatprep.subr.bf16.mxu0 %v7736_v56  ;;  %v7791_v22 = vld [vmem:[%s11027_s3 + $0x5c8] ss:$16 sps:$4 sm:$0xff]   ;;  %v7796_v47 = vld [vmem:[%s11027_s3 + $0x5e4] ss:$16 sps:$4 sm:$0xff]   ;;  %v7799_v50 = vld [vmem:[%s11027_s3 + $0x5ec] ss:$16 sps:$4 sm:$0xff]  }
 0x1b2   : > { %2986 = vmatprep.subr.bf16.mxu1 %v7739_v51  ;;  %v7794_v36 = vld [vmem:[%s11027_s3 + $0x5e0] ss:$16 sps:$4 sm:$0xff]   ;;  %v7797_v56 = vld [vmem:[%s11027_s3 + $0x5e8] ss:$16 sps:$4 sm:$0xff]   ;;  %v7802_v51 = vld [vmem:[%s11027_s3 + $0x604] ss:$16 sps:$4 sm:$0xff]  }
 0x1b4   : > { %2914 = vmatpush1.bf16.msra.mxu0 %v7734_v45  ;;  %v7805_v45 = vld [vmem:[%s11027_s3 + $0x60c] ss:$16 sps:$4 sm:$0xff]  }
 0x1b5   : > { %2987 = vmatpush1.bf16.msra.mxu1 %v7737_v41  ;;  %2915 = vmatprep.subr.bf16.mxu0 %v7742_v52  ;;  %v7800_v41 = vld [vmem:[%s11027_s3 + $0x600] ss:$16 sps:$4 sm:$0xff]   ;;  %v7803_v52 = vld [vmem:[%s11027_s3 + $0x608] ss:$16 sps:$4 sm:$0xff]  }
 0x1b6   : > { %2395 = vmatmul.mubr.bf16.gmra.mrb[60].mxu0 %v9433_v42  ;;  %2988 = vmatprep.subr.bf16.mxu1 %v7745_v53  ;;  %v7808_v53 = vld [vmem:[%s11027_s3 + $0x624] ss:$16 sps:$4 sm:$0xff]  }
 0x1b7   : > { %2468 = vmatmul.mubr.bf16.gmra.mrb[60].mxu1 %v9433_v42  ;;  %2935 = vmatprep.mubr.bf16.mxu0 %v9219_v27 }
 0x1b8   : > { %2916 = vmatpush1.bf16.msra.mxu0 %v7740_v62  ;;  %3008 = vmatprep.mubr.bf16.mxu1 %v9219_v27  ;;  %v7752_v27 = vld [vmem:[%s11027_s3 + $0x500] ss:$16 sps:$4 sm:$0xff]   ;;  %v7811_v62 = vld [vmem:[%s11027_s3 + $0x62c] ss:$16 sps:$4 sm:$0xff]  }
 0x1b9   : > { %2989 = vmatpush1.bf16.msra.mxu1 %v7743_v5  ;;  %2917 = vmatprep.subr.bf16.mxu0 %v7748_v7  ;;  %v7806_v5 = vld [vmem:[%s11027_s3 + $0x620] ss:$16 sps:$4 sm:$0xff]   ;;  %v7809_v7 = vld [vmem:[%s11027_s3 + $0x628] ss:$16 sps:$4 sm:$0xff]  }
 0x1ba   : > { %2990 = vmatprep.subr.bf16.mxu1 %v7751_v8  ;;  %v7814_v8 = vld [vmem:[%s11027_s3 + $0x644] ss:$16 sps:$4 sm:$0xff]  }
 0x1bc   : > { %2918 = vmatpush1.bf16.msra.mxu0 %v7746_v9  ;;  %v7812_v9 = vld [vmem:[%s11027_s3 + $0x640] ss:$16 sps:$4 sm:$0xff]  }
 0x1bd   : > { %2991 = vmatpush1.bf16.msra.mxu1 %v7749_v49  ;;  %2919 = vmatprep.subr.bf16.mxu0 %v7754_v14  ;;  %v7815_v49 = vld [vmem:[%s11027_s3 + $0x648] ss:$16 sps:$4 sm:$0xff]   ;;  %v7820_v14 = vld [vmem:[%s11027_s3 + $0x664] ss:$16 sps:$4 sm:$0xff]  }
 0x1be   : > { %2992 = vmatprep.subr.bf16.mxu1 %v7757_v15  ;;  %v7823_v15 = vld [vmem:[%s11027_s3 + $0x66c] ss:$16 sps:$4 sm:$0xff]  }
 0x1c0   : > { %2920 = vmatpush1.bf16.msra.mxu0 %v7752_v27  ;;  %v7818_v27 = vld [vmem:[%s11027_s3 + $0x660] ss:$16 sps:$4 sm:$0xff]  }
 0x1c1   : > { %2993 = vmatpush1.bf16.msra.mxu1 %v7755_v13  ;;  %2921 = vmatprep.subr.bf16.mxu0 %v7760_v18  ;;  %v7821_v13 = vld [vmem:[%s11027_s3 + $0x668] ss:$16 sps:$4 sm:$0xff]   ;;  %v7826_v18 = vld [vmem:[%s11027_s3 + $0x684] ss:$16 sps:$4 sm:$0xff]  }
 0x1c2   : > { %2994 = vmatprep.subr.bf16.mxu1 %v7763_v11  ;;  %v7829_v11 = vld [vmem:[%s11027_s3 + $0x68c] ss:$16 sps:$4 sm:$0xff]  }
 0x1c4   : > { %2922 = vmatpush1.bf16.msra.mxu0 %v7758_v20  ;;  %v7824_v20 = vld [vmem:[%s11027_s3 + $0x680] ss:$16 sps:$4 sm:$0xff]  }
 0x1c5   : > { %2995 = vmatpush1.bf16.msra.mxu1 %v7761_v21  ;;  %2923 = vmatprep.subr.bf16.mxu0 %v7766_v23  ;;  %v7827_v21 = vld [vmem:[%s11027_s3 + $0x688] ss:$16 sps:$4 sm:$0xff]   ;;  %v7832_v23 = vld [vmem:[%s11027_s3 + $0x6a4] ss:$16 sps:$4 sm:$0xff]  }
 0x1c6   : > { %2996 = vmatprep.subr.bf16.mxu1 %v7769_v16  ;;  %v7835_v16 = vld [vmem:[%s11027_s3 + $0x6ac] ss:$16 sps:$4 sm:$0xff]  }
 0x1c8   : > { %2924 = vmatpush1.bf16.msra.mxu0 %v7764_v24  ;;  %v7830_v24 = vld [vmem:[%s11027_s3 + $0x6a0] ss:$16 sps:$4 sm:$0xff]  }
 0x1c9   : > { %2997 = vmatpush1.bf16.msra.mxu1 %v7767_v26  ;;  %2925 = vmatprep.subr.bf16.mxu0 %v7772_v28  ;;  %v7833_v26 = vld [vmem:[%s11027_s3 + $0x6a8] ss:$16 sps:$4 sm:$0xff]   ;;  %v7838_v28 = vld [vmem:[%s11027_s3 + $0x6c4] ss:$16 sps:$4 sm:$0xff]  }
 0x1ca   : > { %2998 = vmatprep.subr.bf16.mxu1 %v7775_v30  ;;  %v7841_v30 = vld [vmem:[%s11027_s3 + $0x6cc] ss:$16 sps:$4 sm:$0xff]  }
 0x1cc   : > { %2926 = vmatpush1.bf16.msra.mxu0 %v7770_v31  ;;  %v7836_v31 = vld [vmem:[%s11027_s3 + $0x6c0] ss:$16 sps:$4 sm:$0xff]  }
 0x1cd   : > { %2999 = vmatpush1.bf16.msra.mxu1 %v7773_v29  ;;  %2927 = vmatprep.subr.bf16.mxu0 %v7778_v33  ;;  %v7839_v29 = vld [vmem:[%s11027_s3 + $0x6c8] ss:$16 sps:$4 sm:$0xff]   ;;  %v7844_v33 = vld [vmem:[%s11027_s3 + $0x6e4] ss:$16 sps:$4 sm:$0xff]  }
 0x1ce   : > { %3000 = vmatprep.subr.bf16.mxu1 %v7781_v35  ;;  %v7847_v35 = vld [vmem:[%s11027_s3 + $0x6ec] ss:$16 sps:$4 sm:$0xff]  }
 0x1d0   : > { %2928 = vmatpush1.bf16.msra.mxu0 %v7776_v37  ;;  %v7842_v37 = vld [vmem:[%s11027_s3 + $0x6e0] ss:$16 sps:$4 sm:$0xff]  }
 0x1d1   : > { %3001 = vmatpush1.bf16.msra.mxu1 %v7779_v1  ;;  %2929 = vmatprep.subr.bf16.mxu0 %v7784_v2  ;;  %v7845_v1 = vld [vmem:[%s11027_s3 + $0x6e8] ss:$16 sps:$4 sm:$0xff]   ;;  %v7850_v2 = vld [vmem:[%s11027_s3 + $0x704] ss:$16 sps:$4 sm:$0xff]  }
 0x1d2   : > { %3002 = vmatprep.subr.bf16.mxu1 %v7787_v38  ;;  %v7853_v38 = vld [vmem:[%s11027_s3 + $0x70c] ss:$16 sps:$4 sm:$0xff]  }
 0x1d4   : > { %2930 = vmatpush1.bf16.msra.mxu0 %v7782_v3  ;;  %v7851_v3 = vld [vmem:[%s11027_s3 + $0x708] ss:$16 sps:$4 sm:$0xff]  }
 0x1d5   : > { %3003 = vmatpush1.bf16.msra.mxu1 %v7785_v4  ;;  %2931 = vmatprep.subr.bf16.mxu0 %v7790_v40  ;;  %v7856_v4 = vld [vmem:[%s11027_s3 + $0x724] ss:$16 sps:$4 sm:$0xff]   ;;  %v7859_v40 = vld [vmem:[%s11027_s3 + $0x72c] ss:$16 sps:$4 sm:$0xff]  }
 0x1d6   : > { %3004 = vmatprep.subr.bf16.mxu1 %v7793_v43  ;;  %v7854_v43 = vld [vmem:[%s11027_s3 + $0x720] ss:$16 sps:$4 sm:$0xff]  }
 0x1d8   : > { %2932 = vmatpush1.bf16.msra.mxu0 %v7788_v46  ;;  %v7857_v46 = vld [vmem:[%s11027_s3 + $0x728] ss:$16 sps:$4 sm:$0xff]  }
 0x1d9   : > { %3005 = vmatpush1.bf16.msra.mxu1 %v7791_v22  ;;  %2933 = vmatprep.subr.bf16.mxu0 %v7796_v47  ;;  %v7862_v22 = vld [vmem:[%s11027_s3 + $0x744] ss:$16 sps:$4 sm:$0xff]   ;;  %v7865_v47 = vld [vmem:[%s11027_s3 + $0x74c] ss:$16 sps:$4 sm:$0xff]  }
 0x1da   : > { %3006 = vmatprep.subr.bf16.mxu1 %v7799_v50  ;;  %v7860_v50 = vld [vmem:[%s11027_s3 + $0x740] ss:$16 sps:$4 sm:$0xff]  }
 0x1dc   : > { %2934 = vmatpush1.bf16.msra.mxu0 %v7794_v36  ;;  %v7863_v36 = vld [vmem:[%s11027_s3 + $0x748] ss:$16 sps:$4 sm:$0xff]  }
 0x1dd   : > { %3007 = vmatpush1.bf16.msra.mxu1 %v7797_v56  ;;  %3474 = vmatprep.subr.bf16.mxu0 %v7802_v51  ;;  %v7868_v56 = vld [vmem:[%s11027_s3 + $0x764] ss:$16 sps:$4 sm:$0xff]   ;;  %v7871_v51 = vld [vmem:[%s11027_s3 + $0x76c] ss:$16 sps:$4 sm:$0xff]  }
 0x1de   : > { %3547 = vmatprep.subr.bf16.mxu1 %v7805_v45  ;;  %v7866_v45 = vld [vmem:[%s11027_s3 + $0x760] ss:$16 sps:$4 sm:$0xff]  }
 0x1df   : > { %2936 = vmatmul.mubr.bf16.vlgmr.msra.gmra.mrb[48].mxu0 %v9209_v19 }
 0x1e0   : > { %3009 = vmatmul.mubr.bf16.vlgmr.msra.gmra.mrb[48].mxu1 %v9209_v19  ;;  %2945 = vmatprep.mubr.bf16.mxu0 %v9304_v44  ;;  %v7817_v19 = vld [vmem:[%s11027_s3 + $0x64c] ss:$16 sps:$4 sm:$0xff]  }
 0x1e1   : > { %3018 = vmatprep.mubr.bf16.mxu1 %v9304_v44  ;;  %3475 = vmatpush1.bf16.msra.mxu0 %v7800_v41  ;;  %v7869_v41 = vld [vmem:[%s11027_s3 + $0x768] ss:$16 sps:$4 sm:$0xff]  }
 0x1e2   : > { %3548 = vmatpush1.bf16.msra.mxu1 %v7803_v52  ;;  %3476 = vmatprep.subr.bf16.mxu0 %v7808_v53  ;;  %v7874_v52 = vld [vmem:[%s11027_s3 + $0x784] ss:$16 sps:$4 sm:$0xff]   ;;  %v7877_v53 = vld [vmem:[%s11027_s3 + $0x78c] ss:$16 sps:$4 sm:$0xff]  }
 0x1e3   : > { %3549 = vmatprep.subr.bf16.mxu1 %v7811_v62  ;;  %v7872_v62 = vld [vmem:[%s11027_s3 + $0x780] ss:$16 sps:$4 sm:$0xff]  }
 0x1e5   : > { %3477 = vmatpush1.bf16.msra.mxu0 %v7806_v5  ;;  %v7875_v5 = vld [vmem:[%s11027_s3 + $0x788] ss:$16 sps:$4 sm:$0xff]  }
 0x1e6   : > { %3550 = vmatpush1.bf16.msra.mxu1 %v7809_v7  ;;  %3478 = vmatprep.subr.bf16.mxu0 %v7814_v8  ;;  %v7880_v7 = vld [vmem:[%s11027_s3 + $0x7a4] ss:$16 sps:$4 sm:$0xff]   ;;  %v7883_v8 = vld [vmem:[%s11027_s3 + $0x7ac] ss:$16 sps:$4 sm:$0xff]  }
 0x1e7   : > { %2946 = vmatmul.mubr.bf16.gmra.mrb[52].mxu0 %v9294_v34  ;;  %3551 = vmatprep.subr.bf16.mxu1 %v7817_v19  ;;  %v7878_v19 = vld [vmem:[%s11027_s3 + $0x7a0] ss:$16 sps:$4 sm:$0xff]  }
 0x1e8   : > { %3019 = vmatmul.mubr.bf16.gmra.mrb[52].mxu1 %v9294_v34  ;;  %2955 = vmatprep.mubr.bf16.mxu0 %v9389_v10 }
 0x1e9   : > { %3028 = vmatprep.mubr.bf16.mxu1 %v9389_v10  ;;  %3479 = vmatpush1.bf16.msra.mxu0 %v7812_v9  ;;  %v7881_v9 = vld [vmem:[%s11027_s3 + $0x7a8] ss:$16 sps:$4 sm:$0xff]  }
 0x1ea   : > { %3552 = vmatpush1.bf16.msra.mxu1 %v7815_v49  ;;  %3480 = vmatprep.subr.bf16.mxu0 %v7820_v14  ;;  %v7886_v49 = vld [vmem:[%s11027_s3 + $0x7c4] ss:$16 sps:$4 sm:$0xff]   ;;  %v7889_v14 = vld [vmem:[%s11027_s3 + $0x7cc] ss:$16 sps:$4 sm:$0xff]  }
 0x1eb   : > { %3553 = vmatprep.subr.bf16.mxu1 %v7823_v15  ;;  %v7884_v15 = vld [vmem:[%s11027_s3 + $0x7c0] ss:$16 sps:$4 sm:$0xff]  }
 0x1ed   : > { %3481 = vmatpush1.bf16.msra.mxu0 %v7818_v27  ;;  %v7887_v27 = vld [vmem:[%s11027_s3 + $0x7c8] ss:$16 sps:$4 sm:$0xff]  }
 0x1ee   : > { %3554 = vmatpush1.bf16.msra.mxu1 %v7821_v13  ;;  %3482 = vmatprep.subr.bf16.mxu0 %v7826_v18  ;;  %v7892_v13 = vld [vmem:[%s11027_s3 + $0x7e4] ss:$16 sps:$4 sm:$0xff]   ;;  %v7895_v18 = vld [vmem:[%s11027_s3 + $0x7ec] ss:$16 sps:$4 sm:$0xff]  }
 0x1ef   : > { %2956 = vmatmul.mubr.bf16.gmra.mrb[56].mxu0 %v9382_v59  ;;  %3555 = vmatprep.subr.bf16.mxu1 %v7829_v11  ;;  %v7890_v11 = vld [vmem:[%s11027_s3 + $0x7e0] ss:$16 sps:$4 sm:$0xff]  }
 0x1f0   : > { %3029 = vmatmul.mubr.bf16.gmra.mrb[56].mxu1 %v9382_v59  ;;  %2965 = vmatprep.mubr.bf16.mxu0 %v9476_v39 }
 0x1f1   : > { %3038 = vmatprep.mubr.bf16.mxu1 %v9476_v39  ;;  %3483 = vmatpush1.bf16.msra.mxu0 %v7824_v20  ;;  %v7893_v20 = vld [vmem:[%s11027_s3 + $0x7e8] ss:$16 sps:$4 sm:$0xff]  }
 0x1f2   : > { %3556 = vmatpush1.bf16.msra.mxu1 %v7827_v21  ;;  %3484 = vmatprep.subr.bf16.mxu0 %v7832_v23  ;;  %v7898_v21 = vld [vmem:[%s11027_s3 + $0x804] ss:$16 sps:$4 sm:$0xff]   ;;  %v7901_v23 = vld [vmem:[%s11027_s3 + $0x80c] ss:$16 sps:$4 sm:$0xff]  }
 0x1f3   : > { %3557 = vmatprep.subr.bf16.mxu1 %v7835_v16  ;;  %v7896_v16 = vld [vmem:[%s11027_s3 + $0x800] ss:$16 sps:$4 sm:$0xff]  }
 0x1f5   : > { %3485 = vmatpush1.bf16.msra.mxu0 %v7830_v24  ;;  %v7899_v24 = vld [vmem:[%s11027_s3 + $0x808] ss:$16 sps:$4 sm:$0xff]  }
 0x1f6   : > { %3558 = vmatpush1.bf16.msra.mxu1 %v7833_v26  ;;  %3486 = vmatprep.subr.bf16.mxu0 %v7838_v28  ;;  %v7904_v26 = vld [vmem:[%s11027_s3 + $0x824] ss:$16 sps:$4 sm:$0xff]   ;;  %v7907_v28 = vld [vmem:[%s11027_s3 + $0x82c] ss:$16 sps:$4 sm:$0xff]  }
 0x1f7   : > { %2966 = vmatmul.mubr.bf16.gmra.mrb[60].mxu0 %v9472_v32  ;;  %3559 = vmatprep.subr.bf16.mxu1 %v7841_v30  ;;  %v7902_v30 = vld [vmem:[%s11027_s3 + $0x820] ss:$16 sps:$4 sm:$0xff]  }
 0x1f8   : > { %3039 = vmatmul.mubr.bf16.gmra.mrb[60].mxu1 %v9472_v32  ;;  %3506 = vmatprep.mubr.bf16.mxu0 %v9265_v58 }
 0x1f9   : > { %3487 = vmatpush1.bf16.msra.mxu0 %v7836_v31  ;;  %3579 = vmatprep.mubr.bf16.mxu1 %v9265_v58  ;;  %v7848_v58 = vld [vmem:[%s11027_s3 + $0x700] ss:$16 sps:$4 sm:$0xff]   ;;  %v7905_v31 = vld [vmem:[%s11027_s3 + $0x828] ss:$16 sps:$4 sm:$0xff]  }
 0x1fa   : > { %3560 = vmatpush1.bf16.msra.mxu1 %v7839_v29  ;;  %3488 = vmatprep.subr.bf16.mxu0 %v7844_v33  ;;  %v7910_v29 = vld [vmem:[%s11027_s3 + $0x844] ss:$16 sps:$4 sm:$0xff]   ;;  %v7911_v33 = vld [vmem:[%s11027_s3 + $0x848] ss:$16 sps:$4 sm:$0xff]  }
 0x1fb   : > { %3561 = vmatprep.subr.bf16.mxu1 %v7847_v35  ;;  %v7916_v35 = vld [vmem:[%s11027_s3 + $0x864] ss:$16 sps:$4 sm:$0xff]  }
 0x1fd   : > { %3489 = vmatpush1.bf16.msra.mxu0 %v7842_v37  ;;  %v7919_v37 = vld [vmem:[%s11027_s3 + $0x86c] ss:$16 sps:$4 sm:$0xff]  }
 0x1fe   : > { %3562 = vmatpush1.bf16.msra.mxu1 %v7845_v1  ;;  %3490 = vmatprep.subr.bf16.mxu0 %v7850_v2  ;;  %v7914_v1 = vld [vmem:[%s11027_s3 + $0x860] ss:$16 sps:$4 sm:$0xff]   ;;  %v7917_v2 = vld [vmem:[%s11027_s3 + $0x868] ss:$16 sps:$4 sm:$0xff]  }
 0x1ff   : > { %3563 = vmatprep.subr.bf16.mxu1 %v7853_v38  ;;  %v7922_v38 = vld [vmem:[%s11027_s3 + $0x884] ss:$16 sps:$4 sm:$0xff]  }
 0x201   : > { %3491 = vmatpush1.bf16.msra.mxu0 %v7848_v58  ;;  %v7923_v58 = vld [vmem:[%s11027_s3 + $0x888] ss:$16 sps:$4 sm:$0xff]  }
 0x202   : > { %3564 = vmatpush1.bf16.msra.mxu1 %v7851_v3  ;;  %3492 = vmatprep.subr.bf16.mxu0 %v7856_v4  ;;  %v7928_v3 = vld [vmem:[%s11027_s3 + $0x8a4] ss:$16 sps:$4 sm:$0xff]   ;;  %v7931_v4 = vld [vmem:[%s11027_s3 + $0x8ac] ss:$16 sps:$4 sm:$0xff]  }
 0x203   : > { %3565 = vmatprep.subr.bf16.mxu1 %v7859_v40  ;;  %v7926_v40 = vld [vmem:[%s11027_s3 + $0x8a0] ss:$16 sps:$4 sm:$0xff]  }
 0x205   : > { %3493 = vmatpush1.bf16.msra.mxu0 %v7854_v43  ;;  %v7929_v43 = vld [vmem:[%s11027_s3 + $0x8a8] ss:$16 sps:$4 sm:$0xff]  }
 0x206   : > { %3566 = vmatpush1.bf16.msra.mxu1 %v7857_v46  ;;  %3494 = vmatprep.subr.bf16.mxu0 %v7862_v22  ;;  %v7934_v46 = vld [vmem:[%s11027_s3 + $0x8c4] ss:$16 sps:$4 sm:$0xff]   ;;  %v7935_v22 = vld [vmem:[%s11027_s3 + $0x8c8] ss:$16 sps:$4 sm:$0xff]  }
 0x207   : > { %3567 = vmatprep.subr.bf16.mxu1 %v7865_v47  ;;  %v7940_v47 = vld [vmem:[%s11027_s3 + $0x8e4] ss:$16 sps:$4 sm:$0xff]  }
 0x209   : > { %3495 = vmatpush1.bf16.msra.mxu0 %v7860_v50  ;;  %v7943_v50 = vld [vmem:[%s11027_s3 + $0x8ec] ss:$16 sps:$4 sm:$0xff]  }
 0x20a   : > { %3568 = vmatpush1.bf16.msra.mxu1 %v7863_v36  ;;  %3496 = vmatprep.subr.bf16.mxu0 %v7868_v56  ;;  %v7938_v36 = vld [vmem:[%s11027_s3 + $0x8e0] ss:$16 sps:$4 sm:$0xff]   ;;  %v7941_v56 = vld [vmem:[%s11027_s3 + $0x8e8] ss:$16 sps:$4 sm:$0xff]  }
 0x20b   : > { %3569 = vmatprep.subr.bf16.mxu1 %v7871_v51  ;;  %v7946_v51 = vld [vmem:[%s11027_s3 + $0x904] ss:$16 sps:$4 sm:$0xff]  }
 0x20d   : > { %3497 = vmatpush1.bf16.msra.mxu0 %v7866_v45  ;;  %v7947_v45 = vld [vmem:[%s11027_s3 + $0x908] ss:$16 sps:$4 sm:$0xff]  }
 0x20e   : > { %3570 = vmatpush1.bf16.msra.mxu1 %v7869_v41  ;;  %3498 = vmatprep.subr.bf16.mxu0 %v7874_v52  ;;  %v7952_v41 = vld [vmem:[%s11027_s3 + $0x924] ss:$16 sps:$4 sm:$0xff]   ;;  %v7955_v52 = vld [vmem:[%s11027_s3 + $0x92c] ss:$16 sps:$4 sm:$0xff]  }
 0x20f   : > { %3571 = vmatprep.subr.bf16.mxu1 %v7877_v53  ;;  %v7950_v53 = vld [vmem:[%s11027_s3 + $0x920] ss:$16 sps:$4 sm:$0xff]  }
 0x211   : > { %3499 = vmatpush1.bf16.msra.mxu0 %v7872_v62  ;;  %v7953_v62 = vld [vmem:[%s11027_s3 + $0x928] ss:$16 sps:$4 sm:$0xff]  }
 0x212   : > { %3572 = vmatpush1.bf16.msra.mxu1 %v7875_v5  ;;  %3500 = vmatprep.subr.bf16.mxu0 %v7880_v7  ;;  %v7958_v5 = vld [vmem:[%s11027_s3 + $0x944] ss:$16 sps:$4 sm:$0xff]   ;;  %v7961_v7 = vld [vmem:[%s11027_s3 + $0x94c] ss:$16 sps:$4 sm:$0xff]  }
 0x213   : > { %3573 = vmatprep.subr.bf16.mxu1 %v7883_v8  ;;  %v7956_v8 = vld [vmem:[%s11027_s3 + $0x940] ss:$16 sps:$4 sm:$0xff]  }
 0x215   : > { %3501 = vmatpush1.bf16.msra.mxu0 %v7878_v19  ;;  %v7959_v19 = vld [vmem:[%s11027_s3 + $0x948] ss:$16 sps:$4 sm:$0xff]  }
 0x216   : > { %3574 = vmatpush1.bf16.msra.mxu1 %v7881_v9  ;;  %3502 = vmatprep.subr.bf16.mxu0 %v7886_v49  ;;  %v7964_v9 = vld [vmem:[%s11027_s3 + $0x964] ss:$16 sps:$4 sm:$0xff]   ;;  %v7967_v49 = vld [vmem:[%s11027_s3 + $0x96c] ss:$16 sps:$4 sm:$0xff]  }
 0x217   : > { %3575 = vmatprep.subr.bf16.mxu1 %v7889_v14  ;;  %v7962_v14 = vld [vmem:[%s11027_s3 + $0x960] ss:$16 sps:$4 sm:$0xff]  }
 0x219   : > { %3503 = vmatpush1.bf16.msra.mxu0 %v7884_v15  ;;  %v7965_v15 = vld [vmem:[%s11027_s3 + $0x968] ss:$16 sps:$4 sm:$0xff]  }
 0x21a   : > { %3576 = vmatpush1.bf16.msra.mxu1 %v7887_v27  ;;  %3504 = vmatprep.subr.bf16.mxu0 %v7892_v13  ;;  %v7970_v27 = vld [vmem:[%s11027_s3 + $0x984] ss:$16 sps:$4 sm:$0xff]   ;;  %v7973_v13 = vld [vmem:[%s11027_s3 + $0x98c] ss:$16 sps:$4 sm:$0xff]  }
 0x21b   : > { %3577 = vmatprep.subr.bf16.mxu1 %v7895_v18  ;;  %v7968_v18 = vld [vmem:[%s11027_s3 + $0x980] ss:$16 sps:$4 sm:$0xff]  }
 0x21d   : > { %3505 = vmatpush1.bf16.msra.mxu0 %v7890_v11  ;;  %v7971_v11 = vld [vmem:[%s11027_s3 + $0x988] ss:$16 sps:$4 sm:$0xff]  }
 0x21e   : > { %3578 = vmatpush1.bf16.msra.mxu1 %v7893_v20  ;;  %4045 = vmatprep.subr.bf16.mxu0 %v7898_v21  ;;  %v7976_v20 = vld [vmem:[%s11027_s3 + $0x9a4] ss:$16 sps:$4 sm:$0xff]   ;;  %v7979_v21 = vld [vmem:[%s11027_s3 + $0x9ac] ss:$16 sps:$4 sm:$0xff]  }
 0x21f   : > { %4118 = vmatprep.subr.bf16.mxu1 %v7901_v23  ;;  %v7974_v23 = vld [vmem:[%s11027_s3 + $0x9a0] ss:$16 sps:$4 sm:$0xff]  }
 0x220   : > { %3507 = vmatmul.mubr.bf16.vlgmr.msra.gmra.mrb[48].mxu0 %v9255_v55 }
 0x221   : > { %3580 = vmatmul.mubr.bf16.vlgmr.msra.gmra.mrb[48].mxu1 %v9255_v55  ;;  %3516 = vmatprep.mubr.bf16.mxu0 %v9347_v25  ;;  %v7913_v55 = vld [vmem:[%s11027_s3 + $0x84c] ss:$16 sps:$4 sm:$0xff]  }
 0x222   : > { %3589 = vmatprep.mubr.bf16.mxu1 %v9347_v25  ;;  %4046 = vmatpush1.bf16.msra.mxu0 %v7896_v16  ;;  %v7908_v25 = vld [vmem:[%s11027_s3 + $0x840] ss:$16 sps:$4 sm:$0xff]   ;;  %v7977_v16 = vld [vmem:[%s11027_s3 + $0x9a8] ss:$16 sps:$4 sm:$0xff]  }
 0x223   : > { %4119 = vmatpush1.bf16.msra.mxu1 %v7899_v24  ;;  %4047 = vmatprep.subr.bf16.mxu0 %v7904_v26  ;;  %v7982_v24 = vld [vmem:[%s11027_s3 + $0x9c4] ss:$16 sps:$4 sm:$0xff]   ;;  %v7985_v26 = vld [vmem:[%s11027_s3 + $0x9cc] ss:$16 sps:$4 sm:$0xff]  }
 0x224   : > { %4120 = vmatprep.subr.bf16.mxu1 %v7907_v28  ;;  %v7980_v28 = vld [vmem:[%s11027_s3 + $0x9c0] ss:$16 sps:$4 sm:$0xff]  }
 0x226   : > { %4048 = vmatpush1.bf16.msra.mxu0 %v7902_v30  ;;  %v7983_v30 = vld [vmem:[%s11027_s3 + $0x9c8] ss:$16 sps:$4 sm:$0xff]  }
 0x227   : > { %4121 = vmatpush1.bf16.msra.mxu1 %v7905_v31  ;;  %4049 = vmatprep.subr.bf16.mxu0 %v7910_v29  ;;  %v7988_v31 = vld [vmem:[%s11027_s3 + $0x9e4] ss:$16 sps:$4 sm:$0xff]   ;;  %v7991_v29 = vld [vmem:[%s11027_s3 + $0x9ec] ss:$16 sps:$4 sm:$0xff]  }
 0x228   : > { %3517 = vmatmul.mubr.bf16.gmra.mrb[52].mxu0 %v9343_v17  ;;  %4122 = vmatprep.subr.bf16.mxu1 %v7913_v55  ;;  %v7986_v55 = vld [vmem:[%s11027_s3 + $0x9e0] ss:$16 sps:$4 sm:$0xff]  }
 0x229   : > { %3590 = vmatmul.mubr.bf16.gmra.mrb[52].mxu1 %v9343_v17  ;;  %3526 = vmatprep.mubr.bf16.mxu0 %v9437_v48  ;;  %v7925_v17 = vld [vmem:[%s11027_s3 + $0x88c] ss:$16 sps:$4 sm:$0xff]  }
 0x22a   : > { %3599 = vmatprep.mubr.bf16.mxu1 %v9437_v48  ;;  %4050 = vmatpush1.bf16.msra.mxu0 %v7908_v25  ;;  %v7920_v48 = vld [vmem:[%s11027_s3 + $0x880] ss:$16 sps:$4 sm:$0xff]   ;;  %v7989_v25 = vld [vmem:[%s11027_s3 + $0x9e8] ss:$16 sps:$4 sm:$0xff]  }
 0x22b   : > { %4123 = vmatpush1.bf16.msra.mxu1 %v7911_v33  ;;  %4051 = vmatprep.subr.bf16.mxu0 %v7916_v35  ;;  %v7994_v33 = vld [vmem:[%s11029_s5 + $0x4] ss:$16 sps:$4 sm:$0xff]   ;;  %v7997_v35 = vld [vmem:[%s11029_s5 + $0xc] ss:$16 sps:$4 sm:$0xff]  }
 0x22c   : > { %4124 = vmatprep.subr.bf16.mxu1 %v7919_v37  ;;  %v7992_v37 = vld [vmem:[%s11029_s5] ss:$16 sps:$4 sm:$0xff]  }
 0x22e   : > { %4052 = vmatpush1.bf16.msra.mxu0 %v7914_v1  ;;  %v7995_v1 = vld [vmem:[%s11029_s5 + $0x8] ss:$16 sps:$4 sm:$0xff]  }
 0x22f   : > { %4125 = vmatpush1.bf16.msra.mxu1 %v7917_v2  ;;  %4053 = vmatprep.subr.bf16.mxu0 %v7922_v38  ;;  %v8000_v2 = vld [vmem:[%s11029_s5 + $0x24] ss:$16 sps:$4 sm:$0xff]   ;;  %v8003_v38 = vld [vmem:[%s11029_s5 + $0x2c] ss:$16 sps:$4 sm:$0xff]  }
 0x230   : > { %3527 = vmatmul.mubr.bf16.gmra.mrb[56].mxu0 %v9433_v42  ;;  %4126 = vmatprep.subr.bf16.mxu1 %v7925_v17  ;;  %v7998_v17 = vld [vmem:[%s11029_s5 + $0x20] ss:$16 sps:$4 sm:$0xff]  }
 0x231   : > { %3600 = vmatmul.mubr.bf16.gmra.mrb[56].mxu1 %v9433_v42  ;;  %3536 = vmatprep.mubr.bf16.mxu0 %v9520_v6  ;;  %v7937_v42 = vld [vmem:[%s11027_s3 + $0x8cc] ss:$16 sps:$4 sm:$0xff]  }
 0x232   : > { %3609 = vmatprep.mubr.bf16.mxu1 %v9520_v6  ;;  %4054 = vmatpush1.bf16.msra.mxu0 %v7920_v48  ;;  %v7932_v6 = vld [vmem:[%s11027_s3 + $0x8c0] ss:$16 sps:$4 sm:$0xff]   ;;  %v8001_v48 = vld [vmem:[%s11029_s5 + $0x28] ss:$16 sps:$4 sm:$0xff]  }
 0x233   : > { %4127 = vmatpush1.bf16.msra.mxu1 %v7923_v58  ;;  %4055 = vmatprep.subr.bf16.mxu0 %v7928_v3  ;;  %v8006_v58 = vld [vmem:[%s11029_s5 + $0x44] ss:$16 sps:$4 sm:$0xff]   ;;  %v8007_v3 = vld [vmem:[%s11029_s5 + $0x48] ss:$16 sps:$4 sm:$0xff]  }
 0x234   : > { %4128 = vmatprep.subr.bf16.mxu1 %v7931_v4  ;;  %v8012_v4 = vld [vmem:[%s11029_s5 + $0x64] ss:$16 sps:$4 sm:$0xff]  }
 0x236   : > { %4056 = vmatpush1.bf16.msra.mxu0 %v7926_v40  ;;  %v8015_v40 = vld [vmem:[%s11029_s5 + $0x6c] ss:$16 sps:$4 sm:$0xff]  }
 0x237   : > { %4129 = vmatpush1.bf16.msra.mxu1 %v7929_v43  ;;  %4057 = vmatprep.subr.bf16.mxu0 %v7934_v46  ;;  %v8010_v43 = vld [vmem:[%s11029_s5 + $0x60] ss:$16 sps:$4 sm:$0xff]   ;;  %v8013_v46 = vld [vmem:[%s11029_s5 + $0x68] ss:$16 sps:$4 sm:$0xff]  }
 0x238   : > { %3537 = vmatmul.mubr.bf16.gmra.mrb[60].mxu0 %v9518_v12  ;;  %4130 = vmatprep.subr.bf16.mxu1 %v7937_v42  ;;  %v8018_v42 = vld [vmem:[%s11029_s5 + $0x84] ss:$16 sps:$4 sm:$0xff]  }
 0x239   : > { %3610 = vmatmul.mubr.bf16.gmra.mrb[60].mxu1 %v9518_v12  ;;  %4077 = vmatprep.mubr.bf16.mxu0 %v9304_v44  ;;  %v7949_v12 = vld [vmem:[%s11027_s3 + $0x90c] ss:$16 sps:$4 sm:$0xff]  }
 0x23a   : > { %4058 = vmatpush1.bf16.msra.mxu0 %v7932_v6  ;;  %4150 = vmatprep.mubr.bf16.mxu1 %v9304_v44  ;;  %v7944_v44 = vld [vmem:[%s11027_s3 + $0x900] ss:$16 sps:$4 sm:$0xff]   ;;  %v8019_v6 = vld [vmem:[%s11029_s5 + $0x88] ss:$16 sps:$4 sm:$0xff]  }
 0x23b   : > { %4131 = vmatpush1.bf16.msra.mxu1 %v7935_v22  ;;  %4059 = vmatprep.subr.bf16.mxu0 %v7940_v47  ;;  %v8024_v22 = vld [vmem:[%s11029_s5 + $0xa4] ss:$16 sps:$4 sm:$0xff]   ;;  %v8027_v47 = vld [vmem:[%s11029_s5 + $0xac] ss:$16 sps:$4 sm:$0xff]  }
 0x23c   : > { %4132 = vmatprep.subr.bf16.mxu1 %v7943_v50  ;;  %v8022_v50 = vld [vmem:[%s11029_s5 + $0xa0] ss:$16 sps:$4 sm:$0xff]  }
 0x23e   : > { %4060 = vmatpush1.bf16.msra.mxu0 %v7938_v36  ;;  %v8025_v36 = vld [vmem:[%s11029_s5 + $0xa8] ss:$16 sps:$4 sm:$0xff]  }
 0x23f   : > { %4133 = vmatpush1.bf16.msra.mxu1 %v7941_v56  ;;  %4061 = vmatprep.subr.bf16.mxu0 %v7946_v51  ;;  %v8030_v56 = vld [vmem:[%s11029_s5 + $0xc4] ss:$16 sps:$4 sm:$0xff]   ;;  %v8031_v51 = vld [vmem:[%s11029_s5 + $0xc8] ss:$16 sps:$4 sm:$0xff]  }
 0x240   : > { %4134 = vmatprep.subr.bf16.mxu1 %v7949_v12  ;;  %v8036_v12 = vld [vmem:[%s11029_s5 + $0xe4] ss:$16 sps:$4 sm:$0xff]  }
 0x242   : > { %4062 = vmatpush1.bf16.msra.mxu0 %v7944_v44  ;;  %v8039_v44 = vld [vmem:[%s11029_s5 + $0xec] ss:$16 sps:$4 sm:$0xff]  }
 0x243   : > { %4135 = vmatpush1.bf16.msra.mxu1 %v7947_v45  ;;  %4063 = vmatprep.subr.bf16.mxu0 %v7952_v41  ;;  %v8034_v45 = vld [vmem:[%s11029_s5 + $0xe0] ss:$16 sps:$4 sm:$0xff]   ;;  %v8037_v41 = vld [vmem:[%s11029_s5 + $0xe8] ss:$16 sps:$4 sm:$0xff]  }
 0x244   : > { %4136 = vmatprep.subr.bf16.mxu1 %v7955_v52  ;;  %v8042_v52 = vld [vmem:[%s11029_s5 + $0x104] ss:$16 sps:$4 sm:$0xff]  }
 0x246   : > { %4064 = vmatpush1.bf16.msra.mxu0 %v7950_v53  ;;  %v8040_v53 = vld [vmem:[%s11029_s5 + $0x100] ss:$16 sps:$4 sm:$0xff]  }
 0x247   : > { %4137 = vmatpush1.bf16.msra.mxu1 %v7953_v62  ;;  %4065 = vmatprep.subr.bf16.mxu0 %v7958_v5  ;;  %v8043_v62 = vld [vmem:[%s11029_s5 + $0x108] ss:$16 sps:$4 sm:$0xff]   ;;  %v8048_v5 = vld [vmem:[%s11029_s5 + $0x124] ss:$16 sps:$4 sm:$0xff]  }
 0x248   : > { %4138 = vmatprep.subr.bf16.mxu1 %v7961_v7  ;;  %v8051_v7 = vld [vmem:[%s11029_s5 + $0x12c] ss:$16 sps:$4 sm:$0xff]  }
 0x24a   : > { %4066 = vmatpush1.bf16.msra.mxu0 %v7956_v8  ;;  %v8046_v8 = vld [vmem:[%s11029_s5 + $0x120] ss:$16 sps:$4 sm:$0xff]  }
 0x24b   : > { %4139 = vmatpush1.bf16.msra.mxu1 %v7959_v19  ;;  %4067 = vmatprep.subr.bf16.mxu0 %v7964_v9  ;;  %v8049_v19 = vld [vmem:[%s11029_s5 + $0x128] ss:$16 sps:$4 sm:$0xff]   ;;  %v8054_v9 = vld [vmem:[%s11029_s5 + $0x144] ss:$16 sps:$4 sm:$0xff]  }
 0x24c   : > { %4140 = vmatprep.subr.bf16.mxu1 %v7967_v49  ;;  %v8057_v49 = vld [vmem:[%s11029_s5 + $0x14c] ss:$16 sps:$4 sm:$0xff]  }
 0x24e   : > { %4068 = vmatpush1.bf16.msra.mxu0 %v7962_v14  ;;  %v8052_v14 = vld [vmem:[%s11029_s5 + $0x140] ss:$16 sps:$4 sm:$0xff]  }
 0x24f   : > { %4141 = vmatpush1.bf16.msra.mxu1 %v7965_v15  ;;  %4069 = vmatprep.subr.bf16.mxu0 %v7970_v27  ;;  %v8055_v15 = vld [vmem:[%s11029_s5 + $0x148] ss:$16 sps:$4 sm:$0xff]   ;;  %v8060_v27 = vld [vmem:[%s11029_s5 + $0x164] ss:$16 sps:$4 sm:$0xff]  }
 0x250   : > { %4142 = vmatprep.subr.bf16.mxu1 %v7973_v13  ;;  %v8063_v13 = vld [vmem:[%s11029_s5 + $0x16c] ss:$16 sps:$4 sm:$0xff]  }
 0x252   : > { %4070 = vmatpush1.bf16.msra.mxu0 %v7968_v18  ;;  %v8058_v18 = vld [vmem:[%s11029_s5 + $0x160] ss:$16 sps:$4 sm:$0xff]  }
 0x253   : > { %4143 = vmatpush1.bf16.msra.mxu1 %v7971_v11  ;;  %4071 = vmatprep.subr.bf16.mxu0 %v7976_v20  ;;  %v8061_v11 = vld [vmem:[%s11029_s5 + $0x168] ss:$16 sps:$4 sm:$0xff]   ;;  %v8066_v20 = vld [vmem:[%s11029_s5 + $0x184] ss:$16 sps:$4 sm:$0xff]  }
 0x254   : > { %4144 = vmatprep.subr.bf16.mxu1 %v7979_v21  ;;  %v8069_v21 = vld [vmem:[%s11029_s5 + $0x18c] ss:$16 sps:$4 sm:$0xff]  }
 0x256   : > { %4072 = vmatpush1.bf16.msra.mxu0 %v7974_v23  ;;  %v8064_v23 = vld [vmem:[%s11029_s5 + $0x180] ss:$16 sps:$4 sm:$0xff]  }
 0x257   : > { %4145 = vmatpush1.bf16.msra.mxu1 %v7977_v16  ;;  %4073 = vmatprep.subr.bf16.mxu0 %v7982_v24  ;;  %v8067_v16 = vld [vmem:[%s11029_s5 + $0x188] ss:$16 sps:$4 sm:$0xff]   ;;  %v8072_v24 = vld [vmem:[%s11029_s5 + $0x1a4] ss:$16 sps:$4 sm:$0xff]  }
 0x258   : > { %4146 = vmatprep.subr.bf16.mxu1 %v7985_v26  ;;  %v8075_v26 = vld [vmem:[%s11029_s5 + $0x1ac] ss:$16 sps:$4 sm:$0xff]  }
 0x25a   : > { %4074 = vmatpush1.bf16.msra.mxu0 %v7980_v28  ;;  %v8070_v28 = vld [vmem:[%s11029_s5 + $0x1a0] ss:$16 sps:$4 sm:$0xff]  }
 0x25b   : > { %4147 = vmatpush1.bf16.msra.mxu1 %v7983_v30  ;;  %4075 = vmatprep.subr.bf16.mxu0 %v7988_v31  ;;  %v8073_v30 = vld [vmem:[%s11029_s5 + $0x1a8] ss:$16 sps:$4 sm:$0xff]   ;;  %v8078_v31 = vld [vmem:[%s11029_s5 + $0x1c4] ss:$16 sps:$4 sm:$0xff]  }
 0x25c   : > { %4148 = vmatprep.subr.bf16.mxu1 %v7991_v29  ;;  %v8081_v29 = vld [vmem:[%s11029_s5 + $0x1cc] ss:$16 sps:$4 sm:$0xff]  }
 0x25e   : > { %4076 = vmatpush1.bf16.msra.mxu0 %v7986_v55  ;;  %v8076_v55 = vld [vmem:[%s11029_s5 + $0x1c0] ss:$16 sps:$4 sm:$0xff]  }
 0x25f   : > { %4149 = vmatpush1.bf16.msra.mxu1 %v7989_v25  ;;  %5821 = vmatprep.subr.bf16.mxu0 %v7994_v33  ;;  %v8079_v25 = vld [vmem:[%s11029_s5 + $0x1c8] ss:$16 sps:$4 sm:$0xff]   ;;  %v8084_v33 = vld [vmem:[%s11029_s5 + $0x1e4] ss:$16 sps:$4 sm:$0xff]  }
 0x260   : > { %5985 = vmatprep.subr.bf16.mxu1 %v7997_v35  ;;  %v8087_v35 = vld [vmem:[%s11029_s5 + $0x1ec] ss:$16 sps:$4 sm:$0xff]  }
 0x261   : > { %4078 = vmatmul.mubr.bf16.vlgmr.msra.gmra.mrb[48].mxu0 %v9294_v34 }
 0x262   : > { %4151 = vmatmul.mubr.bf16.vlgmr.msra.gmra.mrb[48].mxu1 %v9294_v34  ;;  %4087 = vmatprep.mubr.bf16.mxu0 %v9389_v10  ;;  %v8009_v34 = vld [vmem:[%s11029_s5 + $0x4c] ss:$16 sps:$4 sm:$0xff]  }
 0x263   : > { %4160 = vmatprep.mubr.bf16.mxu1 %v9389_v10  ;;  %5822 = vmatpush1.bf16.msra.mxu0 %v7992_v37  ;;  %v8004_v10 = vld [vmem:[%s11029_s5 + $0x40] ss:$16 sps:$4 sm:$0xff]  }
 0x264   : > { %5986 = vmatpush1.bf16.msra.mxu1 %v7995_v1  ;;  %5823 = vmatprep.subr.bf16.mxu0 %v8000_v2  ;;  %v8082_v37 = vld [vmem:[%s11029_s5 + $0x1e0] ss:$16 sps:$4 sm:$0xff]   ;;  %v8085_v1 = vld [vmem:[%s11029_s5 + $0x1e8] ss:$16 sps:$4 sm:$0xff]   ;;  %v8090_v2 = vld [vmem:[%s11029_s5 + $0x204] ss:$16 sps:$4 sm:$0xff]  }
 0x265   : > { %5987 = vmatprep.subr.bf16.mxu1 %v8003_v38  ;;  %v8093_v38 = vld [vmem:[%s11029_s5 + $0x20c] ss:$16 sps:$4 sm:$0xff]  }
 0x267   : > { %5824 = vmatpush1.bf16.msra.mxu0 %v7998_v17  ;;  %v1295_v17 = vld [vmem:[%s11028_s4] sm:$0xf] }
 0x268   : > { %5988 = vmatpush1.bf16.msra.mxu1 %v8001_v48  ;;  %5825 = vmatprep.subr.bf16.mxu0 %v8006_v58  ;;  %v10340_v48 = vrot.slane %v1295_v17, %v9079_v60  ;;  %v10343_v58 = vrot.slane %v1295_v17, %v9081_v61 }
 0x269   : > { %4088 = vmatmul.mubr.bf16.gmra.mrb[52].mxu0 %v9382_v59  ;;  %5989 = vmatprep.subr.bf16.mxu1 %v8009_v34  ;;  %v10346_v34 = vrot.slane %v1295_v17, %v9086_v63 }
 0x26a   : > { %4161 = vmatmul.mubr.bf16.gmra.mrb[52].mxu1 %v9382_v59  ;;  %4097 = vmatprep.mubr.bf16.mxu0 %v9476_v39  ;;  %v8021_v59 = vld [vmem:[%s11029_s5 + $0x8c] ss:$16 sps:$4 sm:$0xff]  }
 0x26b   : > { %4170 = vmatprep.mubr.bf16.mxu1 %v9476_v39  ;;  %5826 = vmatpush1.bf16.msra.mxu0 %v8004_v10  ;;  %v8016_v39 = vld [vmem:[%s11029_s5 + $0x80] ss:$16 sps:$4 sm:$0xff]   ;;  %v10349_v10 = vrot.slane %v1295_v17, %v9088_v0 }
 0x26c   : > { %5990 = vmatpush1.bf16.msra.mxu1 %v8007_v3  ;;  %5827 = vmatprep.subr.bf16.mxu0 %v8012_v4 }
 0x26d   : > { %5991 = vmatprep.subr.bf16.mxu1 %v8015_v40 }
 0x26f   : > { %5828 = vmatpush1.bf16.msra.mxu0 %v8010_v43 }
 0x270   : > { %5992 = vmatpush1.bf16.msra.mxu1 %v8013_v46  ;;  %5829 = vmatprep.subr.bf16.mxu0 %v8018_v42 }
 0x271   : > { %4098 = vmatmul.mubr.bf16.gmra.mrb[56].mxu0 %v9472_v32  ;;  %5993 = vmatprep.subr.bf16.mxu1 %v8021_v59 }
 0x272   : > { %4171 = vmatmul.mubr.bf16.gmra.mrb[56].mxu1 %v9472_v32  ;;  %4107 = vmatprep.mubr.bf16.mxu0 %v9571_v54  ;;  %v8033_v32 = vld [vmem:[%s11029_s5 + $0xcc] ss:$16 sps:$4 sm:$0xff]  }
 0x273   : > { %4180 = vmatprep.mubr.bf16.mxu1 %v9571_v54  ;;  %5830 = vmatpush1.bf16.msra.mxu0 %v8016_v39  ;;  %v8028_v54 = vld [vmem:[%s11029_s5 + $0xc0] ss:$16 sps:$4 sm:$0xff]  }
 0x274   : > { %5994 = vmatpush1.bf16.msra.mxu1 %v8019_v6  ;;  %5831 = vmatprep.subr.bf16.mxu0 %v8024_v22 }
 0x275   : > { %5995 = vmatprep.subr.bf16.mxu1 %v8027_v47 }
 0x277   : > { %5832 = vmatpush1.bf16.msra.mxu0 %v8022_v50 }
 0x278   : > { %5996 = vmatpush1.bf16.msra.mxu1 %v8025_v36  ;;  %5833 = vmatprep.subr.bf16.mxu0 %v8030_v56 }
 0x279   : > { %4108 = vmatmul.mubr.bf16.gmra.mrb[60].mxu0 %v9575_v57  ;;  %5997 = vmatprep.subr.bf16.mxu1 %v8033_v32 }
 0x27a   : > { %4181 = vmatmul.mubr.bf16.gmra.mrb[60].mxu1 %v9575_v57  ;;  %v8045_v57 = vld [vmem:[%s11029_s5 + $0x10c] ss:$16 sps:$4 sm:$0xff]  }
 0x27b   : > { %5834 = vmatpush1.bf16.msra.mxu0 %v8028_v54 }
 0x27c   : > { %5998 = vmatpush1.bf16.msra.mxu1 %v8031_v51  ;;  %5835 = vmatprep.subr.bf16.mxu0 %v8036_v12 }
 0x27d   : > { %5999 = vmatprep.subr.bf16.mxu1 %v8039_v44 }
 0x27f   : > { %5836 = vmatpush1.bf16.msra.mxu0 %v8034_v45 }
 0x280   : > { %6000 = vmatpush1.bf16.msra.mxu1 %v8037_v41  ;;  %5837 = vmatprep.subr.bf16.mxu0 %v8042_v52 }
 0x281   : > { %6001 = vmatprep.subr.bf16.mxu1 %v8045_v57 }
 0x283   : > { %5838 = vmatpush1.bf16.msra.mxu0 %v8040_v53 }
 0x284   : > { %6002 = vmatpush1.bf16.msra.mxu1 %v8043_v62  ;;  %5839 = vmatprep.subr.bf16.mxu0 %v8048_v5 }
 0x285   : > { %6003 = vmatprep.subr.bf16.mxu1 %v8051_v7 }
 0x287   : > { %5840 = vmatpush1.bf16.msra.mxu0 %v8046_v8 }
 0x288   : > { %6004 = vmatpush1.bf16.msra.mxu1 %v8049_v19  ;;  %5841 = vmatprep.subr.bf16.mxu0 %v8054_v9 }
 0x289   : > { %6005 = vmatprep.subr.bf16.mxu1 %v8057_v49 }
 0x28b   : > { %5842 = vmatpush1.bf16.msra.mxu0 %v8052_v14 }
 0x28c   : > { %6006 = vmatpush1.bf16.msra.mxu1 %v8055_v15  ;;  %5843 = vmatprep.subr.bf16.mxu0 %v8060_v27 }
 0x28d   : > { %6007 = vmatprep.subr.bf16.mxu1 %v8063_v13 }
 0x28f   : > { %5844 = vmatpush1.bf16.msra.mxu0 %v8058_v18 }
 0x290   : > { %6008 = vmatpush1.bf16.msra.mxu1 %v8061_v11  ;;  %5845 = vmatprep.subr.bf16.mxu0 %v8066_v20 }
 0x291   : > { %6009 = vmatprep.subr.bf16.mxu1 %v8069_v21 }
 0x293   : > { %5846 = vmatpush1.bf16.msra.mxu0 %v8064_v23 }
 0x294   : > { %6010 = vmatpush1.bf16.msra.mxu1 %v8067_v16  ;;  %5847 = vmatprep.subr.bf16.mxu0 %v8072_v24 }
 0x295   : > { %6011 = vmatprep.subr.bf16.mxu1 %v8075_v26 }
 0x297   : > { %5848 = vmatpush1.bf16.msra.mxu0 %v8070_v28  ;;  %v8088_v28 = vld [vmem:[%s11029_s5 + $0x200] ss:$16 sps:$4 sm:$0xff]  }
 0x298   : > { %6012 = vmatpush1.bf16.msra.mxu1 %v8073_v30  ;;  %5849 = vmatprep.subr.bf16.mxu0 %v8078_v31  ;;  %v8091_v30 = vld [vmem:[%s11029_s5 + $0x208] ss:$16 sps:$4 sm:$0xff]  }
 0x299   : > { %6013 = vmatprep.subr.bf16.mxu1 %v8081_v29 }
 0x29b   : > { %5850 = vmatpush1.bf16.msra.mxu0 %v8076_v55  ;;  %v8096_v55 = vld [vmem:[%s11029_s5 + $0x224] ss:$16 sps:$4 sm:$0xff]  }
 0x29c   : > { %6014 = vmatpush1.bf16.msra.mxu1 %v8079_v25  ;;  %5851 = vmatprep.subr.bf16.mxu0 %v8084_v33  ;;  %v8099_v25 = vld [vmem:[%s11029_s5 + $0x22c] ss:$16 sps:$4 sm:$0xff]  }
 0x29d   : > { %6015 = vmatprep.subr.bf16.mxu1 %v8087_v35 }
 0x29f   : > { %5852 = vmatpush1.bf16.msra.mxu0 %v8082_v37 }
 0x2a0   : > { %6016 = vmatpush1.bf16.msra.mxu1 %v8085_v1  ;;  %5862 = vmatprep.subr.bf16.mxu0 %v8090_v2 }
 0x2a1   : > { %6026 = vmatprep.subr.bf16.mxu1 %v8093_v38 }
 0x334   : > { %v4079_v3 = vpop.f32.mrb[48].mxu0 }
 0x335   : > { %v7187_v4 = vadd.f32 %v4079_v3, %v10340_v48  ;;  %v4152_v40 = vpop.f32.mrb[48].mxu1  ;;  %v4081_v43 = vpop.f32.mrb[49].mxu0  ;;  %v8094_v3 = vld [vmem:[%s11029_s5 + $0x220] ss:$16 sps:$4 sm:$0xff]  }
 0x336   : > { %v7203_v46 = vadd.f32 %v4152_v40, %v10343_v58  ;;  %v7188_v42 = vadd.f32 %v4081_v43, %v10346_v34  ;;  %v4154_v59 = vpop.f32.mrb[49].mxu1  ;;  %v4083_v39 = vpop.f32.mrb[50].mxu0 }
 0x337   : > { %v7204_v6 = vadd.f32 %v4154_v59, %v10349_v10  ;;  %v7189_v22 = vadd.f32 %v4083_v39, %v10340_v48  ;;  %v4156_v47 = vpop.f32.mrb[50].mxu1  ;;  %v4085_v50 = vpop.f32.mrb[51].mxu0  ;;  %v8102_v59 = vld [vmem:[%s11029_s5 + $0x244] ss:$16 sps:$4 sm:$0xff]   ;;  %v8105_v39 = vld [vmem:[%s11029_s5 + $0x24c] ss:$16 sps:$4 sm:$0xff]  }
 0x338   : > { %v4223_v36 = vmax.f32 %v7187_v4, %v7203_v46  ;;  %v7205_v56 = vadd.f32 %v4156_v47, %v10343_v58  ;;  %v7190_v32 = vadd.f32 %v4085_v50, %v10346_v34  ;;  %v4158_v54 = vpop.f32.mrb[51].mxu1  ;;  %v8097_v4 = vld [vmem:[%s11029_s5 + $0x228] ss:$16 sps:$4 sm:$0xff]  }
 0x339   : > { %v4224_v51 = vmax.f32 %v7188_v42, %v7204_v6  ;;  %v7206_v12 = vadd.f32 %v4158_v54, %v10349_v10 }
 0x33a   : > { %v4225_v44 = vmax.f32 %v7189_v22, %v7205_v56 }
 0x33b   : > { %v4226_v45 = vmax.f32 %v7190_v32, %v7206_v12 }
 0x33c   : > { %v4239_v41 = vmax.f32 %v4223_v36, %v4225_v44  ;;  %v4089_v52 = vpop.f32.mrb[52].mxu0 }
 0x33d   : > { %v4240_v57 = vmax.f32 %v4224_v51, %v4226_v45  ;;  %v7191_v53 = vadd.f32 %v4089_v52, %v10340_v48  ;;  %v4162_v62 = vpop.f32.mrb[52].mxu1  ;;  %v4091_v5 = vpop.f32.mrb[53].mxu0  ;;  %v8100_v45 = vld [vmem:[%s11029_s5 + $0x240] ss:$16 sps:$4 sm:$0xff]   ;;  %v8103_v52 = vld [vmem:[%s11029_s5 + $0x248] ss:$16 sps:$4 sm:$0xff]  }
 0x33e   : > { %v4247_v7 = vmax.f32 %v4239_v41, 0.0  ;;  %v7207_v8 = vadd.f32 %v4162_v62, %v10343_v58  ;;  %v7192_v19 = vadd.f32 %v4091_v5, %v10346_v34  ;;  %v4164_v9 = vpop.f32.mrb[53].mxu1  ;;  %v4093_v49 = vpop.f32.mrb[54].mxu0  ;;  %v8111_v62 = vld [vmem:[%s11029_s5 + $0x26c] ss:$16 sps:$4 sm:$0xff]  }
 0x33f   : > { %v7208_v14 = vadd.f32 %v4164_v9, %v10349_v10  ;;  %v7193_v15 = vadd.f32 %v4093_v49, %v10340_v48  ;;  %v4166_v27 = vpop.f32.mrb[54].mxu1  ;;  %v4095_v13 = vpop.f32.mrb[55].mxu0  ;;  %v4248_v18 = vmax.f32 %v4240_v57, 0.0 }
 0x340   : > { %v4227_v11 = vmax.f32 %v7191_v53, %v7207_v8  ;;  %v7209_v20 = vadd.f32 %v4166_v27, %v10343_v58  ;;  %v7194_v21 = vadd.f32 %v4095_v13, %v10346_v34  ;;  %v4168_v23 = vpop.f32.mrb[55].mxu1  ;;  %v4255_v31 = vpack.c.bf16 %v4247_v7, %v4247_v7  ;;  %v8108_v53 = vld [vmem:[%s11029_s5 + $0x264] ss:$16 sps:$4 sm:$0xff]   ;;  %v8109_v27 = vld [vmem:[%s11029_s5 + $0x268] ss:$16 sps:$4 sm:$0xff]  }
 0x341   : > { %v4228_v16 = vmax.f32 %v7192_v19, %v7208_v14  ;;  %v7210_v24 = vadd.f32 %v4168_v23, %v10349_v10  ;;  %v4256_v26 = vpack.c.bf16 %v4248_v18, %v4248_v18  ;;  %v8117_v23 = vld [vmem:[%s11029_s5 + $0x28c] ss:$16 sps:$4 sm:$0xff]  }
 0x342   : > { %v4229_v29 = vmax.f32 %v7193_v15, %v7209_v20  ;;  %v8106_v15 = vld [vmem:[%s11029_s5 + $0x260] ss:$16 sps:$4 sm:$0xff]  }
 0x343   : > { %v4230_v33 = vmax.f32 %v7194_v21, %v7210_v24  ;;  %5853 = vmatprep.mubr.bf16.mxu0 %v4256_v26  ;;  %6017 = vmatprep.mubr.bf16.mxu1 %v4256_v26  ;;  %v8114_v21 = vld [vmem:[%s11029_s5 + $0x284] ss:$16 sps:$4 sm:$0xff]  }
 0x344   : > { %v10379_v35 = vmax.f32 %v4227_v11, %v4229_v29  ;;  %5854 = vmatmul.mubr.bf16.vlgmr.msra.gmra.mrb[64].mxu0 %v4255_v31  ;;  %6018 = vmatmul.mubr.bf16.vlgmr.msra.gmra.mrb[64].mxu1 %v4255_v31  ;;  %v4099_v37 = vpop.f32.mrb[56].mxu0 }
 0x345   : > { %v4242_v1 = vmax.f32 %v4228_v16, %v4230_v33  ;;  %5863 = vmatpush1.bf16.msra.mxu0 %v8088_v28  ;;  %6027 = vmatpush1.bf16.msra.mxu1 %v8091_v30  ;;  %v7195_v2 = vadd.f32 %v4099_v37, %v10340_v48  ;;  %v4172_v38 = vpop.f32.mrb[56].mxu1  ;;  %v4101_v17 = vpop.f32.mrb[57].mxu0  ;;  %v8112_v37 = vld [vmem:[%s11029_s5 + $0x280] ss:$16 sps:$4 sm:$0xff]  }
 0x346   : > { %v7211_v40 = vadd.f32 %v4172_v38, %v10343_v58  ;;  %v7196_v43 = vadd.f32 %v4101_v17, %v10346_v34  ;;  %v4174_v46 = vpop.f32.mrb[57].mxu1  ;;  %v4103_v42 = vpop.f32.mrb[58].mxu0  ;;  %5864 = vmatprep.subr.bf16.mxu0 %v8096_v55  ;;  %6028 = vmatprep.subr.bf16.mxu1 %v8099_v25  ;;  %v8118_v17 = vld [vmem:[%s11029_s5 + $0x2a0] ss:$16 sps:$4 sm:$0xff]  }
 0x347   : > { %v7212_v6 = vadd.f32 %v4174_v46, %v10349_v10  ;;  %v7197_v22 = vadd.f32 %v4103_v42, %v10340_v48  ;;  %v4176_v47 = vpop.f32.mrb[58].mxu1  ;;  %v4105_v50 = vpop.f32.mrb[59].mxu0  ;;  %v4250_v36 = vmax.f32 %v4242_v1, 0.0  ;;  %v8127_v46 = vld [vmem:[%s11029_s5 + $0x2c8] ss:$16 sps:$4 sm:$0xff]  }
 0x348   : > { %v4231_v56 = vmax.f32 %v7195_v2, %v7211_v40  ;;  %v7213_v32 = vadd.f32 %v4176_v47, %v10343_v58  ;;  %v7198_v54 = vadd.f32 %v4105_v50, %v10346_v34  ;;  %v4178_v51 = vpop.f32.mrb[59].mxu1  ;;  %v8129_v40 = vld [vmem:[%s11029_s5 + $0x2cc] ss:$16 sps:$4 sm:$0xff]   ;;  %v8132_v42 = vld [vmem:[%s11029_s5 + $0x2e4] ss:$16 sps:$4 sm:$0xff]  }
 0x349   : > { %v4232_v12 = vmax.f32 %v7196_v43, %v7212_v6  ;;  %v7214_v44 = vadd.f32 %v4178_v51, %v10349_v10  ;;  %5865 = vmatpush1.bf16.msra.mxu0 %v8094_v3  ;;  %6029 = vmatpush1.bf16.msra.mxu1 %v8097_v4  ;;  %v4258_v41 = vpack.c.bf16 %v4250_v36, %v4250_v36  ;;  %v8121_v3 = vld [vmem:[%s11029_s5 + $0x2a8] ss:$16 sps:$4 sm:$0xff]   ;;  %v8126_v4 = vld [vmem:[%s11029_s5 + $0x2c4] ss:$16 sps:$4 sm:$0xff]   ;;  %v8124_v43 = vld [vmem:[%s11029_s5 + $0x2c0] ss:$16 sps:$4 sm:$0xff]  }
 0x34a   : > { %v4233_v57 = vmax.f32 %v7197_v22, %v7213_v32  ;;  %5866 = vmatprep.subr.bf16.mxu0 %v8102_v59  ;;  %6030 = vmatprep.subr.bf16.mxu1 %v8105_v39  ;;  %v8135_v59 = vld [vmem:[%s11029_s5 + $0x2ec] ss:$16 sps:$4 sm:$0xff]   ;;  %v8130_v39 = vld [vmem:[%s11029_s5 + $0x2e0] ss:$16 sps:$4 sm:$0xff]   ;;  %v8133_v6 = vld [vmem:[%s11029_s5 + $0x2e8] ss:$16 sps:$4 sm:$0xff]  }
 0x34b   : > { %v4234_v5 = vmax.f32 %v7198_v54, %v7214_v44  ;;  %5894 = vmatprep.mubr.bf16.mxu0 %v4258_v41  ;;  %6058 = vmatprep.mubr.bf16.mxu1 %v4258_v41  ;;  %v8138_v22 = vld [vmem:[%s11029_s5 + $0x304] ss:$16 sps:$4 sm:$0xff]   ;;  %v8141_v47 = vld [vmem:[%s11029_s5 + $0x30c] ss:$16 sps:$4 sm:$0xff]   ;;  %v8136_v50 = vld [vmem:[%s11029_s5 + $0x300] ss:$16 sps:$4 sm:$0xff]  }
 0x34c   : > { %v10413_v7 = vmax.f32 %v4231_v56, %v4233_v57  ;;  %v4109_v8 = vpop.f32.mrb[60].mxu0  ;;  %v8139_v36 = vld [vmem:[%s11029_s5 + $0x308] ss:$16 sps:$4 sm:$0xff]   ;;  %v8144_v56 = vld [vmem:[%s11029_s5 + $0x324] ss:$16 sps:$4 sm:$0xff]  }
 0x34d   : > { %v10415_v19 = vmax.f32 %v4232_v12, %v4234_v5  ;;  %5867 = vmatpush1.bf16.msra.mxu0 %v8100_v45  ;;  %6031 = vmatpush1.bf16.msra.mxu1 %v8103_v52  ;;  %v7199_v9 = vadd.f32 %v4109_v8, %v10340_v48  ;;  %v4182_v49 = vpop.f32.mrb[60].mxu1  ;;  %v4111_v14 = vpop.f32.mrb[61].mxu0  ;;  %v8147_v32 = vld [vmem:[%s11029_s5 + $0x32c] ss:$16 sps:$4 sm:$0xff]   ;;  %v8142_v54 = vld [vmem:[%s11029_s5 + $0x320] ss:$16 sps:$4 sm:$0xff]  }
 0x34e   : > { %v7215_v13 = vadd.f32 %v4182_v49, %v10343_v58  ;;  %v7200_v18 = vadd.f32 %v4111_v14, %v10346_v34  ;;  %v4184_v11 = vpop.f32.mrb[61].mxu1  ;;  %v4113_v20 = vpop.f32.mrb[62].mxu0  ;;  %5868 = vmatprep.subr.bf16.mxu0 %v8108_v53  ;;  %6032 = vmatprep.subr.bf16.mxu1 %v8111_v62  ;;  %v8145_v51 = vld [vmem:[%s11029_s5 + $0x328] ss:$16 sps:$4 sm:$0xff]   ;;  %v8150_v12 = vld [vmem:[%s11029_s5 + $0x344] ss:$16 sps:$4 sm:$0xff]  }
 0x34f   : > { %v7216_v16 = vadd.f32 %v4184_v11, %v10349_v10  ;;  %v7201_v24 = vadd.f32 %v4113_v20, %v10340_v48  ;;  %v4186_v26 = vpop.f32.mrb[62].mxu1  ;;  %v4115_v28 = vpop.f32.mrb[63].mxu0  ;;  %v8115_v48 = vld [vmem:[%s11029_s5 + $0x288] ss:$16 sps:$4 sm:$0xff]   ;;  %v8153_v44 = vld [vmem:[%s11029_s5 + $0x34c] ss:$16 sps:$4 sm:$0xff]  }
 0x350   : > { %v4235_v30 = vmax.f32 %v7199_v9, %v7215_v13  ;;  %v7217_v31 = vadd.f32 %v4186_v26, %v10343_v58  ;;  %v7202_v29 = vadd.f32 %v4115_v28, %v10346_v34  ;;  %v4188_v55 = vpop.f32.mrb[63].mxu1  ;;  %v8120_v58 = vld [vmem:[%s11029_s5 + $0x2a4] ss:$16 sps:$4 sm:$0xff]   ;;  %v8123_v34 = vld [vmem:[%s11029_s5 + $0x2ac] ss:$16 sps:$4 sm:$0xff]   ;;  %v4249_v28 = vmax.f32 %v10379_v35, 0.0 }
 0x351   : > { %v4236_v25 = vmax.f32 %v7200_v18, %v7216_v16  ;;  %v7218_v33 = vadd.f32 %v4188_v55, %v10349_v10  ;;  %5869 = vmatpush1.bf16.msra.mxu0 %v8106_v15  ;;  %6033 = vmatpush1.bf16.msra.mxu1 %v8109_v27  ;;  %v8148_v45 = vld [vmem:[%s11029_s5 + $0x340] ss:$16 sps:$4 sm:$0xff]   ;;  %v8151_v41 = vld [vmem:[%s11029_s5 + $0x348] ss:$16 sps:$4 sm:$0xff]   ;;  %v8156_v52 = vld [vmem:[%s11029_s5 + $0x364] ss:$16 sps:$4 sm:$0xff]  }
 0x352   : > { %v4237_v1 = vmax.f32 %v7201_v24, %v7217_v31  ;;  %5870 = vmatprep.subr.bf16.mxu0 %v8114_v21  ;;  %6034 = vmatprep.subr.bf16.mxu1 %v8117_v23  ;;  %v8159_v57 = vld [vmem:[%s11029_s5 + $0x36c] ss:$16 sps:$4 sm:$0xff]   ;;  %v8154_v53 = vld [vmem:[%s11029_s5 + $0x360] ss:$16 sps:$4 sm:$0xff]   ;;  %v8157_v62 = vld [vmem:[%s11029_s5 + $0x368] ss:$16 sps:$4 sm:$0xff]  }
 0x353   : > { %v4238_v10 = vmax.f32 %v7202_v29, %v7218_v33  ;;  %v8162_v5 = vld [vmem:[%s11029_s5 + $0x384] ss:$16 sps:$4 sm:$0xff]   ;;  %v8165_v8 = vld [vmem:[%s11029_s5 + $0x38c] ss:$16 sps:$4 sm:$0xff]   ;;  %v8160_v9 = vld [vmem:[%s11029_s5 + $0x380] ss:$16 sps:$4 sm:$0xff]  }
 0x354   : > { %v10449_v2 = vmax.f32 %v4235_v30, %v4237_v1  ;;  %v8163_v49 = vld [vmem:[%s11029_s5 + $0x388] ss:$16 sps:$4 sm:$0xff]   ;;  %v8168_v14 = vld [vmem:[%s11029_s5 + $0x3a4] ss:$16 sps:$4 sm:$0xff]   ;;  %v8171_v15 = vld [vmem:[%s11029_s5 + $0x3ac] ss:$16 sps:$4 sm:$0xff]  }
 0x355   : > { %v10451_v38 = vmax.f32 %v4236_v25, %v4238_v10  ;;  %5871 = vmatpush1.bf16.msra.mxu0 %v8112_v37  ;;  %6035 = vmatpush1.bf16.msra.mxu1 %v8115_v48  ;;  %v8166_v27 = vld [vmem:[%s11029_s5 + $0x3a0] ss:$16 sps:$4 sm:$0xff]   ;;  %v8169_v13 = vld [vmem:[%s11029_s5 + $0x3a8] ss:$16 sps:$4 sm:$0xff]   ;;  %v8174_v18 = vld [vmem:[%s11029_s5 + $0x3c4] ss:$16 sps:$4 sm:$0xff]   ;;  %v4257_v25 = vpack.c.bf16 %v4249_v28, %v4249_v28 }
 0x356   : > { %5872 = vmatprep.subr.bf16.mxu0 %v8120_v58  ;;  %6036 = vmatprep.subr.bf16.mxu1 %v8123_v34  ;;  %v8177_v11 = vld [vmem:[%s11029_s5 + $0x3cc] ss:$16 sps:$4 sm:$0xff]   ;;  %v8172_v20 = vld [vmem:[%s11029_s5 + $0x3c0] ss:$16 sps:$4 sm:$0xff]   ;;  %v8175_v21 = vld [vmem:[%s11029_s5 + $0x3c8] ss:$16 sps:$4 sm:$0xff]  }
 0x357   : > { %v8180_v23 = vld [vmem:[%s11029_s5 + $0x3e4] ss:$16 sps:$4 sm:$0xff]   ;;  %v8183_v16 = vld [vmem:[%s11029_s5 + $0x3ec] ss:$16 sps:$4 sm:$0xff]   ;;  %v8178_v24 = vld [vmem:[%s11029_s5 + $0x3e0] ss:$16 sps:$4 sm:$0xff]  }
 0x358   : > { %v8181_v26 = vld [vmem:[%s11029_s5 + $0x3e8] ss:$16 sps:$4 sm:$0xff]   ;;  %v8186_v30 = vld [vmem:[%s11029_s5 + $0x404] ss:$16 sps:$4 sm:$0xff]   ;;  %v8189_v31 = vld [vmem:[%s11029_s5 + $0x40c] ss:$16 sps:$4 sm:$0xff]  }
 0x359   : > { %5873 = vmatpush1.bf16.msra.mxu0 %v8118_v17  ;;  %6037 = vmatpush1.bf16.msra.mxu1 %v8121_v3  ;;  %v4252_v29 = vmax.f32 %v10415_v19, 0.0  ;;  %v8184_v55 = vld [vmem:[%s11029_s5 + $0x400] ss:$16 sps:$4 sm:$0xff]   ;;  %v8187_v35 = vld [vmem:[%s11029_s5 + $0x408] ss:$16 sps:$4 sm:$0xff]  }
 0x35a   : > { %5874 = vmatprep.subr.bf16.mxu0 %v8126_v4  ;;  %6038 = vmatprep.subr.bf16.mxu1 %v8129_v40  ;;  %v8192_v37 = vld [vmem:[%s11029_s5 + $0x424] ss:$16 sps:$4 sm:$0xff]   ;;  %v8195_v19 = vld [vmem:[%s11029_s5 + $0x42c] ss:$16 sps:$4 sm:$0xff]   ;;  %v8190_v48 = vld [vmem:[%s11029_s5 + $0x420] ss:$16 sps:$4 sm:$0xff]  }
 0x35b   : > { %v4260_v33 = vpack.c.bf16 %v4252_v29, %v4252_v29  ;;  %v8193_v1 = vld [vmem:[%s11029_s5 + $0x428] ss:$16 sps:$4 sm:$0xff]   ;;  %v8198_v58 = vld [vmem:[%s11029_s5 + $0x444] ss:$16 sps:$4 sm:$0xff]   ;;  %v8201_v34 = vld [vmem:[%s11029_s5 + $0x44c] ss:$16 sps:$4 sm:$0xff]  }
 0x35c   : > { %v8196_v10 = vld [vmem:[%s11029_s5 + $0x440] ss:$16 sps:$4 sm:$0xff]   ;;  %v8199_v17 = vld [vmem:[%s11029_s5 + $0x448] ss:$16 sps:$4 sm:$0xff]   ;;  %v8204_v3 = vld [vmem:[%s11029_s5 + $0x464] ss:$16 sps:$4 sm:$0xff]  }
 0x35d   : > { %5875 = vmatpush1.bf16.msra.mxu0 %v8124_v43  ;;  %6039 = vmatpush1.bf16.msra.mxu1 %v8127_v46  ;;  %v8207_v4 = vld [vmem:[%s11029_s5 + $0x46c] ss:$16 sps:$4 sm:$0xff]   ;;  %v8202_v40 = vld [vmem:[%s11029_s5 + $0x460] ss:$16 sps:$4 sm:$0xff]   ;;  %v8205_v43 = vld [vmem:[%s11029_s5 + $0x468] ss:$16 sps:$4 sm:$0xff]  }
 0x35e   : > { %5876 = vmatprep.subr.bf16.mxu0 %v8132_v42  ;;  %6040 = vmatprep.subr.bf16.mxu1 %v8135_v59  ;;  %v8210_v46 = vld [vmem:[%s11029_s5 + $0x484] ss:$16 sps:$4 sm:$0xff]   ;;  %v8213_v42 = vld [vmem:[%s11029_s5 + $0x48c] ss:$16 sps:$4 sm:$0xff]   ;;  %v8208_v59 = vld [vmem:[%s11029_s5 + $0x480] ss:$16 sps:$4 sm:$0xff]  }
 0x35f   : > { %v8267_v28 = vld [vmem:[%s11029_s5 + $0x5ac] ss:$16 sps:$4 sm:$0xff]   ;;  %v8270_v29 = vld [vmem:[%s11029_s5 + $0x5c4] ss:$16 sps:$4 sm:$0xff]  }
 0x361   : > { %5877 = vmatpush1.bf16.msra.mxu0 %v8130_v39  ;;  %6041 = vmatpush1.bf16.msra.mxu1 %v8133_v6  ;;  %v8211_v39 = vld [vmem:[%s11029_s5 + $0x488] ss:$16 sps:$4 sm:$0xff]   ;;  %v8216_v6 = vld [vmem:[%s11029_s5 + $0x4a4] ss:$16 sps:$4 sm:$0xff]  }
 0x362   : > { %5878 = vmatprep.subr.bf16.mxu0 %v8138_v22  ;;  %6042 = vmatprep.subr.bf16.mxu1 %v8141_v47  ;;  %v8219_v22 = vld [vmem:[%s11029_s5 + $0x4ac] ss:$16 sps:$4 sm:$0xff]   ;;  %v8214_v47 = vld [vmem:[%s11029_s5 + $0x4a0] ss:$16 sps:$4 sm:$0xff]  }
 0x365   : > { %5879 = vmatpush1.bf16.msra.mxu0 %v8136_v50  ;;  %6043 = vmatpush1.bf16.msra.mxu1 %v8139_v36  ;;  %v8217_v50 = vld [vmem:[%s11029_s5 + $0x4a8] ss:$16 sps:$4 sm:$0xff]   ;;  %v8222_v36 = vld [vmem:[%s11029_s5 + $0x4c4] ss:$16 sps:$4 sm:$0xff]  }
 0x366   : > { %5880 = vmatprep.subr.bf16.mxu0 %v8144_v56  ;;  %6044 = vmatprep.subr.bf16.mxu1 %v8147_v32  ;;  %v8225_v56 = vld [vmem:[%s11029_s5 + $0x4cc] ss:$16 sps:$4 sm:$0xff]   ;;  %v8220_v32 = vld [vmem:[%s11029_s5 + $0x4c0] ss:$16 sps:$4 sm:$0xff]  }
 0x369   : > { %5881 = vmatpush1.bf16.msra.mxu0 %v8142_v54  ;;  %6045 = vmatpush1.bf16.msra.mxu1 %v8145_v51  ;;  %v8223_v54 = vld [vmem:[%s11029_s5 + $0x4c8] ss:$16 sps:$4 sm:$0xff]   ;;  %v8228_v51 = vld [vmem:[%s11029_s5 + $0x4e4] ss:$16 sps:$4 sm:$0xff]  }
 0x36a   : > { %5882 = vmatprep.subr.bf16.mxu0 %v8150_v12  ;;  %6046 = vmatprep.subr.bf16.mxu1 %v8153_v44  ;;  %v8231_v12 = vld [vmem:[%s11029_s5 + $0x4ec] ss:$16 sps:$4 sm:$0xff]   ;;  %v8226_v44 = vld [vmem:[%s11029_s5 + $0x4e0] ss:$16 sps:$4 sm:$0xff]  }
 0x36d   : > { %5883 = vmatpush1.bf16.msra.mxu0 %v8148_v45  ;;  %6047 = vmatpush1.bf16.msra.mxu1 %v8151_v41  ;;  %v8229_v45 = vld [vmem:[%s11029_s5 + $0x4e8] ss:$16 sps:$4 sm:$0xff]   ;;  %v8234_v41 = vld [vmem:[%s11029_s5 + $0x504] ss:$16 sps:$4 sm:$0xff]  }
 0x36e   : > { %5884 = vmatprep.subr.bf16.mxu0 %v8156_v52  ;;  %6048 = vmatprep.subr.bf16.mxu1 %v8159_v57  ;;  %v8237_v52 = vld [vmem:[%s11029_s5 + $0x50c] ss:$16 sps:$4 sm:$0xff]   ;;  %v8232_v57 = vld [vmem:[%s11029_s5 + $0x500] ss:$16 sps:$4 sm:$0xff]  }
 0x371   : > { %5885 = vmatpush1.bf16.msra.mxu0 %v8154_v53  ;;  %6049 = vmatpush1.bf16.msra.mxu1 %v8157_v62  ;;  %v8235_v53 = vld [vmem:[%s11029_s5 + $0x508] ss:$16 sps:$4 sm:$0xff]   ;;  %v8240_v62 = vld [vmem:[%s11029_s5 + $0x524] ss:$16 sps:$4 sm:$0xff]  }
 0x372   : > { %5886 = vmatprep.subr.bf16.mxu0 %v8162_v5  ;;  %6050 = vmatprep.subr.bf16.mxu1 %v8165_v8  ;;  %v8243_v5 = vld [vmem:[%s11029_s5 + $0x52c] ss:$16 sps:$4 sm:$0xff]   ;;  %v8238_v8 = vld [vmem:[%s11029_s5 + $0x520] ss:$16 sps:$4 sm:$0xff]  }
 0x375   : > { %5887 = vmatpush1.bf16.msra.mxu0 %v8160_v9  ;;  %6051 = vmatpush1.bf16.msra.mxu1 %v8163_v49  ;;  %v8241_v9 = vld [vmem:[%s11029_s5 + $0x528] ss:$16 sps:$4 sm:$0xff]   ;;  %v8246_v49 = vld [vmem:[%s11029_s5 + $0x544] ss:$16 sps:$4 sm:$0xff]  }
 0x376   : > { %5888 = vmatprep.subr.bf16.mxu0 %v8168_v14  ;;  %6052 = vmatprep.subr.bf16.mxu1 %v8171_v15  ;;  %v8249_v14 = vld [vmem:[%s11029_s5 + $0x54c] ss:$16 sps:$4 sm:$0xff]   ;;  %v8244_v15 = vld [vmem:[%s11029_s5 + $0x540] ss:$16 sps:$4 sm:$0xff]  }
 0x379   : > { %5889 = vmatpush1.bf16.msra.mxu0 %v8166_v27  ;;  %6053 = vmatpush1.bf16.msra.mxu1 %v8169_v13  ;;  %v8247_v27 = vld [vmem:[%s11029_s5 + $0x548] ss:$16 sps:$4 sm:$0xff]   ;;  %v8252_v13 = vld [vmem:[%s11029_s5 + $0x564] ss:$16 sps:$4 sm:$0xff]  }
 0x37a   : > { %5890 = vmatprep.subr.bf16.mxu0 %v8174_v18  ;;  %6054 = vmatprep.subr.bf16.mxu1 %v8177_v11  ;;  %v8255_v18 = vld [vmem:[%s11029_s5 + $0x56c] ss:$16 sps:$4 sm:$0xff]   ;;  %v8250_v11 = vld [vmem:[%s11029_s5 + $0x560] ss:$16 sps:$4 sm:$0xff]  }
 0x37d   : > { %5891 = vmatpush1.bf16.msra.mxu0 %v8172_v20  ;;  %6055 = vmatpush1.bf16.msra.mxu1 %v8175_v21  ;;  %v8253_v20 = vld [vmem:[%s11029_s5 + $0x568] ss:$16 sps:$4 sm:$0xff]   ;;  %v8258_v21 = vld [vmem:[%s11029_s5 + $0x584] ss:$16 sps:$4 sm:$0xff]  }
 0x37e   : > { %5892 = vmatprep.subr.bf16.mxu0 %v8180_v23  ;;  %6056 = vmatprep.subr.bf16.mxu1 %v8183_v16  ;;  %v8261_v23 = vld [vmem:[%s11029_s5 + $0x58c] ss:$16 sps:$4 sm:$0xff]   ;;  %v8256_v16 = vld [vmem:[%s11029_s5 + $0x580] ss:$16 sps:$4 sm:$0xff]  }
 0x381   : > { %5893 = vmatpush1.bf16.msra.mxu0 %v8178_v24  ;;  %6057 = vmatpush1.bf16.msra.mxu1 %v8181_v26  ;;  %v8259_v24 = vld [vmem:[%s11029_s5 + $0x588] ss:$16 sps:$4 sm:$0xff]   ;;  %v8264_v26 = vld [vmem:[%s11029_s5 + $0x5a4] ss:$16 sps:$4 sm:$0xff]  }
 0x382   : > { %5903 = vmatprep.subr.bf16.mxu0 %v8186_v30  ;;  %6067 = vmatprep.subr.bf16.mxu1 %v8189_v31  ;;  %v8262_v30 = vld [vmem:[%s11029_s5 + $0x5a0] ss:$16 sps:$4 sm:$0xff]   ;;  %v8265_v31 = vld [vmem:[%s11029_s5 + $0x5a8] ss:$16 sps:$4 sm:$0xff]  }
 0x384   : > { %5895 = vmatmul.mubr.bf16.vlgmr.msra.gmra.mrb[64].mxu0 %v4257_v25  ;;  %6059 = vmatmul.mubr.bf16.vlgmr.msra.gmra.mrb[64].mxu1 %v4257_v25  ;;  %v8268_v25 = vld [vmem:[%s11029_s5 + $0x5c0] ss:$16 sps:$4 sm:$0xff]  }
 0x385   : > { %5904 = vmatpush1.bf16.msra.mxu0 %v8184_v55  ;;  %5935 = vmatprep.mubr.bf16.mxu0 %v4260_v33  ;;  %v8273_v55 = vld [vmem:[%s11029_s5 + $0x5cc] ss:$16 sps:$4 sm:$0xff]  }
 0x386   : > { %6068 = vmatpush1.bf16.msra.mxu1 %v8187_v35  ;;  %6099 = vmatprep.mubr.bf16.mxu1 %v4260_v33  ;;  %v8271_v35 = vld [vmem:[%s11029_s5 + $0x5c8] ss:$16 sps:$4 sm:$0xff]   ;;  %v8276_v33 = vld [vmem:[%s11029_s5 + $0x5e4] ss:$16 sps:$4 sm:$0xff]  }
 0x387   : > { %5905 = vmatprep.subr.bf16.mxu0 %v8192_v37  ;;  %6069 = vmatprep.subr.bf16.mxu1 %v8195_v19  ;;  %v8279_v37 = vld [vmem:[%s11029_s5 + $0x5ec] ss:$16 sps:$4 sm:$0xff]   ;;  %v8274_v19 = vld [vmem:[%s11029_s5 + $0x5e0] ss:$16 sps:$4 sm:$0xff]  }
 0x389   : > { %5906 = vmatpush1.bf16.msra.mxu0 %v8190_v48  ;;  %v4251_v48 = vmax.f32 %v10413_v7, 0.0  ;;  %v8280_v7 = vld [vmem:[%s11029_s5 + $0x600] ss:$16 sps:$4 sm:$0xff]  }
 0x38a   : > { %6070 = vmatpush1.bf16.msra.mxu1 %v8193_v1  ;;  %5907 = vmatprep.subr.bf16.mxu0 %v8198_v58  ;;  %v8277_v1 = vld [vmem:[%s11029_s5 + $0x5e8] ss:$16 sps:$4 sm:$0xff]   ;;  %v8282_v58 = vld [vmem:[%s11029_s5 + $0x604] ss:$16 sps:$4 sm:$0xff]  }
 0x38b   : > { %6071 = vmatprep.subr.bf16.mxu1 %v8201_v34  ;;  %v8285_v34 = vld [vmem:[%s11029_s5 + $0x60c] ss:$16 sps:$4 sm:$0xff]  }
 0x38d   : > { %5908 = vmatpush1.bf16.msra.mxu0 %v8196_v10  ;;  %v4254_v10 = vmax.f32 %v10451_v38, 0.0  ;;  %v8291_v38 = vld [vmem:[%s11029_s5 + $0x62c] ss:$16 sps:$4 sm:$0xff]  }
 0x38e   : > { %6072 = vmatpush1.bf16.msra.mxu1 %v8199_v17  ;;  %5909 = vmatprep.subr.bf16.mxu0 %v8204_v3  ;;  %v4259_v17 = vpack.c.bf16 %v4251_v48, %v4251_v48  ;;  %v8283_v3 = vld [vmem:[%s11029_s5 + $0x608] ss:$16 sps:$4 sm:$0xff]   ;;  %v8358_v48 = vld [vmem:[%s11029_s5 + $0x7a0] ss:$16 sps:$4 sm:$0xff]  }
 0x38f   : > { %6073 = vmatprep.subr.bf16.mxu1 %v8207_v4  ;;  %v8288_v4 = vld [vmem:[%s11029_s5 + $0x624] ss:$16 sps:$4 sm:$0xff]  }
 0x391   : > { %5910 = vmatpush1.bf16.msra.mxu0 %v8202_v40  ;;  %v4262_v40 = vpack.c.bf16 %v4254_v10, %v4254_v10  ;;  %v8364_v10 = vld [vmem:[%s11029_s5 + $0x7c0] ss:$16 sps:$4 sm:$0xff]  }
 0x392   : > { %6074 = vmatpush1.bf16.msra.mxu1 %v8205_v43  ;;  %5911 = vmatprep.subr.bf16.mxu0 %v8210_v46  ;;  %v8286_v43 = vld [vmem:[%s11029_s5 + $0x620] ss:$16 sps:$4 sm:$0xff]   ;;  %v8289_v46 = vld [vmem:[%s11029_s5 + $0x628] ss:$16 sps:$4 sm:$0xff]  }
 0x393   : > { %6075 = vmatprep.subr.bf16.mxu1 %v8213_v42  ;;  %v8294_v42 = vld [vmem:[%s11029_s5 + $0x644] ss:$16 sps:$4 sm:$0xff]  }
 0x395   : > { %5912 = vmatpush1.bf16.msra.mxu0 %v8208_v59  ;;  %v8297_v59 = vld [vmem:[%s11029_s5 + $0x64c] ss:$16 sps:$4 sm:$0xff]  }
 0x396   : > { %6076 = vmatpush1.bf16.msra.mxu1 %v8211_v39  ;;  %5913 = vmatprep.subr.bf16.mxu0 %v8216_v6  ;;  %v8292_v39 = vld [vmem:[%s11029_s5 + $0x640] ss:$16 sps:$4 sm:$0xff]   ;;  %v8295_v6 = vld [vmem:[%s11029_s5 + $0x648] ss:$16 sps:$4 sm:$0xff]  }
 0x397   : > { %6077 = vmatprep.subr.bf16.mxu1 %v8219_v22  ;;  %v8300_v22 = vld [vmem:[%s11029_s5 + $0x664] ss:$16 sps:$4 sm:$0xff]  }
 0x399   : > { %5914 = vmatpush1.bf16.msra.mxu0 %v8214_v47  ;;  %v8303_v47 = vld [vmem:[%s11029_s5 + $0x66c] ss:$16 sps:$4 sm:$0xff]  }
 0x39a   : > { %6078 = vmatpush1.bf16.msra.mxu1 %v8217_v50  ;;  %5915 = vmatprep.subr.bf16.mxu0 %v8222_v36  ;;  %v8298_v50 = vld [vmem:[%s11029_s5 + $0x660] ss:$16 sps:$4 sm:$0xff]   ;;  %v8301_v36 = vld [vmem:[%s11029_s5 + $0x668] ss:$16 sps:$4 sm:$0xff]  }
 0x39b   : > { %6079 = vmatprep.subr.bf16.mxu1 %v8225_v56  ;;  %v8306_v56 = vld [vmem:[%s11029_s5 + $0x684] ss:$16 sps:$4 sm:$0xff]  }
 0x39d   : > { %5916 = vmatpush1.bf16.msra.mxu0 %v8220_v32  ;;  %v8309_v32 = vld [vmem:[%s11029_s5 + $0x68c] ss:$16 sps:$4 sm:$0xff]  }
 0x39e   : > { %6080 = vmatpush1.bf16.msra.mxu1 %v8223_v54  ;;  %5917 = vmatprep.subr.bf16.mxu0 %v8228_v51  ;;  %v8304_v54 = vld [vmem:[%s11029_s5 + $0x680] ss:$16 sps:$4 sm:$0xff]   ;;  %v8307_v51 = vld [vmem:[%s11029_s5 + $0x688] ss:$16 sps:$4 sm:$0xff]  }
 0x39f   : > { %6081 = vmatprep.subr.bf16.mxu1 %v8231_v12  ;;  %v8312_v12 = vld [vmem:[%s11029_s5 + $0x6a4] ss:$16 sps:$4 sm:$0xff]  }
 0x3a1   : > { %5918 = vmatpush1.bf16.msra.mxu0 %v8226_v44  ;;  %v8315_v44 = vld [vmem:[%s11029_s5 + $0x6ac] ss:$16 sps:$4 sm:$0xff]  }
 0x3a2   : > { %6082 = vmatpush1.bf16.msra.mxu1 %v8229_v45  ;;  %5919 = vmatprep.subr.bf16.mxu0 %v8234_v41  ;;  %v8310_v45 = vld [vmem:[%s11029_s5 + $0x6a0] ss:$16 sps:$4 sm:$0xff]   ;;  %v8313_v41 = vld [vmem:[%s11029_s5 + $0x6a8] ss:$16 sps:$4 sm:$0xff]  }
 0x3a3   : > { %6083 = vmatprep.subr.bf16.mxu1 %v8237_v52  ;;  %v8318_v52 = vld [vmem:[%s11029_s5 + $0x6c4] ss:$16 sps:$4 sm:$0xff]  }
 0x3a5   : > { %5920 = vmatpush1.bf16.msra.mxu0 %v8232_v57  ;;  %v8321_v57 = vld [vmem:[%s11029_s5 + $0x6cc] ss:$16 sps:$4 sm:$0xff]  }
 0x3a6   : > { %6084 = vmatpush1.bf16.msra.mxu1 %v8235_v53  ;;  %5921 = vmatprep.subr.bf16.mxu0 %v8240_v62  ;;  %v8316_v53 = vld [vmem:[%s11029_s5 + $0x6c0] ss:$16 sps:$4 sm:$0xff]   ;;  %v8319_v62 = vld [vmem:[%s11029_s5 + $0x6c8] ss:$16 sps:$4 sm:$0xff]  }
 0x3a7   : > { %6085 = vmatprep.subr.bf16.mxu1 %v8243_v5  ;;  %v8324_v5 = vld [vmem:[%s11029_s5 + $0x6e4] ss:$16 sps:$4 sm:$0xff]  }
 0x3a9   : > { %5922 = vmatpush1.bf16.msra.mxu0 %v8238_v8  ;;  %v8327_v8 = vld [vmem:[%s11029_s5 + $0x6ec] ss:$16 sps:$4 sm:$0xff]  }
 0x3aa   : > { %6086 = vmatpush1.bf16.msra.mxu1 %v8241_v9  ;;  %5923 = vmatprep.subr.bf16.mxu0 %v8246_v49  ;;  %v8322_v9 = vld [vmem:[%s11029_s5 + $0x6e0] ss:$16 sps:$4 sm:$0xff]   ;;  %v8325_v49 = vld [vmem:[%s11029_s5 + $0x6e8] ss:$16 sps:$4 sm:$0xff]  }
 0x3ab   : > { %6087 = vmatprep.subr.bf16.mxu1 %v8249_v14  ;;  %v8330_v14 = vld [vmem:[%s11029_s5 + $0x704] ss:$16 sps:$4 sm:$0xff]  }
 0x3ad   : > { %5924 = vmatpush1.bf16.msra.mxu0 %v8244_v15  ;;  %v8333_v15 = vld [vmem:[%s11029_s5 + $0x70c] ss:$16 sps:$4 sm:$0xff]  }
 0x3ae   : > { %6088 = vmatpush1.bf16.msra.mxu1 %v8247_v27  ;;  %5925 = vmatprep.subr.bf16.mxu0 %v8252_v13  ;;  %v8328_v27 = vld [vmem:[%s11029_s5 + $0x700] ss:$16 sps:$4 sm:$0xff]   ;;  %v8331_v13 = vld [vmem:[%s11029_s5 + $0x708] ss:$16 sps:$4 sm:$0xff]  }
 0x3af   : > { %6089 = vmatprep.subr.bf16.mxu1 %v8255_v18  ;;  %v8336_v18 = vld [vmem:[%s11029_s5 + $0x724] ss:$16 sps:$4 sm:$0xff]  }
 0x3b1   : > { %5926 = vmatpush1.bf16.msra.mxu0 %v8250_v11  ;;  %v8339_v11 = vld [vmem:[%s11029_s5 + $0x72c] ss:$16 sps:$4 sm:$0xff]  }
 0x3b2   : > { %6090 = vmatpush1.bf16.msra.mxu1 %v8253_v20  ;;  %5927 = vmatprep.subr.bf16.mxu0 %v8258_v21  ;;  %v8334_v20 = vld [vmem:[%s11029_s5 + $0x720] ss:$16 sps:$4 sm:$0xff]   ;;  %v8337_v21 = vld [vmem:[%s11029_s5 + $0x728] ss:$16 sps:$4 sm:$0xff]  }
 0x3b3   : > { %6091 = vmatprep.subr.bf16.mxu1 %v8261_v23  ;;  %v8342_v23 = vld [vmem:[%s11029_s5 + $0x744] ss:$16 sps:$4 sm:$0xff]  }
 0x3b5   : > { %5928 = vmatpush1.bf16.msra.mxu0 %v8256_v16  ;;  %v8345_v16 = vld [vmem:[%s11029_s5 + $0x74c] ss:$16 sps:$4 sm:$0xff]  }
 0x3b6   : > { %6092 = vmatpush1.bf16.msra.mxu1 %v8259_v24  ;;  %5929 = vmatprep.subr.bf16.mxu0 %v8264_v26  ;;  %v8340_v24 = vld [vmem:[%s11029_s5 + $0x740] ss:$16 sps:$4 sm:$0xff]   ;;  %v8343_v26 = vld [vmem:[%s11029_s5 + $0x748] ss:$16 sps:$4 sm:$0xff]  }
 0x3b7   : > { %6093 = vmatprep.subr.bf16.mxu1 %v8267_v28  ;;  %v8348_v28 = vld [vmem:[%s11029_s5 + $0x764] ss:$16 sps:$4 sm:$0xff]  }
 0x3b9   : > { %5930 = vmatpush1.bf16.msra.mxu0 %v8262_v30  ;;  %v8351_v30 = vld [vmem:[%s11029_s5 + $0x76c] ss:$16 sps:$4 sm:$0xff]  }
 0x3ba   : > { %6094 = vmatpush1.bf16.msra.mxu1 %v8265_v31  ;;  %5931 = vmatprep.subr.bf16.mxu0 %v8270_v29  ;;  %v8346_v31 = vld [vmem:[%s11029_s5 + $0x760] ss:$16 sps:$4 sm:$0xff]   ;;  %v8349_v29 = vld [vmem:[%s11029_s5 + $0x768] ss:$16 sps:$4 sm:$0xff]  }
 0x3bb   : > { %6095 = vmatprep.subr.bf16.mxu1 %v8273_v55  ;;  %v8354_v55 = vld [vmem:[%s11029_s5 + $0x784] ss:$16 sps:$4 sm:$0xff]  }
 0x3bd   : > { %5932 = vmatpush1.bf16.msra.mxu0 %v8268_v25  ;;  %v8357_v25 = vld [vmem:[%s11029_s5 + $0x78c] ss:$16 sps:$4 sm:$0xff]  }
 0x3be   : > { %6096 = vmatpush1.bf16.msra.mxu1 %v8271_v35  ;;  %5933 = vmatprep.subr.bf16.mxu0 %v8276_v33  ;;  %v8352_v35 = vld [vmem:[%s11029_s5 + $0x780] ss:$16 sps:$4 sm:$0xff]   ;;  %v8355_v33 = vld [vmem:[%s11029_s5 + $0x788] ss:$16 sps:$4 sm:$0xff]  }
 0x3bf   : > { %6097 = vmatprep.subr.bf16.mxu1 %v8279_v37  ;;  %v8360_v37 = vld [vmem:[%s11029_s5 + $0x7a4] ss:$16 sps:$4 sm:$0xff]  }
 0x3c1   : > { %5934 = vmatpush1.bf16.msra.mxu0 %v8274_v19  ;;  %v8363_v19 = vld [vmem:[%s11029_s5 + $0x7ac] ss:$16 sps:$4 sm:$0xff]  }
 0x3c2   : > { %6098 = vmatpush1.bf16.msra.mxu1 %v8277_v1  ;;  %5944 = vmatprep.subr.bf16.mxu0 %v8282_v58  ;;  %v8361_v1 = vld [vmem:[%s11029_s5 + $0x7a8] ss:$16 sps:$4 sm:$0xff]   ;;  %v8366_v58 = vld [vmem:[%s11029_s5 + $0x7c4] ss:$16 sps:$4 sm:$0xff]  }
 0x3c3   : > { %6108 = vmatprep.subr.bf16.mxu1 %v8285_v34  ;;  %v8369_v34 = vld [vmem:[%s11029_s5 + $0x7cc] ss:$16 sps:$4 sm:$0xff]  }
 0x3c4   : > { %5936 = vmatmul.mubr.bf16.vlgmr.msra.gmra.mrb[64].mxu0 %v4259_v17 }
 0x3c5   : > { %6100 = vmatmul.mubr.bf16.vlgmr.msra.gmra.mrb[64].mxu1 %v4259_v17  ;;  %5945 = vmatpush1.bf16.msra.mxu0 %v8280_v7  ;;  %v8367_v7 = vld [vmem:[%s11029_s5 + $0x7c8] ss:$16 sps:$4 sm:$0xff]   ;;  %v8372_v17 = vld [vmem:[%s11029_s5 + $0x7e4] ss:$16 sps:$4 sm:$0xff]  }
 0x3c6   : > { %5976 = vmatprep.mubr.bf16.mxu0 %v4262_v40  ;;  %6109 = vmatpush1.bf16.msra.mxu1 %v8283_v3  ;;  %v8375_v3 = vld [vmem:[%s11029_s5 + $0x7ec] ss:$16 sps:$4 sm:$0xff]  }
 0x3c7   : > { %6140 = vmatprep.mubr.bf16.mxu1 %v4262_v40  ;;  %5946 = vmatprep.subr.bf16.mxu0 %v8288_v4  ;;  %v8370_v4 = vld [vmem:[%s11029_s5 + $0x7e0] ss:$16 sps:$4 sm:$0xff]   ;;  %v4253_v40 = vmax.f32 %v10449_v2, 0.0 }
 0x3c8   : > { %6110 = vmatprep.subr.bf16.mxu1 %v8291_v38  ;;  %v8373_v38 = vld [vmem:[%s11029_s5 + $0x7e8] ss:$16 sps:$4 sm:$0xff]  }
 0x3c9   : > { %5947 = vmatpush1.bf16.msra.mxu0 %v8286_v43  ;;  %v4261_v43 = vpack.c.bf16 %v4253_v40, %v4253_v40 }
 0x3ca   : > { %6111 = vmatpush1.bf16.msra.mxu1 %v8289_v46  ;;  %5948 = vmatprep.subr.bf16.mxu0 %v8294_v42  ;;  %v4519_v46 = vld [vmem:[%s11030_s6] sm:$0xf] }
 0x3cb   : > { %6112 = vmatprep.subr.bf16.mxu1 %v8297_v59  ;;  %v4524_v2 = vrot.slane %v4519_v46, %v9079_v60  ;;  %v4532_v42 = vrot.slane %v4519_v46, %v9081_v61  ;;  %v4528_v59 = vrot.slane %v4519_v46, %v9086_v63 }
 0x3cd   : > { %5949 = vmatpush1.bf16.msra.mxu0 %v8292_v39  ;;  %v4536_v39 = vrot.slane %v4519_v46, %v9088_v0 }
 0x3ce   : > { %6113 = vmatpush1.bf16.msra.mxu1 %v8295_v6  ;;  %5950 = vmatprep.subr.bf16.mxu0 %v8300_v22 }
 0x3cf   : > { %6114 = vmatprep.subr.bf16.mxu1 %v8303_v47 }
 0x3d1   : > { %5951 = vmatpush1.bf16.msra.mxu0 %v8298_v50 }
 0x3d2   : > { %6115 = vmatpush1.bf16.msra.mxu1 %v8301_v36  ;;  %5952 = vmatprep.subr.bf16.mxu0 %v8306_v56 }
 0x3d3   : > { %6116 = vmatprep.subr.bf16.mxu1 %v8309_v32 }
 0x3d5   : > { %5953 = vmatpush1.bf16.msra.mxu0 %v8304_v54 }
 0x3d6   : > { %6117 = vmatpush1.bf16.msra.mxu1 %v8307_v51  ;;  %5954 = vmatprep.subr.bf16.mxu0 %v8312_v12 }
 0x3d7   : > { %6118 = vmatprep.subr.bf16.mxu1 %v8315_v44 }
 0x3d9   : > { %5955 = vmatpush1.bf16.msra.mxu0 %v8310_v45 }
 0x3da   : > { %6119 = vmatpush1.bf16.msra.mxu1 %v8313_v41  ;;  %5956 = vmatprep.subr.bf16.mxu0 %v8318_v52 }
 0x3db   : > { %6120 = vmatprep.subr.bf16.mxu1 %v8321_v57 }
 0x3dd   : > { %5957 = vmatpush1.bf16.msra.mxu0 %v8316_v53 }
 0x3de   : > { %6121 = vmatpush1.bf16.msra.mxu1 %v8319_v62  ;;  %5958 = vmatprep.subr.bf16.mxu0 %v8324_v5 }
 0x3df   : > { %6122 = vmatprep.subr.bf16.mxu1 %v8327_v8 }
 0x3e1   : > { %5959 = vmatpush1.bf16.msra.mxu0 %v8322_v9 }
 0x3e2   : > { %6123 = vmatpush1.bf16.msra.mxu1 %v8325_v49  ;;  %5960 = vmatprep.subr.bf16.mxu0 %v8330_v14 }
 0x3e3   : > { %6124 = vmatprep.subr.bf16.mxu1 %v8333_v15 }
 0x3e5   : > { %5961 = vmatpush1.bf16.msra.mxu0 %v8328_v27 }
 0x3e6   : > { %6125 = vmatpush1.bf16.msra.mxu1 %v8331_v13  ;;  %5962 = vmatprep.subr.bf16.mxu0 %v8336_v18 }
 0x3e7   : > { %6126 = vmatprep.subr.bf16.mxu1 %v8339_v11 }
 0x3e9   : > { %5963 = vmatpush1.bf16.msra.mxu0 %v8334_v20 }
 0x3ea   : > { %6127 = vmatpush1.bf16.msra.mxu1 %v8337_v21  ;;  %5964 = vmatprep.subr.bf16.mxu0 %v8342_v23 }
 0x3eb   : > { %6128 = vmatprep.subr.bf16.mxu1 %v8345_v16 }
 0x3ed   : > { %5965 = vmatpush1.bf16.msra.mxu0 %v8340_v24 }
 0x3ee   : > { %6129 = vmatpush1.bf16.msra.mxu1 %v8343_v26  ;;  %5966 = vmatprep.subr.bf16.mxu0 %v8348_v28 }
 0x3ef   : > { %6130 = vmatprep.subr.bf16.mxu1 %v8351_v30 }
 0x3f1   : > { %5967 = vmatpush1.bf16.msra.mxu0 %v8346_v31 }
 0x3f2   : > { %6131 = vmatpush1.bf16.msra.mxu1 %v8349_v29  ;;  %5968 = vmatprep.subr.bf16.mxu0 %v8354_v55 }
 0x3f3   : > { %6132 = vmatprep.subr.bf16.mxu1 %v8357_v25 }
 0x3f5   : > { %5969 = vmatpush1.bf16.msra.mxu0 %v8352_v35 }
 0x3f6   : > { %6133 = vmatpush1.bf16.msra.mxu1 %v8355_v33  ;;  %5970 = vmatprep.subr.bf16.mxu0 %v8360_v37 }
 0x3f7   : > { %6134 = vmatprep.subr.bf16.mxu1 %v8363_v19 }
 0x3f9   : > { %5971 = vmatpush1.bf16.msra.mxu0 %v8358_v48 }
 0x3fa   : > { %6135 = vmatpush1.bf16.msra.mxu1 %v8361_v1  ;;  %5972 = vmatprep.subr.bf16.mxu0 %v8366_v58 }
 0x3fb   : > { %6136 = vmatprep.subr.bf16.mxu1 %v8369_v34 }
 0x3fd   : > { %5973 = vmatpush1.bf16.msra.mxu0 %v8364_v10 }
 0x3fe   : > { %6137 = vmatpush1.bf16.msra.mxu1 %v8367_v7  ;;  %5974 = vmatprep.subr.bf16.mxu0 %v8372_v17 }
 0x3ff   : > { %6138 = vmatprep.subr.bf16.mxu1 %v8375_v3 }
 0x401   : > { %5975 = vmatpush1.bf16.msra.mxu0 %v8370_v4 }
 0x402   : > { %6139 = vmatpush1.bf16.msra.mxu1 %v8373_v38 }
 0x404   : > { %5977 = vmatmul.mubr.bf16.vlgmr.msra.gmra.mrb[64].mxu0 %v4261_v43 }
 0x405   : > { %6141 = vmatmul.mubr.bf16.vlgmr.msra.gmra.mrb[64].mxu1 %v4261_v43 }
 0x4d7   : > { %v5978_v6 = vpop.f32.mrb[64].mxu0 }
 0x4d8   : > { %v7219_v22 = vadd.f32 %v5978_v6, %v4524_v2  ;;  %v6142_v47 = vpop.f32.mrb[64].mxu1  ;;  %v5980_v50 = vpop.f32.mrb[65].mxu0 }
 0x4d9   : > { %v7221_v36 = vadd.f32 %v6142_v47, %v4532_v42  ;;  %v7220_v56 = vadd.f32 %v5980_v50, %v4528_v59  ;;  %v6144_v32 = vpop.f32.mrb[65].mxu1  ;;  %v5982_v60 = vpop.f32.mrb[66].mxu0 }
 0x4da   : > { %6149 = vst [vmem:[%s390_s17] sm:$0xff] %v7219_v22  ;;  %v7222_v61 = vadd.f32 %v6144_v32, %v4536_v39  ;;  %v6146_v54 = vpop.f32.mrb[66].mxu1  ;;  %v5983_v63 = vpop.f32.mrb[67].mxu0 }
 0x4db   : > { %6151 = vst [vmem:[%s390_s17 + $0x10] sm:$0xff] %v7221_v36  ;;  %6150 = vst [vmem:[%s390_s17 + $0x8] sm:$0xff] %v7220_v56  ;;  %v6147_v0 = vpop.f32.mrb[67].mxu1 }
 0x4dc   : > { %6152 = vst [vmem:[%s390_s17 + $0x18] sm:$0xff] %v7222_v61 }
 0x4dd   : > { %8389 = shalt.err (!%p8386_p5)
}
 0x4de   : > { %s8390_s29 = scalar_lea.hbm %s10981_s22, 512  ;;  %s8394_s14 = scalar_lea.hbm %s11031_s7, 1536 }
 0x4df   : > { %p8391_p7 = scmp.ne.s32.totalorder %s10981_s22, %s8390_s29  ;;  %p8395_p11 = scmp.lt.u32.totalorder %s10981_s22, %s11031_s7 }
 0x4e0   : > { %p8396_p12 = scmp.lt.u32.totalorder %s8394_s14, %s8390_s29  ;;  %p8398_p0 = scmp.lt.u32.totalorder %s8390_s29, %s10981_s22 }
 0x4e1   : > { %p8392_p9 = pnand %p8391_p7, %p8519_p6 }
 0x4e2   : > { %p8397_p13 = por %p8396_p12, %p8395_p11 }
 0x4e3   : > { %p8393_p10 = pneg %p8392_p9 }
 0x4e4   : > { %p8399_p1 = por %p8398_p0, %p8397_p13 }
 0x4e6   : > { %p8400_p2 = pnand %p8399_p1, %p8393_p10 }
 0x4e8   : > { %8403 = shalt.err (!%p8400_p2)
}
 0x4e9   : > { %7377 = dma.vmem_to_hbm [thread:$0]  (%p8519_p6), %s10983_s19, 512, %s10981_s22, %s6154_s28  }
 0x4ea PF: > { %p7383_p3 = scmp.ge.s32.totalorder %s8438_s27, 2  ;;  %s6180_s20 = sand.u32 1, %s8426_s24  }
 0x4eb   : > { %s6181_s21 = scalar_lea.sflag [#allocation4], %s6180_s20 }
 0x4ec   : > { %p7380_p4 = pnand %p7383_p3, %p8523_p8 }
 0x4ee   : > { %8421 = dma.done.wait (!%p7380_p4), %s6181_s21, 512  }
 0x4ef   : > { %8423 = vsyncadd (!%p7380_p4), %s6181_s21, 4294966784  ;;  %p17_p5 = scmp.ge.s32.totalorder %s8504_s30, 5   ;;  %s11034_s24 = smov %s8430_s25 }
 0x4f0   : > { %s11035_s25 = smov %s8434_s26  ;;  %s11036_s26 = smov %s8517_s10 }
 0x4f1   : > { %s11037_s27 = smov %s8504_s30  ;;  %19 = sbr.rel (!%p17_p5) target bundleno = 3 (0x3), region = 115 }
 0x4f8   :  { %6186 = vsyncpa [#allocation4], 1 }
 0x4f9   :  { %6188 = vsyncpa [#allocation4 + $0x1], 1 }

</bundles_post_ra>
